<compile_context>
chip_gen: v5e
topology: v5e:2x2
jax: 0.10.0
libtpu: 0.0.40
codegen_flags: <defaults>
</compile_context>

<pallas_src>
import functools
import math

import numpy as np

import jax
import jax.numpy as jnp
from jax import lax
from jax.experimental import pallas as pl
from jax.experimental.pallas import tpu as pltpu


def _conv_block3d_kernel(x_ref, w1_ref, b1_ref, w2_ref, b2_ref, o_ref, y1p_ref,
                         *, D, K):
    # x_ref  : (D + 2p, H*W*Cin)        depth-padded input slab, one batch elem
    # w1_ref : (K, H*W*Cin,  H*W*Cout)  H/W-Toeplitz weights, layer 1
    # b1_ref : (1, H*W*Cout)
    # w2_ref : (K, H*W*Cout, H*W*Cout)  H/W-Toeplitz weights, layer 2
    # b2_ref : (1, H*W*Cout)
    # o_ref  : (D, H*W*Cout)            lane-dense output slab (512 lanes)
    # y1p_ref: (D + 2p, H*W*Cout) f32   VMEM scratch: layer-1 act + depth halo
    LC2 = o_ref.shape[-1]
    p = K // 2
    zero_row = jnp.zeros((1, LC2), jnp.float32)

    def conv_relu(src_ref, w_ref, b_ref):
        # One accumulating MXU dot per depth tap; contraction = H*W*C lanes.
        acc = jnp.dot(src_ref[pl.ds(0, D), :], w_ref[0],
                      preferred_element_type=jnp.float32)
        for kd in range(1, K):
            acc = acc + jnp.dot(src_ref[pl.ds(kd, D), :], w_ref[kd],
                                preferred_element_type=jnp.float32)
        return jnp.maximum(acc + b_ref[...], 0.0)           # (D, H*W*Cout)

    # Depth halo for layer 2: zero ONLY the 2*p border rows (cheap, and safe
    # under any grid->core split).  Interior rows are fully overwritten below
    # every grid step -- keep that invariant if the staging layout changes.
    for r in range(p):
        y1p_ref[pl.ds(r, 1), :] = zero_row
        y1p_ref[pl.ds(D + 2 * p - 1 - r, 1), :] = zero_row

    # ---------------- layer 1: conv3d + ReLU (stays in VMEM) ----------------
    y1p_ref[pl.ds(p, D), :] = conv_relu(x_ref, w1_ref, b1_ref)

    # ---------------- layer 2: conv3d + ReLU (lane-dense store) -------------
    o_ref[...] = conv_relu(y1p_ref, w2_ref, b2_ref).astype(o_ref.dtype)


def _axis_toeplitz_onehot(size, K):
    """(K, size_in, size_out) 0/1 matrix: m[k, i, o] = 1 iff i == o + k - K//2."""
    pad = K // 2
    m = np.zeros((K, size, size), np.float32)
    for k in range(K):
        for o in range(size):
            i = o + k - pad
            if 0 <= i < size:
                m[k, i, o] = 1.0
    return m


def _toeplitz_weight_hw(w_kkkio, H, W):
    """(K,K,K,Cin,Cout) conv weights -> (K, H*W*Cin, H*W*Cout) Toeplitz mats.

    wt[kd, (hi*W+wi)*Cin+ci, (ho*W+wo)*Cout+co] =
        w[kd, hi-ho+K//2, wi-wo+K//2, ci, co]   (0 if the kh/kw tap is OOB),
    so the kernel contracts over (h_in, w_in, cin) per depth tap and the H/W
    "same" boundaries are handled by zero rows (input needs no H/W padding).
    """
    K = w_kkkio.shape[0]
    Cin, Cout = w_kkkio.shape[3], w_kkkio.shape[4]
    mh = jnp.asarray(_axis_toeplitz_onehot(H, K))   # (K, H_in, H_out)
    mw = jnp.asarray(_axis_toeplitz_onehot(W, K))   # (K, W_in, W_out)
    wt = jnp.einsum("ahy,bwz,dabio->dhwiyzo", mh, mw, w_kkkio)
    return wt.reshape(K, H * W * Cin, H * W * Cout)


def prepare_params(params, H, W):
    """One-time weight/bias preparation -- keep this OUT of the forward path."""
    Cout = params["w1"].shape[-1]
    return {
        "w1t": _toeplitz_weight_hw(params["w1"], H, W),             # (K, HWCin, HWCout)
        "b1t": jnp.tile(params["b1"], H * W).reshape(1, H * W * Cout),
        "w2t": _toeplitz_weight_hw(params["w2"], H, W),             # (K, HWCout, HWCout)
        "b2t": jnp.tile(params["b2"], H * W).reshape(1, H * W * Cout),
    }


def conv_block_3d(x_ncdhw, prepared):
    """Forward of ConvBlock3D (conv3d->relu->conv3d->relu); NCDHW in/out."""
    N, Cin, D, H, W = x_ncdhw.shape
    w1t, b1t = prepared["w1t"], prepared["b1t"]
    w2t, b2t = prepared["w2t"], prepared["b2t"]
    K, LC1, LC2 = w1t.shape
    Cout = LC2 // (H * W)
    p = K // 2
    Dp = D + 2 * p

    # NCDHW -> (N, D, H*W*Cin) lane-dense slabs; pad ONLY the depth axis
    # (H/W "same" boundaries are zero rows inside the Toeplitz weights).
    x = jnp.transpose(x_ncdhw, (0, 2, 3, 4, 1)).reshape(N, D, H * W * Cin)
    x = jnp.pad(x, ((0, 0), (p, p), (0, 0)))

    kernel = functools.partial(_conv_block3d_kernel, D=D, K=K)

    out = pl.pallas_call(
        kernel,
        out_shape=jax.ShapeDtypeStruct((N, D, LC2), x_ncdhw.dtype),
        grid=(N,),
        in_specs=[
            pl.BlockSpec((None, Dp, LC1), lambda n: (n, 0, 0)),
            pl.BlockSpec((K, LC1, LC2), lambda n: (0, 0, 0)),
            pl.BlockSpec((1, LC2), lambda n: (0, 0)),
            pl.BlockSpec((K, LC2, LC2), lambda n: (0, 0, 0)),
            pl.BlockSpec((1, LC2), lambda n: (0, 0)),
        ],
        out_specs=pl.BlockSpec((None, D, LC2), lambda n: (n, 0, 0)),
        scratch_shapes=[pltpu.VMEM((Dp, LC2), jnp.float32)],
        compiler_params=pltpu.CompilerParams(
            dimension_semantics=("parallel",)),
    )(x, w1t, b1t, w2t, b2t)

    # (N, D, H*W*Cout) -> (N, D, H, W, Cout) -> NCDHW
    out = out.reshape(N, D, H, W, Cout)
    return jnp.transpose(out, (0, 4, 1, 2, 3))


def init_params(key, in_channels, out_channels, kernel_size=3):
    K = kernel_size
    k1, k2, k3, k4 = jax.random.split(key, 4)
    fan1 = in_channels * K * K * K
    fan2 = out_channels * K * K * K
    bnd1 = 1.0 / math.sqrt(fan1)
    bnd2 = 1.0 / math.sqrt(fan2)
    return {
        "w1": jax.random.uniform(k1, (K, K, K, in_channels, out_channels),
                                 jnp.float32, -bnd1, bnd1),
        "b1": jax.random.uniform(k2, (out_channels,), jnp.float32, -bnd1, bnd1),
        "w2": jax.random.uniform(k3, (K, K, K, out_channels, out_channels),
                                 jnp.float32, -bnd2, bnd2),
        "b2": jax.random.uniform(k4, (out_channels,), jnp.float32, -bnd2, bnd2),
    }


def _reference(x_ncdhw, params):
    """Pure-JAX (XLA conv) reference for correctness checking."""
    def conv(x, w_kkkio, b):
        w_oidhw = jnp.transpose(w_kkkio, (4, 3, 0, 1, 2))
        y = lax.conv_general_dilated(
            x, w_oidhw, window_strides=(1, 1, 1),
            padding=((1, 1), (1, 1), (1, 1)),
            dimension_numbers=("NCDHW", "OIDHW", "NCDHW"),
            precision=lax.Precision.HIGHEST)
        return jnp.maximum(y + b[None, :, None, None, None], 0.0)
    x = conv(x_ncdhw, params["w1"], params["b1"])
    return conv(x, params["w2"], params["b2"])


if __name__ == "__main__":
    N, Cin, Cout = 2, 4, 8
    D = H = W = 8

    key = jax.random.PRNGKey(0)
    kx, kp = jax.random.split(key)
    x = jax.random.normal(kx, (N, Cin, D, H, W), jnp.float32)   # NCDHW like PyTorch
    params = init_params(kp, Cin, Cout)

    # One-time weight preparation (outside the jitted per-call forward path).
    prepared = prepare_params(params, H, W)

    fwd = jax.jit(conv_block_3d)
    out = jax.block_until_ready(fwd(x, prepared))
    ref = jax.block_until_ready(_reference(x, params))

    assert out.shape == (N, Cout, D, H, W), out.shape
    err = float(jnp.max(jnp.abs(out - ref)))
    assert jnp.allclose(out, ref, rtol=1e-4, atol=1e-4), err
    print("KERNEL_OK")
</pallas_src>

<mosaic_0001>
module attributes {stable_mosaic.version = 11 : i64} {
  func.func @_conv_block3d_kernel(%arg0: i32, %arg1: memref<1x10x256xf32, #tpu.memory_space<vmem>>, %arg2: memref<3x256x512xf32, #tpu.memory_space<vmem>>, %arg3: memref<1x512xf32, #tpu.memory_space<vmem>>, %arg4: memref<3x512x512xf32, #tpu.memory_space<vmem>>, %arg5: memref<1x512xf32, #tpu.memory_space<vmem>>, %arg6: memref<1x8x512xf32, #tpu.memory_space<vmem>>, %arg7: memref<10x512xf32, #tpu.memory_space<vmem>>) attributes {dimension_semantics = [#tpu.dimension_semantics<parallel>], iteration_bounds = array<i64: 2>, scalar_prefetch = 0 : i64, scratch_operands = 1 : i64, tpu.core_type = #tpu.core_type<tc>, window_params = [{transform_indices = @transform_0, window_bounds = array<i64: 1, 10, 256>}, {pipeline_mode = #tpu.pipeline_mode<synchronous>, transform_indices = @transform_1, window_bounds = array<i64: 3, 256, 512>}, {pipeline_mode = #tpu.pipeline_mode<synchronous>, transform_indices = @transform_2, window_bounds = array<i64: 1, 512>}, {pipeline_mode = #tpu.pipeline_mode<synchronous>, transform_indices = @transform_3, window_bounds = array<i64: 3, 512, 512>}, {pipeline_mode = #tpu.pipeline_mode<synchronous>, transform_indices = @transform_4, window_bounds = array<i64: 1, 512>}, {transform_indices = @transform_5, window_bounds = array<i64: 1, 8, 512>}]} {
    %cst = arith.constant 0.000000e+00 : f32
    %0 = vector.broadcast %cst : f32 to vector<1x512xf32>
    %c0 = arith.constant 0 : index
    %c0_0 = arith.constant 0 : index
    %1 = vector.load %arg7[%c0, %c0_0] : memref<10x512xf32, #tpu.memory_space<vmem>>, vector<1x512xf32>
    tpu.vector_store %arg7[%c0, %c0_0], %0 {strides = array<i32>} : memref<10x512xf32, #tpu.memory_space<vmem>>, vector<1x512xf32>,
    %c9 = arith.constant 9 : index
    %c0_1 = arith.constant 0 : index
    %2 = vector.load %arg7[%c9, %c0_1] : memref<10x512xf32, #tpu.memory_space<vmem>>, vector<1x512xf32>
    tpu.vector_store %arg7[%c9, %c0_1], %0 {strides = array<i32>} : memref<10x512xf32, #tpu.memory_space<vmem>>, vector<1x512xf32>,
    %c0_2 = arith.constant 0 : index
    %c0_3 = arith.constant 0 : index
    %c0_4 = arith.constant 0 : index
    %3 = vector.load %arg1[%c0_2, %c0_3, %c0_4] : memref<1x10x256xf32, #tpu.memory_space<vmem>>, vector<1x8x256xf32>
    %4 = vector.shape_cast %3 : vector<1x8x256xf32> to vector<8x256xf32>
    %c0_5 = arith.constant 0 : index
    %c0_6 = arith.constant 0 : index
    %c0_7 = arith.constant 0 : index
    %5 = vector.load %arg2[%c0_5, %c0_6, %c0_7] : memref<3x256x512xf32, #tpu.memory_space<vmem>>, vector<1x256x512xf32>
    %6 = vector.shape_cast %5 : vector<1x256x512xf32> to vector<256x512xf32>
    %cst_8 = arith.constant dense<0.000000e+00> : vector<8x512xf32>
    %7 = tpu.matmul %4, %6, %cst_8 {dimension_numbers = #tpu.dot_dimension_numbers<[1], [0], [0], [1], [0, 0, 1, 1], [], []>} : vector<8x256xf32>, vector<256x512xf32>, vector<8x512xf32> -> vector<8x512xf32>
    %c0_9 = arith.constant 0 : index
    %c1 = arith.constant 1 : index
    %c0_10 = arith.constant 0 : index
    %8 = vector.load %arg1[%c0_9, %c1, %c0_10] : memref<1x10x256xf32, #tpu.memory_space<vmem>>, vector<1x8x256xf32>
    %9 = vector.shape_cast %8 : vector<1x8x256xf32> to vector<8x256xf32>
    %c1_11 = arith.constant 1 : index
    %c0_12 = arith.constant 0 : index
    %c0_13 = arith.constant 0 : index
    %10 = vector.load %arg2[%c1_11, %c0_12, %c0_13] : memref<3x256x512xf32, #tpu.memory_space<vmem>>, vector<1x256x512xf32>
    %11 = vector.shape_cast %10 : vector<1x256x512xf32> to vector<256x512xf32>
    %cst_14 = arith.constant dense<0.000000e+00> : vector<8x512xf32>
    %12 = tpu.matmul %9, %11, %cst_14 {dimension_numbers = #tpu.dot_dimension_numbers<[1], [0], [0], [1], [0, 0, 1, 1], [], []>} : vector<8x256xf32>, vector<256x512xf32>, vector<8x512xf32> -> vector<8x512xf32>
    %13 = arith.addf %7, %12 : vector<8x512xf32>
    %c0_15 = arith.constant 0 : index
    %c2 = arith.constant 2 : index
    %c0_16 = arith.constant 0 : index
    %14 = vector.load %arg1[%c0_15, %c2, %c0_16] : memref<1x10x256xf32, #tpu.memory_space<vmem>>, vector<1x8x256xf32>
    %15 = vector.shape_cast %14 : vector<1x8x256xf32> to vector<8x256xf32>
    %c2_17 = arith.constant 2 : index
    %c0_18 = arith.constant 0 : index
    %c0_19 = arith.constant 0 : index
    %16 = vector.load %arg2[%c2_17, %c0_18, %c0_19] : memref<3x256x512xf32, #tpu.memory_space<vmem>>, vector<1x256x512xf32>
    %17 = vector.shape_cast %16 : vector<1x256x512xf32> to vector<256x512xf32>
    %cst_20 = arith.constant dense<0.000000e+00> : vector<8x512xf32>
    %18 = tpu.matmul %15, %17, %cst_20 {dimension_numbers = #tpu.dot_dimension_numbers<[1], [0], [0], [1], [0, 0, 1, 1], [], []>} : vector<8x256xf32>, vector<256x512xf32>, vector<8x512xf32> -> vector<8x512xf32>
    %19 = arith.addf %13, %18 : vector<8x512xf32>
    %c0_21 = arith.constant 0 : index
    %c0_22 = arith.constant 0 : index
    %20 = vector.load %arg3[%c0_21, %c0_22] : memref<1x512xf32, #tpu.memory_space<vmem>>, vector<1x512xf32>
    %21 = vector.broadcast %20 : vector<1x512xf32> to vector<8x512xf32>
    %22 = arith.addf %19, %21 : vector<8x512xf32>
    %cst_23 = arith.constant 0.000000e+00 : f32
    %23 = vector.broadcast %cst_23 : f32 to vector<8x512xf32>
    %24 = arith.maximumf %22, %23 : vector<8x512xf32>
    %c1_24 = arith.constant 1 : index
    %c0_25 = arith.constant 0 : index
    %25 = vector.load %arg7[%c1_24, %c0_25] : memref<10x512xf32, #tpu.memory_space<vmem>>, vector<8x512xf32>
    tpu.vector_store %arg7[%c1_24, %c0_25], %24 {strides = array<i32>} : memref<10x512xf32, #tpu.memory_space<vmem>>, vector<8x512xf32>,
    %c0_26 = arith.constant 0 : index
    %c0_27 = arith.constant 0 : index
    %26 = vector.load %arg7[%c0_26, %c0_27] : memref<10x512xf32, #tpu.memory_space<vmem>>, vector<8x512xf32>
    %c0_28 = arith.constant 0 : index
    %c0_29 = arith.constant 0 : index
    %c0_30 = arith.constant 0 : index
    %27 = vector.load %arg4[%c0_28, %c0_29, %c0_30] : memref<3x512x512xf32, #tpu.memory_space<vmem>>, vector<1x512x512xf32>
    %28 = vector.shape_cast %27 : vector<1x512x512xf32> to vector<512x512xf32>
    %cst_31 = arith.constant dense<0.000000e+00> : vector<8x512xf32>
    %29 = tpu.matmul %26, %28, %cst_31 {dimension_numbers = #tpu.dot_dimension_numbers<[1], [0], [0], [1], [0, 0, 1, 1], [], []>} : vector<8x512xf32>, vector<512x512xf32>, vector<8x512xf32> -> vector<8x512xf32>
    %c1_32 = arith.constant 1 : index
    %c0_33 = arith.constant 0 : index
    %30 = vector.load %arg7[%c1_32, %c0_33] : memref<10x512xf32, #tpu.memory_space<vmem>>, vector<8x512xf32>
    %c1_34 = arith.constant 1 : index
    %c0_35 = arith.constant 0 : index
    %c0_36 = arith.constant 0 : index
    %31 = vector.load %arg4[%c1_34, %c0_35, %c0_36] : memref<3x512x512xf32, #tpu.memory_space<vmem>>, vector<1x512x512xf32>
    %32 = vector.shape_cast %31 : vector<1x512x512xf32> to vector<512x512xf32>
    %cst_37 = arith.constant dense<0.000000e+00> : vector<8x512xf32>
    %33 = tpu.matmul %30, %32, %cst_37 {dimension_numbers = #tpu.dot_dimension_numbers<[1], [0], [0], [1], [0, 0, 1, 1], [], []>} : vector<8x512xf32>, vector<512x512xf32>, vector<8x512xf32> -> vector<8x512xf32>
    %34 = arith.addf %29, %33 : vector<8x512xf32>
    %c2_38 = arith.constant 2 : index
    %c0_39 = arith.constant 0 : index
    %35 = vector.load %arg7[%c2_38, %c0_39] : memref<10x512xf32, #tpu.memory_space<vmem>>, vector<8x512xf32>
    %c2_40 = arith.constant 2 : index
    %c0_41 = arith.constant 0 : index
    %c0_42 = arith.constant 0 : index
    %36 = vector.load %arg4[%c2_40, %c0_41, %c0_42] : memref<3x512x512xf32, #tpu.memory_space<vmem>>, vector<1x512x512xf32>
    %37 = vector.shape_cast %36 : vector<1x512x512xf32> to vector<512x512xf32>
    %cst_43 = arith.constant dense<0.000000e+00> : vector<8x512xf32>
    %38 = tpu.matmul %35, %37, %cst_43 {dimension_numbers = #tpu.dot_dimension_numbers<[1], [0], [0], [1], [0, 0, 1, 1], [], []>} : vector<8x512xf32>, vector<512x512xf32>, vector<8x512xf32> -> vector<8x512xf32>
    %39 = arith.addf %34, %38 : vector<8x512xf32>
    %c0_44 = arith.constant 0 : index
    %c0_45 = arith.constant 0 : index
    %40 = vector.load %arg5[%c0_44, %c0_45] : memref<1x512xf32, #tpu.memory_space<vmem>>, vector<1x512xf32>
    %41 = vector.broadcast %40 : vector<1x512xf32> to vector<8x512xf32>
    %42 = arith.addf %39, %41 : vector<8x512xf32>
    %cst_46 = arith.constant 0.000000e+00 : f32
    %43 = vector.broadcast %cst_46 : f32 to vector<8x512xf32>
    %44 = arith.maximumf %42, %43 : vector<8x512xf32>
    %c0_47 = arith.constant 0 : index
    %c0_48 = arith.constant 0 : index
    %c0_49 = arith.constant 0 : index
    %45 = vector.load %arg6[%c0_47, %c0_48, %c0_49] : memref<1x8x512xf32, #tpu.memory_space<vmem>>, vector<1x8x512xf32>
    %46 = vector.shape_cast %45 : vector<1x8x512xf32> to vector<8x512xf32>
    %47 = vector.shape_cast %44 : vector<8x512xf32> to vector<1x8x512xf32>
    tpu.vector_store %arg6[%c0_47, %c0_48, %c0_49], %47 {strides = array<i32>} : memref<1x8x512xf32, #tpu.memory_space<vmem>>, vector<1x8x512xf32>,
    return
  }
  func.func @transform_0(%arg0: i32) -> (i32, i32, i32) {
    %c0_i32 = arith.constant 0 : i32
    %c0_i32_0 = arith.constant 0 : i32
    %c0_i32_1 = arith.constant 0 : i32
    return %arg0, %c0_i32, %c0_i32_0 : i32, i32, i32
  }
  func.func @transform_1(%arg0: i32) -> (i32, i32, i32) {
    %c0_i32 = arith.constant 0 : i32
    %c0_i32_0 = arith.constant 0 : i32
    %c0_i32_1 = arith.constant 0 : i32
    %c0_i32_2 = arith.constant 0 : i32
    return %c0_i32, %c0_i32_0, %c0_i32_1 : i32, i32, i32
  }
  func.func @transform_2(%arg0: i32) -> (i32, i32) {
    %c0_i32 = arith.constant 0 : i32
    %c0_i32_0 = arith.constant 0 : i32
    %c0_i32_1 = arith.constant 0 : i32
    return %c0_i32, %c0_i32_0 : i32, i32
  }
  func.func @transform_3(%arg0: i32) -> (i32, i32, i32) {
    %c0_i32 = arith.constant 0 : i32
    %c0_i32_0 = arith.constant 0 : i32
    %c0_i32_1 = arith.constant 0 : i32
    %c0_i32_2 = arith.constant 0 : i32
    return %c0_i32, %c0_i32_0, %c0_i32_1 : i32, i32, i32
  }
  func.func @transform_4(%arg0: i32) -> (i32, i32) {
    %c0_i32 = arith.constant 0 : i32
    %c0_i32_0 = arith.constant 0 : i32
    %c0_i32_1 = arith.constant 0 : i32
    return %c0_i32, %c0_i32_0 : i32, i32
  }
  func.func @transform_5(%arg0: i32) -> (i32, i32, i32) {
    %c0_i32 = arith.constant 0 : i32
    %c0_i32_0 = arith.constant 0 : i32
    %c0_i32_1 = arith.constant 0 : i32
    return %arg0, %c0_i32, %c0_i32_0 : i32, i32, i32
  }
}

</mosaic_0001>

<bundles_post_ra>
// kernel: conv_block_3d.1
= control target key start
LH: loop header
LB: loop body
LE: loop exit
PB: predicated region body
PF: predicated region fallthrough
CT: control target
= control target key end

     0   :  { %10 = vsyncpa [#allocation4], 0  ;;  %s3740_s0 = inlined_call_operand.vmem [shape: f32[2,10,256], index: 0, kind: input, shape index: {}]   ;;  %s3741_s1 = inlined_call_operand.hbm [shape: f32[3,256,512], index: 1, kind: input, shape index: {}]   ;;  %s3742_s2 = inlined_call_operand.hbm [shape: f32[1,512], index: 2, kind: input, shape index: {}]   ;;  %s3743_s3 = inlined_call_operand.hbm [shape: f32[3,512,512], index: 3, kind: input, shape index: {}]   ;;  %s3744_s4 = inlined_call_operand.hbm [shape: f32[1,512], index: 4, kind: input, shape index: {}]   ;;  %s3745_s5 = inlined_call_operand.vmem [shape: f32[2,8,512], index: 5, kind: output, shape index: {}]  }
   0x1   :  { %11 = vsyncpa [#allocation6], 0 }
   0x2   :  { %12 = vsyncpa [#allocation9], 0  ;;  %s3411_s18 = smov 0  }
   0x3 LB: > { %s185_s21 = sshll.u32 %s3742_s2, 4  ;;  %s3420_s22 = sadd.s32 4294967295, %s3372_s18   ;;  %s3372_s18 = sphi %s3411_s18, %s18_s18   ;;  %s186_s21 = int_to_ptr.hbm [resolvable:$true] %s185_s21 }
   0x4   : > { %p3163_p0 = scmp.ge.s32.totalorder %s3372_s18, 1  ;;  %p159_p1 = scmp.lt.s32.totalorder %s3372_s18, 3 }
   0x5   : > { %p3211_p2 = scmp.eq.s32.totalorder %s3420_s22, 0  ;;  %s3374_s24 = smov [#allocation5]  }
   0x6   : > { %p3425_p3 = pnand %p3163_p0, %p159_p1  ;;  %s187_s25 = sshll.u32 %s3374_s24, 4  ;;  %s188_s25 = int_to_ptr.vmem [resolvable:$true] %s187_s25 }
   0x7   : > { %s170_s28 = sshll.u32 %s3741_s1, 4  ;;  %s3375_s30 = smov [#allocation3]   ;;  %s171_s28 = int_to_ptr.hbm [resolvable:$true] %s170_s28 }
   0x8   : > { %p3198_p4 = pneg %p3425_p3  ;;  %s172_s6 = sshll.u32 %s3375_s30, 4  ;;  %s173_s6 = int_to_ptr.vmem [resolvable:$true] %s172_s6 }
   0x9   : > { %s196_s9 = sshll.u32 %s3743_s3, 4  ;;  %s3376_s10 = smov 512   ;;  %s197_s9 = int_to_ptr.hbm [resolvable:$true] %s196_s9 }
   0xa   : > { %p3436_p5 = pnand %p3211_p2, %p3198_p4  ;;  %s3377_s11 = smov 32  }
   0xb   : > { %s3378_s12 = smov [#allocation7]   ;;  %s211_s16 = sshll.u32 %s3744_s4, 4  ;;  %s212_s16 = int_to_ptr.hbm [resolvable:$true] %s211_s16 }
   0xc   : > { %3204 = dma.hbm_to_vmem [thread:$0]  (!%p3436_p5), %s186_s21, 64, %s188_s25, [#allocation6]  }
   0xd   : > { %3201 = dma.hbm_to_vmem [thread:$0]  (!%p3436_p5), %s171_s28, 49152, %s173_s6, [#allocation4], %s3376_s10, %s3376_s10, %s3377_s11  }
   0xe   : > { %s198_s13 = sshll.u32 %s3378_s12, 4  ;;  %s3379_s17 = smov [#allocation8]   ;;  %s199_s13 = int_to_ptr.vmem [resolvable:$true] %s198_s13 }
   0xf   : > { %3207 = dma.hbm_to_vmem [thread:$0]  (!%p3436_p5), %s197_s9, 98304, %s199_s13, [#allocation6], %s3376_s10, %s3376_s10, %s3377_s11  }
  0x10   : > { %s213_s19 = sshll.u32 %s3379_s17, 4  ;;  %234 = sbr.rel (%p3425_p3) target bundleno = 862 (0x35e), region = 40  ;;  %s214_s19 = int_to_ptr.vmem [resolvable:$true] %s213_s19 }
  0x11   : > { %3210 = dma.hbm_to_vmem [thread:$0]  (!%p3436_p5), %s212_s16, 64, %s214_s19, [#allocation9]  }
  0x15   : > { %3359 = dma.done.wait (%p3211_p2), [#allocation4], 49152  }
  0x16   : > { %3361 = vsyncadd (%p3211_p2), [#allocation4], 4294918144 }
  0x17   : > { %3363 = dma.done.wait (%p3211_p2), [#allocation6], 98368  }
  0x18   : > { %3365 = vsyncadd (%p3211_p2), [#allocation6], 4294868928 }
  0x19   : > { %3367 = dma.done.wait (%p3211_p2), [#allocation9], 64  }
  0x1a   : > { %3369 = vsyncadd (%p3211_p2), [#allocation9], 4294967232  ;;  %v492_v0 = vld [vmem:[#allocation3 + $0x5e0] sm:$0xff]  ;;  %v493_v2 = vld [vmem:[#allocation3 + $0x5e8] sm:$0xff]  ;;  %p278_p6 = scmp.lt.s32.totalorder %s3420_s22, 1  ;;  %vm564_vm0 = vcmask 1046528  }
  0x1b   : > { %v556_v1 = vld [vmem:[#allocation3 + $0x7e0] sm:$0xff]  ;;  %573 = vmatpush.msra.mxu0 %v492_v0  ;;  %v557_v3 = vld [vmem:[#allocation3 + $0x7e8] sm:$0xff]  ;;  %613 = vmatpush.msra.mxu2 %v493_v2  ;;  %v494_v0 = vld [vmem:[#allocation3 + $0x5f0] sm:$0xff]  ;;  %vm1030_vm1 = vcmask 1045504  }
  0x1c   : > { %593 = vmatpush.msra.mxu1 %v556_v1  ;;  %v488_v4 = vld [vmem:[#allocation3 + $0x5c0] sm:$0xff]  ;;  %633 = vmatpush.msra.mxu3 %v557_v3  ;;  %v489_v6 = vld [vmem:[#allocation3 + $0x5c8] sm:$0xff]  ;;  %v558_v1 = vld [vmem:[#allocation3 + $0x7f0] sm:$0xff]  ;;  %s3749_s22 = smov (!%p278_p6, %s3420_s22), 1 }
  0x1d   : > { %v552_v5 = vld [vmem:[#allocation3 + $0x7c0] sm:$0xff]  ;;  %v553_v7 = vld [vmem:[#allocation3 + $0x7c8] sm:$0xff]  ;;  %574 = vmatpush.msra.mxu0 %v488_v4  ;;  %614 = vmatpush.msra.mxu2 %v489_v6  ;;  %v495_v2 = vld [vmem:[#allocation3 + $0x5f8] sm:$0xff]  ;;  %s3180_s20 = sshll.u32 %s3749_s22, 5 }
  0x1e   : > { %v484_v8 = vld [vmem:[#allocation3 + $0x5a0] sm:$0xff]  ;;  %594 = vmatpush.msra.mxu1 %v552_v5  ;;  %v485_v10 = vld [vmem:[#allocation3 + $0x5a8] sm:$0xff]  ;;  %634 = vmatpush.msra.mxu3 %v553_v7  ;;  %v559_v3 = vld [vmem:[#allocation3 + $0x7f8] sm:$0xff]  ;;  %s3480_s24 = scalar_lea.vmem %s3740_s0, %s3180_s20  ;;  %s3725_s27 = scalar_lea.vmem %s3745_s5, %s3180_s20 }
  0x1f   : > { %v548_v9 = vld [vmem:[#allocation3 + $0x7a0] sm:$0xff]  ;;  %v549_v11 = vld [vmem:[#allocation3 + $0x7a8] sm:$0xff]  ;;  %575 = vmatpush.msra.mxu0 %v484_v8  ;;  %615 = vmatpush.msra.mxu2 %v485_v10  ;;  %v490_v4 = vld [vmem:[#allocation3 + $0x5d0] sm:$0xff] }
  0x20   : > { %v480_v12 = vld [vmem:[#allocation3 + $0x580] sm:$0xff]  ;;  %595 = vmatpush.msra.mxu1 %v548_v9  ;;  %v481_v14 = vld [vmem:[#allocation3 + $0x588] sm:$0xff]  ;;  %635 = vmatpush.msra.mxu3 %v549_v11  ;;  %v554_v5 = vld [vmem:[#allocation3 + $0x7d0] sm:$0xff] }
  0x21   : > { %v544_v13 = vld [vmem:[#allocation3 + $0x780] sm:$0xff]  ;;  %v545_v15 = vld [vmem:[#allocation3 + $0x788] sm:$0xff]  ;;  %576 = vmatpush.msra.mxu0 %v480_v12  ;;  %616 = vmatpush.msra.mxu2 %v481_v14  ;;  %v491_v6 = vld [vmem:[#allocation3 + $0x5d8] sm:$0xff] }
  0x22   : > { %v476_v16 = vld [vmem:[#allocation3 + $0x560] sm:$0xff]  ;;  %596 = vmatpush.msra.mxu1 %v544_v13  ;;  %v477_v18 = vld [vmem:[#allocation3 + $0x568] sm:$0xff]  ;;  %636 = vmatpush.msra.mxu3 %v545_v15  ;;  %v555_v7 = vld [vmem:[#allocation3 + $0x7d8] sm:$0xff] }
  0x23   : > { %v540_v17 = vld [vmem:[#allocation3 + $0x760] sm:$0xff]  ;;  %v541_v19 = vld [vmem:[#allocation3 + $0x768] sm:$0xff]  ;;  %577 = vmatpush.msra.mxu0 %v476_v16  ;;  %617 = vmatpush.msra.mxu2 %v477_v18  ;;  %v486_v8 = vld [vmem:[#allocation3 + $0x5b0] sm:$0xff] }
  0x24   : > { %v472_v20 = vld [vmem:[#allocation3 + $0x540] sm:$0xff]  ;;  %597 = vmatpush.msra.mxu1 %v540_v17  ;;  %v473_v22 = vld [vmem:[#allocation3 + $0x548] sm:$0xff]  ;;  %637 = vmatpush.msra.mxu3 %v541_v19  ;;  %v550_v9 = vld [vmem:[#allocation3 + $0x7b0] sm:$0xff] }
  0x25   : > { %v536_v21 = vld [vmem:[#allocation3 + $0x740] sm:$0xff]  ;;  %v537_v23 = vld [vmem:[#allocation3 + $0x748] sm:$0xff]  ;;  %578 = vmatpush.msra.mxu0 %v472_v20  ;;  %618 = vmatpush.msra.mxu2 %v473_v22  ;;  %v487_v10 = vld [vmem:[#allocation3 + $0x5b8] sm:$0xff] }
  0x26   : > { %v468_v24 = vld [vmem:[#allocation3 + $0x520] sm:$0xff]  ;;  %598 = vmatpush.msra.mxu1 %v536_v21  ;;  %v469_v26 = vld [vmem:[#allocation3 + $0x528] sm:$0xff]  ;;  %638 = vmatpush.msra.mxu3 %v537_v23  ;;  %v551_v11 = vld [vmem:[#allocation3 + $0x7b8] sm:$0xff] }
  0x27   : > { %v532_v25 = vld [vmem:[#allocation3 + $0x720] sm:$0xff]  ;;  %v533_v27 = vld [vmem:[#allocation3 + $0x728] sm:$0xff]  ;;  %579 = vmatpush.msra.mxu0 %v468_v24  ;;  %619 = vmatpush.msra.mxu2 %v469_v26  ;;  %v482_v12 = vld [vmem:[#allocation3 + $0x590] sm:$0xff] }
  0x28   : > { %v464_v28 = vld [vmem:[#allocation3 + $0x500] sm:$0xff]  ;;  %599 = vmatpush.msra.mxu1 %v532_v25  ;;  %v465_v30 = vld [vmem:[#allocation3 + $0x508] sm:$0xff]  ;;  %639 = vmatpush.msra.mxu3 %v533_v27  ;;  %v546_v13 = vld [vmem:[#allocation3 + $0x790] sm:$0xff] }
  0x29   : > { %v528_v29 = vld [vmem:[#allocation3 + $0x700] sm:$0xff]  ;;  %v529_v31 = vld [vmem:[#allocation3 + $0x708] sm:$0xff]  ;;  %580 = vmatpush.msra.mxu0 %v464_v28  ;;  %620 = vmatpush.msra.mxu2 %v465_v30  ;;  %v483_v14 = vld [vmem:[#allocation3 + $0x598] sm:$0xff] }
  0x2a   : > { %v460_v32 = vld [vmem:[#allocation3 + $0x4e0] sm:$0xff]  ;;  %600 = vmatpush.msra.mxu1 %v528_v29  ;;  %v461_v34 = vld [vmem:[#allocation3 + $0x4e8] sm:$0xff]  ;;  %640 = vmatpush.msra.mxu3 %v529_v31  ;;  %v547_v15 = vld [vmem:[#allocation3 + $0x798] sm:$0xff] }
  0x2b   : > { %v524_v33 = vld [vmem:[#allocation3 + $0x6e0] sm:$0xff]  ;;  %v525_v35 = vld [vmem:[#allocation3 + $0x6e8] sm:$0xff]  ;;  %581 = vmatpush.msra.mxu0 %v460_v32  ;;  %621 = vmatpush.msra.mxu2 %v461_v34  ;;  %v478_v16 = vld [vmem:[#allocation3 + $0x570] sm:$0xff] }
  0x2c   : > { %v456_v36 = vld [vmem:[#allocation3 + $0x4c0] sm:$0xff]  ;;  %601 = vmatpush.msra.mxu1 %v524_v33  ;;  %v457_v38 = vld [vmem:[#allocation3 + $0x4c8] sm:$0xff]  ;;  %641 = vmatpush.msra.mxu3 %v525_v35  ;;  %v542_v17 = vld [vmem:[#allocation3 + $0x770] sm:$0xff] }
  0x2d   : > { %v520_v37 = vld [vmem:[#allocation3 + $0x6c0] sm:$0xff]  ;;  %v521_v39 = vld [vmem:[#allocation3 + $0x6c8] sm:$0xff]  ;;  %582 = vmatpush.msra.mxu0 %v456_v36  ;;  %622 = vmatpush.msra.mxu2 %v457_v38  ;;  %v479_v18 = vld [vmem:[#allocation3 + $0x578] sm:$0xff] }
  0x2e   : > { %v452_v40 = vld [vmem:[#allocation3 + $0x4a0] sm:$0xff]  ;;  %602 = vmatpush.msra.mxu1 %v520_v37  ;;  %v453_v42 = vld [vmem:[#allocation3 + $0x4a8] sm:$0xff]  ;;  %642 = vmatpush.msra.mxu3 %v521_v39  ;;  %v543_v19 = vld [vmem:[#allocation3 + $0x778] sm:$0xff] }
  0x2f   : > { %v516_v41 = vld [vmem:[#allocation3 + $0x6a0] sm:$0xff]  ;;  %v517_v43 = vld [vmem:[#allocation3 + $0x6a8] sm:$0xff]  ;;  %583 = vmatpush.msra.mxu0 %v452_v40  ;;  %623 = vmatpush.msra.mxu2 %v453_v42  ;;  %v474_v20 = vld [vmem:[#allocation3 + $0x550] sm:$0xff] }
  0x30   : > { %v448_v44 = vld [vmem:[#allocation3 + $0x480] sm:$0xff]  ;;  %603 = vmatpush.msra.mxu1 %v516_v41  ;;  %v449_v46 = vld [vmem:[#allocation3 + $0x488] sm:$0xff]  ;;  %643 = vmatpush.msra.mxu3 %v517_v43  ;;  %v538_v21 = vld [vmem:[#allocation3 + $0x750] sm:$0xff] }
  0x31   : > { %v512_v45 = vld [vmem:[#allocation3 + $0x680] sm:$0xff]  ;;  %v513_v47 = vld [vmem:[#allocation3 + $0x688] sm:$0xff]  ;;  %584 = vmatpush.msra.mxu0 %v448_v44  ;;  %624 = vmatpush.msra.mxu2 %v449_v46  ;;  %v475_v22 = vld [vmem:[#allocation3 + $0x558] sm:$0xff] }
  0x32   : > { %v444_v48 = vld [vmem:[#allocation3 + $0x460] sm:$0xff]  ;;  %604 = vmatpush.msra.mxu1 %v512_v45  ;;  %v445_v50 = vld [vmem:[#allocation3 + $0x468] sm:$0xff]  ;;  %644 = vmatpush.msra.mxu3 %v513_v47  ;;  %v539_v23 = vld [vmem:[#allocation3 + $0x758] sm:$0xff] }
  0x33   : > { %v508_v49 = vld [vmem:[#allocation3 + $0x660] sm:$0xff]  ;;  %v509_v51 = vld [vmem:[#allocation3 + $0x668] sm:$0xff]  ;;  %585 = vmatpush.msra.mxu0 %v444_v48  ;;  %625 = vmatpush.msra.mxu2 %v445_v50  ;;  %v470_v24 = vld [vmem:[#allocation3 + $0x530] sm:$0xff] }
  0x34   : > { %v440_v52 = vld [vmem:[#allocation3 + $0x440] sm:$0xff]  ;;  %605 = vmatpush.msra.mxu1 %v508_v49  ;;  %v441_v54 = vld [vmem:[#allocation3 + $0x448] sm:$0xff]  ;;  %645 = vmatpush.msra.mxu3 %v509_v51  ;;  %v534_v25 = vld [vmem:[#allocation3 + $0x730] sm:$0xff] }
  0x35   : > { %v504_v53 = vld [vmem:[#allocation3 + $0x640] sm:$0xff]  ;;  %v505_v55 = vld [vmem:[#allocation3 + $0x648] sm:$0xff]  ;;  %586 = vmatpush.msra.mxu0 %v440_v52  ;;  %626 = vmatpush.msra.mxu2 %v441_v54  ;;  %v471_v26 = vld [vmem:[#allocation3 + $0x538] sm:$0xff] }
  0x36   : > { %v436_v56 = vld [vmem:[#allocation3 + $0x420] sm:$0xff]  ;;  %606 = vmatpush.msra.mxu1 %v504_v53  ;;  %v437_v58 = vld [vmem:[#allocation3 + $0x428] sm:$0xff]  ;;  %646 = vmatpush.msra.mxu3 %v505_v55  ;;  %v535_v27 = vld [vmem:[#allocation3 + $0x738] sm:$0xff] }
  0x37   : > { %v500_v57 = vld [vmem:[#allocation3 + $0x620] sm:$0xff]  ;;  %v501_v59 = vld [vmem:[#allocation3 + $0x628] sm:$0xff]  ;;  %587 = vmatpush.msra.mxu0 %v436_v56  ;;  %627 = vmatpush.msra.mxu2 %v437_v58  ;;  %v466_v28 = vld [vmem:[#allocation3 + $0x510] sm:$0xff] }
  0x38   : > { %v432_v60 = vld [vmem:[#allocation3 + $0x400] sm:$0xff]  ;;  %607 = vmatpush.msra.mxu1 %v500_v57  ;;  %v433_v62 = vld [vmem:[#allocation3 + $0x408] sm:$0xff]  ;;  %647 = vmatpush.msra.mxu3 %v501_v59  ;;  %v530_v29 = vld [vmem:[#allocation3 + $0x710] sm:$0xff] }
  0x39   : > { %v496_v61 = vld [vmem:[#allocation3 + $0x600] sm:$0xff]  ;;  %v497_v63 = vld [vmem:[#allocation3 + $0x608] sm:$0xff]  ;;  %588 = vmatpush.msra.mxu0 %v432_v60  ;;  %628 = vmatpush.msra.mxu2 %v433_v62  ;;  %v467_v30 = vld [vmem:[#allocation3 + $0x518] sm:$0xff] }
  0x3a   : > { %608 = vmatpush.msra.mxu1 %v496_v61  ;;  %648 = vmatpush.msra.mxu3 %v497_v63  ;;  %v531_v31 = vld [vmem:[#allocation3 + $0x718] sm:$0xff]  ;;  %v462_v32 = vld [vmem:[#allocation3 + $0x4f0] sm:$0xff]  ;;  %v427_v52 = vld [vmem:[%s3480_s24] sm:$0xfe] }
  0x3b   : > { %653 = vmatpush.msrb.mxu0 %v494_v0  ;;  %693 = vmatpush.msrb.mxu2 %v495_v2  ;;  %v526_v33 = vld [vmem:[#allocation3 + $0x6f0] sm:$0xff]  ;;  %v463_v34 = vld [vmem:[#allocation3 + $0x4f8] sm:$0xff]  ;;  %v428_v54 = vld [vmem:[%s3480_s24 + $0x8] sm:$0xfe]  ;;  %v565_v62 = vrot.slane %v427_v52, 1 }
  0x3c   : > { %673 = vmatpush.msrb.mxu1 %v558_v1  ;;  %713 = vmatpush.msrb.mxu3 %v559_v3  ;;  %v527_v35 = vld [vmem:[#allocation3 + $0x6f8] sm:$0xff]  ;;  %v458_v36 = vld [vmem:[#allocation3 + $0x4d0] sm:$0xff]  ;;  %v568_v0 = vrot.slane %v428_v54, 1  ;;  %v320_v52 = vld [vmem:[#allocation3 + $0xa8] sm:$0xff] }
  0x3d   : > { %654 = vmatpush.msrb.mxu0 %v490_v4  ;;  %694 = vmatpush.msrb.mxu2 %v491_v6  ;;  %v522_v37 = vld [vmem:[#allocation3 + $0x6d0] sm:$0xff]  ;;  %v459_v38 = vld [vmem:[#allocation3 + $0x4d8] sm:$0xff]  ;;  %v315_v54 = vld [vmem:[#allocation3 + $0x80] sm:$0xff] }
  0x3e   : > { %674 = vmatpush.msrb.mxu1 %v554_v5  ;;  %714 = vmatpush.msrb.mxu3 %v555_v7  ;;  %v523_v39 = vld [vmem:[#allocation3 + $0x6d8] sm:$0xff]  ;;  %v454_v40 = vld [vmem:[#allocation3 + $0x4b0] sm:$0xff] }
  0x3f   : > { %655 = vmatpush.msrb.mxu0 %v486_v8  ;;  %695 = vmatpush.msrb.mxu2 %v487_v10  ;;  %v518_v41 = vld [vmem:[#allocation3 + $0x6b0] sm:$0xff]  ;;  %v455_v42 = vld [vmem:[#allocation3 + $0x4b8] sm:$0xff]  ;;  %v359_v10 = vld [vmem:[#allocation3 + $0x1e0] sm:$0xff] }
  0x40   : > { %675 = vmatpush.msrb.mxu1 %v550_v9  ;;  %715 = vmatpush.msrb.mxu3 %v551_v11  ;;  %v519_v43 = vld [vmem:[#allocation3 + $0x6b8] sm:$0xff]  ;;  %v450_v44 = vld [vmem:[#allocation3 + $0x490] sm:$0xff]  ;;  %v423_v11 = vld [vmem:[#allocation3 + $0x3e0] sm:$0xff] }
  0x41   : > { %656 = vmatpush.msrb.mxu0 %v482_v12  ;;  %696 = vmatpush.msrb.mxu2 %v483_v14  ;;  %v514_v45 = vld [vmem:[#allocation3 + $0x690] sm:$0xff]  ;;  %v451_v46 = vld [vmem:[#allocation3 + $0x498] sm:$0xff]  ;;  %v360_v12 = vld [vmem:[#allocation3 + $0x1e8] sm:$0xff] }
  0x42   : > { %676 = vmatpush.msrb.mxu1 %v546_v13  ;;  %716 = vmatpush.msrb.mxu3 %v547_v15  ;;  %v515_v47 = vld [vmem:[#allocation3 + $0x698] sm:$0xff]  ;;  %v446_v48 = vld [vmem:[#allocation3 + $0x470] sm:$0xff]  ;;  %v424_v13 = vld [vmem:[#allocation3 + $0x3e8] sm:$0xff] }
  0x43   : > { %657 = vmatpush.msrb.mxu0 %v478_v16  ;;  %697 = vmatpush.msrb.mxu2 %v479_v18  ;;  %v510_v49 = vld [vmem:[#allocation3 + $0x670] sm:$0xff]  ;;  %v447_v50 = vld [vmem:[#allocation3 + $0x478] sm:$0xff]  ;;  %v355_v14 = vld [vmem:[#allocation3 + $0x1c0] sm:$0xff] }
  0x44   : > { %677 = vmatpush.msrb.mxu1 %v542_v17  ;;  %717 = vmatpush.msrb.mxu3 %v543_v19  ;;  %v511_v51 = vld [vmem:[#allocation3 + $0x678] sm:$0xff]  ;;  %v429_v53 = vld [vmem:[%s3480_s24 + $0x10] sm:$0x1]  ;;  %v419_v15 = vld [vmem:[#allocation3 + $0x3c0] sm:$0xff] }
  0x45   : > { %658 = vmatpush.msrb.mxu0 %v474_v20  ;;  %698 = vmatpush.msrb.mxu2 %v475_v22  ;;  %v430_v55 = vld [vmem:[%s3480_s24 + $0x18] sm:$0x1]  ;;  %v442_v56 = vld [vmem:[#allocation3 + $0x450] sm:$0xff]  ;;  %v566_v63 = vrot.slane %v429_v53, 1  ;;  %v356_v16 = vld [vmem:[#allocation3 + $0x1c8] sm:$0xff] }
  0x46   : > { %678 = vmatpush.msrb.mxu1 %v538_v21  ;;  %718 = vmatpush.msrb.mxu3 %v539_v23  ;;  %v506_v57 = vld [vmem:[#allocation3 + $0x650] sm:$0xff]  ;;  %v443_v58 = vld [vmem:[#allocation3 + $0x458] sm:$0xff]  ;;  %v569_v1 = vrot.slane %v430_v55, 1  ;;  %v420_v17 = vld [vmem:[#allocation3 + $0x3c8] sm:$0xff] }
  0x47   : > { %659 = vmatpush.msrb.mxu0 %v470_v24  ;;  %699 = vmatpush.msrb.mxu2 %v471_v26  ;;  %v507_v59 = vld [vmem:[#allocation3 + $0x658] sm:$0xff]  ;;  %v438_v60 = vld [vmem:[#allocation3 + $0x430] sm:$0xff]  ;;  %v3487_v8 = vsel %vm564_vm0, %v565_v62, %v566_v63  ;;  %v351_v18 = vld [vmem:[#allocation3 + $0x1a0] sm:$0xff] }
  0x48   : > { %679 = vmatpush.msrb.mxu1 %v534_v25  ;;  %719 = vmatpush.msrb.mxu3 %v535_v27  ;;  %v502_v61 = vld [vmem:[#allocation3 + $0x630] sm:$0xff]  ;;  %v439_v2 = vld [vmem:[#allocation3 + $0x438] sm:$0xff]  ;;  %v3490_v9 = vsel %vm564_vm0, %v568_v0, %v569_v1  ;;  %v415_v19 = vld [vmem:[#allocation3 + $0x3a0] sm:$0xff] }
  0x49   : > { %660 = vmatpush.msrb.mxu0 %v466_v28  ;;  %700 = vmatpush.msrb.mxu2 %v467_v30  ;;  %v503_v3 = vld [vmem:[#allocation3 + $0x638] sm:$0xff]  ;;  %v434_v4 = vld [vmem:[#allocation3 + $0x410] sm:$0xff]  ;;  %v352_v20 = vld [vmem:[#allocation3 + $0x1a8] sm:$0xff] }
  0x4a   : > { %680 = vmatpush.msrb.mxu1 %v530_v29  ;;  %720 = vmatpush.msrb.mxu3 %v531_v31  ;;  %v498_v5 = vld [vmem:[#allocation3 + $0x610] sm:$0xff]  ;;  %v435_v6 = vld [vmem:[#allocation3 + $0x418] sm:$0xff]  ;;  %v416_v21 = vld [vmem:[#allocation3 + $0x3a8] sm:$0xff] }
  0x4b   : > { %661 = vmatpush.msrb.mxu0 %v462_v32  ;;  %701 = vmatpush.msrb.mxu2 %v463_v34  ;;  %v499_v7 = vld [vmem:[#allocation3 + $0x618] sm:$0xff]  ;;  %v347_v22 = vld [vmem:[#allocation3 + $0x180] sm:$0xff]  ;;  %v348_v24 = vld [vmem:[#allocation3 + $0x188] sm:$0xff] }
  0x4c   : > { %681 = vmatpush.msrb.mxu1 %v526_v33  ;;  %721 = vmatpush.msrb.mxu3 %v527_v35  ;;  %v411_v23 = vld [vmem:[#allocation3 + $0x380] sm:$0xff]  ;;  %v412_v25 = vld [vmem:[#allocation3 + $0x388] sm:$0xff] }
  0x4d   : > { %662 = vmatpush.msrb.mxu0 %v458_v36  ;;  %702 = vmatpush.msrb.mxu2 %v459_v38  ;;  %v343_v26 = vld [vmem:[#allocation3 + $0x160] sm:$0xff]  ;;  %v344_v28 = vld [vmem:[#allocation3 + $0x168] sm:$0xff] }
  0x4e   : > { %682 = vmatpush.msrb.mxu1 %v522_v37  ;;  %722 = vmatpush.msrb.mxu3 %v523_v39  ;;  %v407_v27 = vld [vmem:[#allocation3 + $0x360] sm:$0xff]  ;;  %v408_v29 = vld [vmem:[#allocation3 + $0x368] sm:$0xff] }
  0x4f   : > { %663 = vmatpush.msrb.mxu0 %v454_v40  ;;  %703 = vmatpush.msrb.mxu2 %v455_v42  ;;  %v339_v30 = vld [vmem:[#allocation3 + $0x140] sm:$0xff]  ;;  %v340_v32 = vld [vmem:[#allocation3 + $0x148] sm:$0xff] }
  0x50   : > { %683 = vmatpush.msrb.mxu1 %v518_v41  ;;  %723 = vmatpush.msrb.mxu3 %v519_v43  ;;  %v403_v31 = vld [vmem:[#allocation3 + $0x340] sm:$0xff]  ;;  %v404_v33 = vld [vmem:[#allocation3 + $0x348] sm:$0xff] }
  0x51   : > { %664 = vmatpush.msrb.mxu0 %v450_v44  ;;  %704 = vmatpush.msrb.mxu2 %v451_v46  ;;  %v335_v34 = vld [vmem:[#allocation3 + $0x120] sm:$0xff]  ;;  %v336_v36 = vld [vmem:[#allocation3 + $0x128] sm:$0xff] }
  0x52   : > { %684 = vmatpush.msrb.mxu1 %v514_v45  ;;  %724 = vmatpush.msrb.mxu3 %v515_v47  ;;  %v399_v35 = vld [vmem:[#allocation3 + $0x320] sm:$0xff]  ;;  %v400_v37 = vld [vmem:[#allocation3 + $0x328] sm:$0xff] }
  0x53   : > { %665 = vmatpush.msrb.mxu0 %v446_v48  ;;  %705 = vmatpush.msrb.mxu2 %v447_v50  ;;  %v331_v38 = vld [vmem:[#allocation3 + $0x100] sm:$0xff]  ;;  %v332_v40 = vld [vmem:[#allocation3 + $0x108] sm:$0xff] }
  0x54   : > { %685 = vmatpush.msrb.mxu1 %v510_v49  ;;  %725 = vmatpush.msrb.mxu3 %v511_v51  ;;  %v395_v39 = vld [vmem:[#allocation3 + $0x300] sm:$0xff]  ;;  %v396_v41 = vld [vmem:[#allocation3 + $0x308] sm:$0xff] }
  0x55   : > { %666 = vmatpush.msrb.mxu0 %v442_v56  ;;  %706 = vmatpush.msrb.mxu2 %v443_v58  ;;  %v327_v42 = vld [vmem:[#allocation3 + $0xe0] sm:$0xff]  ;;  %v328_v44 = vld [vmem:[#allocation3 + $0xe8] sm:$0xff] }
  0x56   : > { %686 = vmatpush.msrb.mxu1 %v506_v57  ;;  %726 = vmatpush.msrb.mxu3 %v507_v59  ;;  %v391_v43 = vld [vmem:[#allocation3 + $0x2e0] sm:$0xff]  ;;  %v392_v45 = vld [vmem:[#allocation3 + $0x2e8] sm:$0xff] }
  0x57   : > { %667 = vmatpush.msrb.mxu0 %v438_v60  ;;  %707 = vmatpush.msrb.mxu2 %v439_v2  ;;  %v323_v46 = vld [vmem:[#allocation3 + $0xc0] sm:$0xff]  ;;  %v324_v48 = vld [vmem:[#allocation3 + $0xc8] sm:$0xff] }
  0x58   : > { %687 = vmatpush.msrb.mxu1 %v502_v61  ;;  %727 = vmatpush.msrb.mxu3 %v503_v3  ;;  %v387_v47 = vld [vmem:[#allocation3 + $0x2c0] sm:$0xff]  ;;  %v388_v49 = vld [vmem:[#allocation3 + $0x2c8] sm:$0xff] }
  0x59   : > { %668 = vmatpush.msrb.mxu0 %v434_v4  ;;  %708 = vmatpush.msrb.mxu2 %v435_v6  ;;  %v319_v50 = vld [vmem:[#allocation3 + $0xa0] sm:$0xff]  ;;  %v384_v53 = vld [vmem:[#allocation3 + $0x2a8] sm:$0xff] }
  0x5a   : > { %688 = vmatpush.msrb.mxu1 %v498_v5  ;;  %728 = vmatpush.msrb.mxu3 %v499_v7  ;;  %v383_v51 = vld [vmem:[#allocation3 + $0x2a0] sm:$0xff]  ;;  %v316_v56 = vld [vmem:[#allocation3 + $0x88] sm:$0xff] }
  0x5b   : > { %589 = vmatmul.f32.vlgmr.msra.gmra.mxu0 %v3487_v8  ;;  %609 = vmatmul.f32.vlgmr.msra.gmra.mxu1 %v3490_v9  ;;  %v379_v55 = vld [vmem:[#allocation3 + $0x280] sm:$0xff]  ;;  %v380_v57 = vld [vmem:[#allocation3 + $0x288] sm:$0xff] }
  0x5c   : > { %629 = vmatmul.f32.vlgmr.msra.gmra.mxu2 %v3487_v8  ;;  %649 = vmatmul.f32.vlgmr.msra.gmra.mxu3 %v3490_v9  ;;  %v311_v58 = vld [vmem:[#allocation3 + $0x60] sm:$0xff]  ;;  %v312_v60 = vld [vmem:[#allocation3 + $0x68] sm:$0xff] }
  0x5d   : > { %733 = vmatpush.msra.mxu0 %v359_v10  ;;  %753 = vmatpush.msra.mxu1 %v423_v11  ;;  %v375_v59 = vld [vmem:[#allocation3 + $0x260] sm:$0xff]  ;;  %v376_v61 = vld [vmem:[#allocation3 + $0x268] sm:$0xff] }
  0x5e   : > { %773 = vmatpush.msra.mxu2 %v360_v12  ;;  %793 = vmatpush.msra.mxu3 %v424_v13  ;;  %v307_v62 = vld [vmem:[#allocation3 + $0x40] sm:$0xff]  ;;  %v308_v0 = vld [vmem:[#allocation3 + $0x48] sm:$0xff]  ;;  %v425_v12 = vld [vmem:[#allocation3 + $0x3f0] sm:$0xff] }
  0x5f   : > { %734 = vmatpush.msra.mxu0 %v355_v14  ;;  %754 = vmatpush.msra.mxu1 %v419_v15  ;;  %v371_v63 = vld [vmem:[#allocation3 + $0x240] sm:$0xff]  ;;  %v372_v1 = vld [vmem:[#allocation3 + $0x248] sm:$0xff]  ;;  %v362_v13 = vld [vmem:[#allocation3 + $0x1f8] sm:$0xff] }
  0x60   : > { %774 = vmatpush.msra.mxu2 %v356_v16  ;;  %794 = vmatpush.msra.mxu3 %v420_v17  ;;  %v303_v2 = vld [vmem:[#allocation3 + $0x20] sm:$0xff]  ;;  %v304_v4 = vld [vmem:[#allocation3 + $0x28] sm:$0xff]  ;;  %v426_v14 = vld [vmem:[#allocation3 + $0x3f8] sm:$0xff] }
  0x61   : > { %735 = vmatpush.msra.mxu0 %v351_v18  ;;  %755 = vmatpush.msra.mxu1 %v415_v19  ;;  %v367_v3 = vld [vmem:[#allocation3 + $0x220] sm:$0xff]  ;;  %v368_v5 = vld [vmem:[#allocation3 + $0x228] sm:$0xff]  ;;  %v357_v16 = vld [vmem:[#allocation3 + $0x1d0] sm:$0xff] }
  0x62   : > { %775 = vmatpush.msra.mxu2 %v352_v20  ;;  %795 = vmatpush.msra.mxu3 %v416_v21  ;;  %v299_v6 = vld [vmem:[#allocation3] sm:$0xff]  ;;  %v364_v10 = vld [vmem:[#allocation3 + $0x208] sm:$0xff]  ;;  %v421_v17 = vld [vmem:[#allocation3 + $0x3d0] sm:$0xff] }
  0x63   : > { %736 = vmatpush.msra.mxu0 %v347_v22  ;;  %756 = vmatpush.msra.mxu1 %v411_v23  ;;  %v363_v7 = vld [vmem:[#allocation3 + $0x200] sm:$0xff]  ;;  %v3506_v15 = vld [vmem:[%s3480_s24 + $0x8] sm:$0xff]  ;;  %v358_v18 = vld [vmem:[#allocation3 + $0x1d8] sm:$0xff] }
  0x64   : > { %776 = vmatpush.msra.mxu2 %v348_v24  ;;  %796 = vmatpush.msra.mxu3 %v412_v25  ;;  %v3501_v11 = vld [vmem:[%s3480_s24] sm:$0xff]  ;;  %v422_v19 = vld [vmem:[#allocation3 + $0x3d8] sm:$0xff]  ;;  %v353_v20 = vld [vmem:[#allocation3 + $0x1b0] sm:$0xff] }
  0x65   : > { %737 = vmatpush.msra.mxu0 %v343_v26  ;;  %757 = vmatpush.msra.mxu1 %v407_v27  ;;  %v417_v21 = vld [vmem:[#allocation3 + $0x3b0] sm:$0xff]  ;;  %v354_v22 = vld [vmem:[#allocation3 + $0x1b8] sm:$0xff] }
  0x66   : > { %777 = vmatpush.msra.mxu2 %v344_v28  ;;  %797 = vmatpush.msra.mxu3 %v408_v29  ;;  %v418_v23 = vld [vmem:[#allocation3 + $0x3b8] sm:$0xff]  ;;  %v349_v24 = vld [vmem:[#allocation3 + $0x190] sm:$0xff] }
  0x67   : > { %738 = vmatpush.msra.mxu0 %v339_v30  ;;  %758 = vmatpush.msra.mxu1 %v403_v31  ;;  %v413_v25 = vld [vmem:[#allocation3 + $0x390] sm:$0xff]  ;;  %v350_v26 = vld [vmem:[#allocation3 + $0x198] sm:$0xff] }
  0x68   : > { %778 = vmatpush.msra.mxu2 %v340_v32  ;;  %798 = vmatpush.msra.mxu3 %v404_v33  ;;  %v414_v27 = vld [vmem:[#allocation3 + $0x398] sm:$0xff]  ;;  %v345_v28 = vld [vmem:[#allocation3 + $0x170] sm:$0xff] }
  0x69   : > { %739 = vmatpush.msra.mxu0 %v335_v34  ;;  %759 = vmatpush.msra.mxu1 %v399_v35  ;;  %v409_v29 = vld [vmem:[#allocation3 + $0x370] sm:$0xff]  ;;  %v346_v30 = vld [vmem:[#allocation3 + $0x178] sm:$0xff] }
  0x6a   : > { %779 = vmatpush.msra.mxu2 %v336_v36  ;;  %799 = vmatpush.msra.mxu3 %v400_v37  ;;  %v410_v31 = vld [vmem:[#allocation3 + $0x378] sm:$0xff]  ;;  %v341_v32 = vld [vmem:[#allocation3 + $0x150] sm:$0xff] }
  0x6b   : > { %740 = vmatpush.msra.mxu0 %v331_v38  ;;  %760 = vmatpush.msra.mxu1 %v395_v39  ;;  %v405_v33 = vld [vmem:[#allocation3 + $0x350] sm:$0xff]  ;;  %v342_v34 = vld [vmem:[#allocation3 + $0x158] sm:$0xff] }
  0x6c   : > { %780 = vmatpush.msra.mxu2 %v332_v40  ;;  %800 = vmatpush.msra.mxu3 %v396_v41  ;;  %v406_v35 = vld [vmem:[#allocation3 + $0x358] sm:$0xff]  ;;  %v337_v36 = vld [vmem:[#allocation3 + $0x130] sm:$0xff] }
  0x6d   : > { %741 = vmatpush.msra.mxu0 %v327_v42  ;;  %761 = vmatpush.msra.mxu1 %v391_v43  ;;  %v401_v37 = vld [vmem:[#allocation3 + $0x330] sm:$0xff]  ;;  %v338_v38 = vld [vmem:[#allocation3 + $0x138] sm:$0xff] }
  0x6e   : > { %781 = vmatpush.msra.mxu2 %v328_v44  ;;  %801 = vmatpush.msra.mxu3 %v392_v45  ;;  %v402_v39 = vld [vmem:[#allocation3 + $0x338] sm:$0xff]  ;;  %v333_v40 = vld [vmem:[#allocation3 + $0x110] sm:$0xff] }
  0x6f   : > { %742 = vmatpush.msra.mxu0 %v323_v46  ;;  %762 = vmatpush.msra.mxu1 %v387_v47  ;;  %v397_v41 = vld [vmem:[#allocation3 + $0x310] sm:$0xff]  ;;  %v334_v42 = vld [vmem:[#allocation3 + $0x118] sm:$0xff] }
  0x70   : > { %782 = vmatpush.msra.mxu2 %v324_v48  ;;  %802 = vmatpush.msra.mxu3 %v388_v49  ;;  %v398_v43 = vld [vmem:[#allocation3 + $0x318] sm:$0xff]  ;;  %v329_v44 = vld [vmem:[#allocation3 + $0xf0] sm:$0xff] }
  0x71   : > { %743 = vmatpush.msra.mxu0 %v319_v50  ;;  %763 = vmatpush.msra.mxu1 %v383_v51  ;;  %v393_v45 = vld [vmem:[#allocation3 + $0x2f0] sm:$0xff]  ;;  %v330_v46 = vld [vmem:[#allocation3 + $0xf8] sm:$0xff] }
  0x72   : > { %783 = vmatpush.msra.mxu2 %v320_v52  ;;  %803 = vmatpush.msra.mxu3 %v384_v53  ;;  %v394_v47 = vld [vmem:[#allocation3 + $0x2f8] sm:$0xff]  ;;  %v325_v48 = vld [vmem:[#allocation3 + $0xd0] sm:$0xff] }
  0x73   : > { %744 = vmatpush.msra.mxu0 %v315_v54  ;;  %764 = vmatpush.msra.mxu1 %v379_v55  ;;  %v389_v49 = vld [vmem:[#allocation3 + $0x2d0] sm:$0xff]  ;;  %v326_v50 = vld [vmem:[#allocation3 + $0xd8] sm:$0xff] }
  0x74   : > { %784 = vmatpush.msra.mxu2 %v316_v56  ;;  %804 = vmatpush.msra.mxu3 %v380_v57  ;;  %v390_v51 = vld [vmem:[#allocation3 + $0x2d8] sm:$0xff]  ;;  %v321_v52 = vld [vmem:[#allocation3 + $0xb0] sm:$0xff] }
  0x75   : > { %669 = vmatmul.f32.vlgmr.msrb.gmra.mxu0 %v3487_v8  ;;  %709 = vmatmul.f32.vlgmr.msrb.gmra.mxu2 %v3487_v8  ;;  %v300_v8 = vld [vmem:[#allocation3 + $0x8] sm:$0xff]  ;;  %v385_v53 = vld [vmem:[#allocation3 + $0x2b0] sm:$0xff]  ;;  %v322_v54 = vld [vmem:[#allocation3 + $0xb8] sm:$0xff] }
  0x76   : > { %745 = vmatpush.msra.mxu0 %v311_v58  ;;  %765 = vmatpush.msra.mxu1 %v375_v59  ;;  %v386_v55 = vld [vmem:[#allocation3 + $0x2b8] sm:$0xff]  ;;  %v317_v56 = vld [vmem:[#allocation3 + $0x90] sm:$0xff] }
  0x77   : > { %785 = vmatpush.msra.mxu2 %v312_v60  ;;  %805 = vmatpush.msra.mxu3 %v376_v61  ;;  %v381_v57 = vld [vmem:[#allocation3 + $0x290] sm:$0xff]  ;;  %v318_v58 = vld [vmem:[#allocation3 + $0x98] sm:$0xff] }
  0x78   : > { %689 = vmatmul.f32.vlgmr.msrb.gmra.mxu1 %v3490_v9  ;;  %729 = vmatmul.f32.vlgmr.msrb.gmra.mxu3 %v3490_v9  ;;  %v361_v9 = vld [vmem:[#allocation3 + $0x1f0] sm:$0xff]  ;;  %v382_v59 = vld [vmem:[#allocation3 + $0x298] sm:$0xff] }
  0x79   : > { %746 = vmatpush.msra.mxu0 %v307_v62  ;;  %766 = vmatpush.msra.mxu1 %v371_v63  ;;  %v313_v60 = vld [vmem:[#allocation3 + $0x70] sm:$0xff]  ;;  %v314_v62 = vld [vmem:[#allocation3 + $0x78] sm:$0xff] }
  0x7a   : > { %786 = vmatpush.msra.mxu2 %v308_v0  ;;  %806 = vmatpush.msra.mxu3 %v372_v1  ;;  %v377_v61 = vld [vmem:[#allocation3 + $0x270] sm:$0xff]  ;;  %v378_v63 = vld [vmem:[#allocation3 + $0x278] sm:$0xff] }
  0x7b   : > { %747 = vmatpush.msra.mxu0 %v303_v2  ;;  %767 = vmatpush.msra.mxu1 %v367_v3  ;;  %v309_v0 = vld [vmem:[#allocation3 + $0x50] sm:$0xff]  ;;  %v310_v2 = vld [vmem:[#allocation3 + $0x58] sm:$0xff] }
  0x7c   : > { %787 = vmatpush.msra.mxu2 %v304_v4  ;;  %807 = vmatpush.msra.mxu3 %v368_v5  ;;  %v373_v1 = vld [vmem:[#allocation3 + $0x250] sm:$0xff]  ;;  %v374_v3 = vld [vmem:[#allocation3 + $0x258] sm:$0xff] }
  0x7d   : > { %748 = vmatpush.msra.mxu0 %v299_v6  ;;  %768 = vmatpush.msra.mxu1 %v363_v7  ;;  %v305_v4 = vld [vmem:[#allocation3 + $0x30] sm:$0xff]  ;;  %v306_v6 = vld [vmem:[#allocation3 + $0x38] sm:$0xff] }
  0x7e   : > { %788 = vmatpush.msra.mxu2 %v300_v8  ;;  %808 = vmatpush.msra.mxu3 %v364_v10  ;;  %v369_v5 = vld [vmem:[#allocation3 + $0x230] sm:$0xff]  ;;  %v370_v7 = vld [vmem:[#allocation3 + $0x238] sm:$0xff] }
  0x7f   : > { %749 = vmatmul.f32.vlgmr.msra.gmra.mxu0 %v3501_v11  ;;  %789 = vmatmul.f32.vlgmr.msra.gmra.mxu2 %v3501_v11  ;;  %v301_v8 = vld [vmem:[#allocation3 + $0x10] sm:$0xff] }
  0x80   : > { %813 = vmatpush.msrb.mxu0 %v361_v9  ;;  %833 = vmatpush.msrb.mxu1 %v425_v12  ;;  %v365_v10 = vld [vmem:[#allocation3 + $0x210] sm:$0xff]  ;;  %v302_v9 = vld [vmem:[#allocation3 + $0x18] sm:$0xff] }
  0x81   : > { %853 = vmatpush.msrb.mxu2 %v362_v13  ;;  %873 = vmatpush.msrb.mxu3 %v426_v14  ;;  %v366_v12 = vld [vmem:[#allocation3 + $0x218] sm:$0xff]  ;;  %v958_v13 = vld [vmem:[#allocation3 + $0x9e0] sm:$0xff] }
  0x82   : > { %769 = vmatmul.f32.vlgmr.msra.gmra.mxu1 %v3506_v15  ;;  %809 = vmatmul.f32.vlgmr.msra.gmra.mxu3 %v3506_v15  ;;  %v1022_v14 = vld [vmem:[#allocation3 + $0xbe0] sm:$0xff] }
  0x83   : > { %814 = vmatpush.msrb.mxu0 %v357_v16  ;;  %834 = vmatpush.msrb.mxu1 %v421_v17  ;;  %v959_v16 = vld [vmem:[#allocation3 + $0x9e8] sm:$0xff] }
  0x84   : > { %854 = vmatpush.msrb.mxu2 %v358_v18  ;;  %874 = vmatpush.msrb.mxu3 %v422_v19  ;;  %v1023_v17 = vld [vmem:[#allocation3 + $0xbe8] sm:$0xff]  ;;  %v954_v18 = vld [vmem:[#allocation3 + $0x9c0] sm:$0xff] }
  0x85   : > { %815 = vmatpush.msrb.mxu0 %v353_v20  ;;  %835 = vmatpush.msrb.mxu1 %v417_v21  ;;  %v1018_v19 = vld [vmem:[#allocation3 + $0xbc0] sm:$0xff]  ;;  %v955_v20 = vld [vmem:[#allocation3 + $0x9c8] sm:$0xff] }
  0x86   : > { %855 = vmatpush.msrb.mxu2 %v354_v22  ;;  %875 = vmatpush.msrb.mxu3 %v418_v23  ;;  %v1019_v21 = vld [vmem:[#allocation3 + $0xbc8] sm:$0xff]  ;;  %v950_v22 = vld [vmem:[#allocation3 + $0x9a0] sm:$0xff] }
  0x87   : > { %816 = vmatpush.msrb.mxu0 %v349_v24  ;;  %836 = vmatpush.msrb.mxu1 %v413_v25  ;;  %v1014_v23 = vld [vmem:[#allocation3 + $0xba0] sm:$0xff]  ;;  %v951_v24 = vld [vmem:[#allocation3 + $0x9a8] sm:$0xff] }
  0x88   : > { %856 = vmatpush.msrb.mxu2 %v350_v26  ;;  %876 = vmatpush.msrb.mxu3 %v414_v27  ;;  %v1015_v25 = vld [vmem:[#allocation3 + $0xba8] sm:$0xff]  ;;  %v1010_v26 = vld [vmem:[#allocation3 + $0xb80] sm:$0xff] }
  0x89   : > { %817 = vmatpush.msrb.mxu0 %v345_v28  ;;  %837 = vmatpush.msrb.mxu1 %v409_v29  ;;  %v947_v27 = vld [vmem:[#allocation3 + $0x988] sm:$0xff]  ;;  %v942_v29 = vld [vmem:[#allocation3 + $0x960] sm:$0xff] }
  0x8a   : > { %857 = vmatpush.msrb.mxu2 %v346_v30  ;;  %877 = vmatpush.msrb.mxu3 %v410_v31  ;;  %v1011_v28 = vld [vmem:[#allocation3 + $0xb88] sm:$0xff]  ;;  %v1006_v30 = vld [vmem:[#allocation3 + $0xb60] sm:$0xff] }
  0x8b   : > { %818 = vmatpush.msrb.mxu0 %v341_v32  ;;  %838 = vmatpush.msrb.mxu1 %v405_v33  ;;  %v1007_v31 = vld [vmem:[#allocation3 + $0xb68] sm:$0xff]  ;;  %v938_v32 = vld [vmem:[#allocation3 + $0x940] sm:$0xff] }
  0x8c   : > { %858 = vmatpush.msrb.mxu2 %v342_v34  ;;  %878 = vmatpush.msrb.mxu3 %v406_v35  ;;  %v1002_v33 = vld [vmem:[#allocation3 + $0xb40] sm:$0xff]  ;;  %v939_v34 = vld [vmem:[#allocation3 + $0x948] sm:$0xff] }
  0x8d   : > { %819 = vmatpush.msrb.mxu0 %v337_v36  ;;  %839 = vmatpush.msrb.mxu1 %v401_v37  ;;  %v1003_v35 = vld [vmem:[#allocation3 + $0xb48] sm:$0xff]  ;;  %v934_v36 = vld [vmem:[#allocation3 + $0x920] sm:$0xff] }
  0x8e   : > { %859 = vmatpush.msrb.mxu2 %v338_v38  ;;  %879 = vmatpush.msrb.mxu3 %v402_v39  ;;  %v998_v37 = vld [vmem:[#allocation3 + $0xb20] sm:$0xff]  ;;  %v935_v38 = vld [vmem:[#allocation3 + $0x928] sm:$0xff] }
  0x8f   : > { %820 = vmatpush.msrb.mxu0 %v333_v40  ;;  %840 = vmatpush.msrb.mxu1 %v397_v41  ;;  %v999_v39 = vld [vmem:[#allocation3 + $0xb28] sm:$0xff]  ;;  %v930_v40 = vld [vmem:[#allocation3 + $0x900] sm:$0xff] }
  0x90   : > { %860 = vmatpush.msrb.mxu2 %v334_v42  ;;  %880 = vmatpush.msrb.mxu3 %v398_v43  ;;  %v994_v41 = vld [vmem:[#allocation3 + $0xb00] sm:$0xff]  ;;  %v931_v42 = vld [vmem:[#allocation3 + $0x908] sm:$0xff] }
  0x91   : > { %821 = vmatpush.msrb.mxu0 %v329_v44  ;;  %841 = vmatpush.msrb.mxu1 %v393_v45  ;;  %v995_v43 = vld [vmem:[#allocation3 + $0xb08] sm:$0xff]  ;;  %v926_v44 = vld [vmem:[#allocation3 + $0x8e0] sm:$0xff] }
  0x92   : > { %861 = vmatpush.msrb.mxu2 %v330_v46  ;;  %881 = vmatpush.msrb.mxu3 %v394_v47  ;;  %v990_v45 = vld [vmem:[#allocation3 + $0xae0] sm:$0xff]  ;;  %v927_v46 = vld [vmem:[#allocation3 + $0x8e8] sm:$0xff] }
  0x93   : > { %822 = vmatpush.msrb.mxu0 %v325_v48  ;;  %842 = vmatpush.msrb.mxu1 %v389_v49  ;;  %v991_v47 = vld [vmem:[#allocation3 + $0xae8] sm:$0xff]  ;;  %v922_v48 = vld [vmem:[#allocation3 + $0x8c0] sm:$0xff] }
  0x94   : > { %862 = vmatpush.msrb.mxu2 %v326_v50  ;;  %882 = vmatpush.msrb.mxu3 %v390_v51  ;;  %v986_v49 = vld [vmem:[#allocation3 + $0xac0] sm:$0xff]  ;;  %v923_v50 = vld [vmem:[#allocation3 + $0x8c8] sm:$0xff] }
  0x95   : > { %823 = vmatpush.msrb.mxu0 %v321_v52  ;;  %843 = vmatpush.msrb.mxu1 %v385_v53  ;;  %v987_v51 = vld [vmem:[#allocation3 + $0xac8] sm:$0xff]  ;;  %v918_v52 = vld [vmem:[#allocation3 + $0x8a0] sm:$0xff] }
  0x96   : > { %863 = vmatpush.msrb.mxu2 %v322_v54  ;;  %883 = vmatpush.msrb.mxu3 %v386_v55  ;;  %v982_v53 = vld [vmem:[#allocation3 + $0xaa0] sm:$0xff]  ;;  %v919_v54 = vld [vmem:[#allocation3 + $0x8a8] sm:$0xff] }
  0x97   : > { %824 = vmatpush.msrb.mxu0 %v317_v56  ;;  %844 = vmatpush.msrb.mxu1 %v381_v57  ;;  %v983_v55 = vld [vmem:[#allocation3 + $0xaa8] sm:$0xff]  ;;  %v914_v56 = vld [vmem:[#allocation3 + $0x880] sm:$0xff] }
  0x98   : > { %864 = vmatpush.msrb.mxu2 %v318_v58  ;;  %884 = vmatpush.msrb.mxu3 %v382_v59  ;;  %v978_v57 = vld [vmem:[#allocation3 + $0xa80] sm:$0xff]  ;;  %v915_v58 = vld [vmem:[#allocation3 + $0x888] sm:$0xff] }
  0x99   : > { %825 = vmatpush.msrb.mxu0 %v313_v60  ;;  %845 = vmatpush.msrb.mxu1 %v377_v61  ;;  %v979_v59 = vld [vmem:[#allocation3 + $0xa88] sm:$0xff]  ;;  %v910_v60 = vld [vmem:[#allocation3 + $0x860] sm:$0xff] }
  0x9a   : > { %865 = vmatpush.msrb.mxu2 %v314_v62  ;;  %885 = vmatpush.msrb.mxu3 %v378_v63  ;;  %v974_v61 = vld [vmem:[#allocation3 + $0xa60] sm:$0xff]  ;;  %v911_v62 = vld [vmem:[#allocation3 + $0x868] sm:$0xff] }
  0x9b   : > { %826 = vmatpush.msrb.mxu0 %v309_v0  ;;  %846 = vmatpush.msrb.mxu1 %v373_v1  ;;  %v975_v63 = vld [vmem:[#allocation3 + $0xa68] sm:$0xff]  ;;  %v893_v0 = vld [vmem:[%s3480_s24] sm:$0xfc]  ;;  %v895_v1 = vld [vmem:[%s3480_s24 + $0x10] sm:$0x3] }
  0x9c   : > { %866 = vmatpush.msrb.mxu2 %v310_v2  ;;  %886 = vmatpush.msrb.mxu3 %v374_v3  ;;  %v894_v2 = vld [vmem:[%s3480_s24 + $0x8] sm:$0xfc]  ;;  %v896_v3 = vld [vmem:[%s3480_s24 + $0x18] sm:$0x3] }
  0x9d   : > { %827 = vmatpush.msrb.mxu0 %v305_v4  ;;  %847 = vmatpush.msrb.mxu1 %v369_v5  ;;  %v906_v4 = vld [vmem:[#allocation3 + $0x840] sm:$0xff] }
  0x9e   : > { %867 = vmatpush.msrb.mxu2 %v306_v6  ;;  %887 = vmatpush.msrb.mxu3 %v370_v7  ;;  %v970_v5 = vld [vmem:[#allocation3 + $0xa40] sm:$0xff]  ;;  %v907_v6 = vld [vmem:[#allocation3 + $0x848] sm:$0xff] }
  0x9f   : > { %828 = vmatpush.msrb.mxu0 %v301_v8  ;;  %848 = vmatpush.msrb.mxu1 %v365_v10  ;;  %v971_v7 = vld [vmem:[#allocation3 + $0xa48] sm:$0xff]  ;;  %v902_v8 = vld [vmem:[#allocation3 + $0x820] sm:$0xff] }
  0xa0   : > { %868 = vmatpush.msrb.mxu2 %v302_v9  ;;  %888 = vmatpush.msrb.mxu3 %v366_v12  ;;  %v966_v10 = vld [vmem:[#allocation3 + $0xa20] sm:$0xff]  ;;  %v1031_v9 = vrot.slane %v893_v0, 2  ;;  %v1032_v12 = vrot.slane %v895_v1, 2  ;;  %v921_v0 = vld [vmem:[#allocation3 + $0x8b8] sm:$0xff] }
  0xa1   : > { %829 = vmatmul.f32.vlgmr.msrb.gmra.mxu0 %v3501_v11  ;;  %869 = vmatmul.f32.vlgmr.msrb.gmra.mxu2 %v3501_v11  ;;  %v946_v11 = vld [vmem:[#allocation3 + $0x980] sm:$0xff]  ;;  %v985_v1 = vld [vmem:[#allocation3 + $0xab8] sm:$0xff] }
  0xa2   : > { %1039 = vmatpush.msra.mxu0 %v958_v13  ;;  %1059 = vmatpush.msra.mxu1 %v1022_v14  ;;  %v1034_v13 = vrot.slane %v894_v2, 2  ;;  %v1035_v14 = vrot.slane %v896_v3, 2  ;;  %v916_v2 = vld [vmem:[#allocation3 + $0x890] sm:$0xff] }
  0xa3   : > { %1079 = vmatpush.msra.mxu2 %v959_v16  ;;  %1099 = vmatpush.msra.mxu3 %v1023_v17  ;;  %v903_v16 = vld [vmem:[#allocation3 + $0x828] sm:$0xff]  ;;  %v980_v3 = vld [vmem:[#allocation3 + $0xa90] sm:$0xff] }
  0xa4   : > { %849 = vmatmul.f32.vlgmr.msrb.gmra.mxu1 %v3506_v15  ;;  %889 = vmatmul.f32.vlgmr.msrb.gmra.mxu3 %v3506_v15  ;;  %v943_v15 = vld [vmem:[#allocation3 + $0x968] sm:$0xff] }
  0xa5   : > { %1040 = vmatpush.msra.mxu0 %v954_v18  ;;  %1060 = vmatpush.msra.mxu1 %v1018_v19  ;;  %v967_v17 = vld [vmem:[#allocation3 + $0xa28] sm:$0xff]  ;;  %v898_v18 = vld [vmem:[#allocation3 + $0x800] sm:$0xff] }
  0xa6   : > { %1080 = vmatpush.msra.mxu2 %v955_v20  ;;  %1100 = vmatpush.msra.mxu3 %v1019_v21  ;;  %v962_v19 = vld [vmem:[#allocation3 + $0xa00] sm:$0xff]  ;;  %v899_v20 = vld [vmem:[#allocation3 + $0x808] sm:$0xff] }
  0xa7   : > { %1041 = vmatpush.msra.mxu0 %v950_v22  ;;  %1061 = vmatpush.msra.mxu1 %v1014_v23  ;;  %v963_v21 = vld [vmem:[#allocation3 + $0xa08] sm:$0xff]  ;;  %v3519_v22 = vsel %vm1030_vm1, %v1031_v9, %v1032_v12  ;;  %v3522_v23 = vsel %vm1030_vm1, %v1034_v13, %v1035_v14  ;;  %v908_v9 = vld [vmem:[#allocation3 + $0x850] sm:$0xff]  ;;  %v909_v13 = vld [vmem:[#allocation3 + $0x858] sm:$0xff] }
  0xa8   : > { %1081 = vmatpush.msra.mxu2 %v951_v24  ;;  %1101 = vmatpush.msra.mxu3 %v1015_v25  ;;  %v960_v24 = vld [vmem:[#allocation3 + $0x9f0] sm:$0xff]  ;;  %v973_v14 = vld [vmem:[#allocation3 + $0xa58] sm:$0xff] }
  0xa9   : > { %1042 = vmatpush.msra.mxu0 %v946_v11  ;;  %1062 = vmatpush.msra.mxu1 %v1010_v26  ;;  %v1024_v25 = vld [vmem:[#allocation3 + $0xbf0] sm:$0xff]  ;;  %v961_v11 = vld [vmem:[#allocation3 + $0x9f8] sm:$0xff] }
  0xaa   : > { %1082 = vmatpush.msra.mxu2 %v947_v27  ;;  %1102 = vmatpush.msra.mxu3 %v1011_v28  ;;  %v1025_v26 = vld [vmem:[#allocation3 + $0xbf8] sm:$0xff]  ;;  %v956_v27 = vld [vmem:[#allocation3 + $0x9d0] sm:$0xff] }
  0xab   : > { %1043 = vmatpush.msra.mxu0 %v942_v29  ;;  %1063 = vmatpush.msra.mxu1 %v1006_v30  ;;  %v1020_v28 = vld [vmem:[#allocation3 + $0xbd0] sm:$0xff]  ;;  %v957_v29 = vld [vmem:[#allocation3 + $0x9d8] sm:$0xff] }
  0xac   : > { %1083 = vmatpush.msra.mxu2 %v943_v15  ;;  %1103 = vmatpush.msra.mxu3 %v1007_v31  ;;  %v1021_v30 = vld [vmem:[#allocation3 + $0xbd8] sm:$0xff]  ;;  %v952_v15 = vld [vmem:[#allocation3 + $0x9b0] sm:$0xff] }
  0xad   : > { %1044 = vmatpush.msra.mxu0 %v938_v32  ;;  %1064 = vmatpush.msra.mxu1 %v1002_v33  ;;  %v1016_v31 = vld [vmem:[#allocation3 + $0xbb0] sm:$0xff]  ;;  %v953_v32 = vld [vmem:[#allocation3 + $0x9b8] sm:$0xff] }
  0xae   : > { %1084 = vmatpush.msra.mxu2 %v939_v34  ;;  %1104 = vmatpush.msra.mxu3 %v1003_v35  ;;  %v1017_v33 = vld [vmem:[#allocation3 + $0xbb8] sm:$0xff]  ;;  %v948_v34 = vld [vmem:[#allocation3 + $0x990] sm:$0xff] }
  0xaf   : > { %1045 = vmatpush.msra.mxu0 %v934_v36  ;;  %1065 = vmatpush.msra.mxu1 %v998_v37  ;;  %v1012_v35 = vld [vmem:[#allocation3 + $0xb90] sm:$0xff]  ;;  %v949_v36 = vld [vmem:[#allocation3 + $0x998] sm:$0xff] }
  0xb0   : > { %1085 = vmatpush.msra.mxu2 %v935_v38  ;;  %1105 = vmatpush.msra.mxu3 %v999_v39  ;;  %v1013_v37 = vld [vmem:[#allocation3 + $0xb98] sm:$0xff]  ;;  %v944_v38 = vld [vmem:[#allocation3 + $0x970] sm:$0xff] }
  0xb1   : > { %1046 = vmatpush.msra.mxu0 %v930_v40  ;;  %1066 = vmatpush.msra.mxu1 %v994_v41  ;;  %v1008_v39 = vld [vmem:[#allocation3 + $0xb70] sm:$0xff]  ;;  %v945_v40 = vld [vmem:[#allocation3 + $0x978] sm:$0xff] }
  0xb2   : > { %1086 = vmatpush.msra.mxu2 %v931_v42  ;;  %1106 = vmatpush.msra.mxu3 %v995_v43  ;;  %v1009_v41 = vld [vmem:[#allocation3 + $0xb78] sm:$0xff]  ;;  %v940_v42 = vld [vmem:[#allocation3 + $0x950] sm:$0xff] }
  0xb3   : > { %1047 = vmatpush.msra.mxu0 %v926_v44  ;;  %1067 = vmatpush.msra.mxu1 %v990_v45  ;;  %v1004_v43 = vld [vmem:[#allocation3 + $0xb50] sm:$0xff]  ;;  %v941_v44 = vld [vmem:[#allocation3 + $0x958] sm:$0xff] }
  0xb4   : > { %1087 = vmatpush.msra.mxu2 %v927_v46  ;;  %1107 = vmatpush.msra.mxu3 %v991_v47  ;;  %v1005_v45 = vld [vmem:[#allocation3 + $0xb58] sm:$0xff]  ;;  %v936_v46 = vld [vmem:[#allocation3 + $0x930] sm:$0xff] }
  0xb5   : > { %1048 = vmatpush.msra.mxu0 %v922_v48  ;;  %1068 = vmatpush.msra.mxu1 %v986_v49  ;;  %v1000_v47 = vld [vmem:[#allocation3 + $0xb30] sm:$0xff]  ;;  %v937_v48 = vld [vmem:[#allocation3 + $0x938] sm:$0xff] }
  0xb6   : > { %1088 = vmatpush.msra.mxu2 %v923_v50  ;;  %1108 = vmatpush.msra.mxu3 %v987_v51  ;;  %v1001_v49 = vld [vmem:[#allocation3 + $0xb38] sm:$0xff]  ;;  %v932_v50 = vld [vmem:[#allocation3 + $0x910] sm:$0xff] }
  0xb7   : > { %1049 = vmatpush.msra.mxu0 %v918_v52  ;;  %1069 = vmatpush.msra.mxu1 %v982_v53  ;;  %v996_v51 = vld [vmem:[#allocation3 + $0xb10] sm:$0xff]  ;;  %v933_v52 = vld [vmem:[#allocation3 + $0x918] sm:$0xff] }
  0xb8   : > { %1089 = vmatpush.msra.mxu2 %v919_v54  ;;  %1109 = vmatpush.msra.mxu3 %v983_v55  ;;  %v997_v53 = vld [vmem:[#allocation3 + $0xb18] sm:$0xff]  ;;  %v928_v54 = vld [vmem:[#allocation3 + $0x8f0] sm:$0xff] }
  0xb9   : > { %1050 = vmatpush.msra.mxu0 %v914_v56  ;;  %1070 = vmatpush.msra.mxu1 %v978_v57  ;;  %v992_v55 = vld [vmem:[#allocation3 + $0xaf0] sm:$0xff]  ;;  %v929_v56 = vld [vmem:[#allocation3 + $0x8f8] sm:$0xff] }
  0xba   : > { %1090 = vmatpush.msra.mxu2 %v915_v58  ;;  %1110 = vmatpush.msra.mxu3 %v979_v59  ;;  %v993_v57 = vld [vmem:[#allocation3 + $0xaf8] sm:$0xff]  ;;  %v924_v58 = vld [vmem:[#allocation3 + $0x8d0] sm:$0xff] }
  0xbb   : > { %1051 = vmatpush.msra.mxu0 %v910_v60  ;;  %1071 = vmatpush.msra.mxu1 %v974_v61  ;;  %v988_v59 = vld [vmem:[#allocation3 + $0xad0] sm:$0xff]  ;;  %v925_v60 = vld [vmem:[#allocation3 + $0x8d8] sm:$0xff] }
  0xbc   : > { %1091 = vmatpush.msra.mxu2 %v911_v62  ;;  %1111 = vmatpush.msra.mxu3 %v975_v63  ;;  %v989_v61 = vld [vmem:[#allocation3 + $0xad8] sm:$0xff]  ;;  %v920_v62 = vld [vmem:[#allocation3 + $0x8b0] sm:$0xff] }
  0xbd   : > { %1052 = vmatpush.msra.mxu0 %v906_v4  ;;  %1072 = vmatpush.msra.mxu1 %v970_v5  ;;  %v984_v63 = vld [vmem:[#allocation3 + $0xab0] sm:$0xff]  ;;  %v917_v4 = vld [vmem:[#allocation3 + $0x898] sm:$0xff] }
  0xbe   : > { %1092 = vmatpush.msra.mxu2 %v907_v6  ;;  %1112 = vmatpush.msra.mxu3 %v971_v7  ;;  %v981_v5 = vld [vmem:[#allocation3 + $0xa98] sm:$0xff]  ;;  %v912_v6 = vld [vmem:[#allocation3 + $0x870] sm:$0xff] }
  0xbf   : > { %1053 = vmatpush.msra.mxu0 %v902_v8  ;;  %1073 = vmatpush.msra.mxu1 %v966_v10  ;;  %v976_v7 = vld [vmem:[#allocation3 + $0xa70] sm:$0xff]  ;;  %v913_v8 = vld [vmem:[#allocation3 + $0x878] sm:$0xff] }
  0xc0   : > { %1093 = vmatpush.msra.mxu2 %v903_v16  ;;  %1113 = vmatpush.msra.mxu3 %v967_v17  ;;  %v977_v10 = vld [vmem:[#allocation3 + $0xa78] sm:$0xff]  ;;  %v972_v12 = vld [vmem:[#allocation3 + $0xa50] sm:$0xff] }
  0xc1   : > { %1054 = vmatpush.msra.mxu0 %v898_v18  ;;  %1074 = vmatpush.msra.mxu1 %v962_v19  ;;  %v904_v16 = vld [vmem:[#allocation3 + $0x830] sm:$0xff]  ;;  %v905_v18 = vld [vmem:[#allocation3 + $0x838] sm:$0xff] }
  0xc2   : > { %1094 = vmatpush.msra.mxu2 %v899_v20  ;;  %1114 = vmatpush.msra.mxu3 %v963_v21  ;;  %v968_v17 = vld [vmem:[#allocation3 + $0xa30] sm:$0xff]  ;;  %v969_v19 = vld [vmem:[#allocation3 + $0xa38] sm:$0xff] }
  0xc3   : > { %1055 = vmatmul.f32.vlgmr.msra.gmra.mxu0 %v3519_v22  ;;  %1075 = vmatmul.f32.vlgmr.msra.gmra.mxu1 %v3522_v23  ;;  %v900_v20 = vld [vmem:[#allocation3 + $0x810] sm:$0xff] }
  0xc4   : > { %1095 = vmatmul.f32.vlgmr.msra.gmra.mxu2 %v3519_v22  ;;  %1115 = vmatmul.f32.vlgmr.msra.gmra.mxu3 %v3522_v23  ;;  %v964_v21 = vld [vmem:[#allocation3 + $0xa10] sm:$0xff] }
  0xc5   : > { %1119 = vmatpush.msrb.mxu0 %v960_v24  ;;  %1139 = vmatpush.msrb.mxu1 %v1024_v25  ;;  %v901_v24 = vld [vmem:[#allocation3 + $0x818] sm:$0xff] }
  0xc6   : > { %1159 = vmatpush.msrb.mxu2 %v961_v11  ;;  %1179 = vmatpush.msrb.mxu3 %v1025_v26  ;;  %v965_v25 = vld [vmem:[#allocation3 + $0xa18] sm:$0xff]  ;;  %v1570_v11 = vld [vmem:[#allocation7 + $0x9e0] sm:$0xff] }
  0xc7   : > { %1120 = vmatpush.msrb.mxu0 %v956_v27  ;;  %1140 = vmatpush.msrb.mxu1 %v1020_v28  ;;  %v1566_v26 = vld [vmem:[#allocation7 + $0x9c0] sm:$0xff] }
  0xc8   : > { %1160 = vmatpush.msrb.mxu2 %v957_v29  ;;  %1180 = vmatpush.msrb.mxu3 %v1021_v30  ;;  %v1634_v27 = vld [vmem:[#allocation7 + $0xbe0] sm:$0xff] }
  0xc9   : > { %1121 = vmatpush.msrb.mxu0 %v952_v15  ;;  %1141 = vmatpush.msrb.mxu1 %v1016_v31  ;;  %v1562_v28 = vld [vmem:[#allocation7 + $0x9a0] sm:$0xff] }
  0xca   : > { %1161 = vmatpush.msrb.mxu2 %v953_v32  ;;  %1181 = vmatpush.msrb.mxu3 %v1017_v33  ;;  %v1630_v29 = vld [vmem:[#allocation7 + $0xbc0] sm:$0xff] }
  0xcb   : > { %1122 = vmatpush.msrb.mxu0 %v948_v34  ;;  %1142 = vmatpush.msrb.mxu1 %v1012_v35  ;;  %v1558_v30 = vld [vmem:[#allocation7 + $0x980] sm:$0xff] }
  0xcc   : > { %1162 = vmatpush.msrb.mxu2 %v949_v36  ;;  %1182 = vmatpush.msrb.mxu3 %v1013_v37  ;;  %v1554_v15 = vld [vmem:[#allocation7 + $0x960] sm:$0xff] }
  0xcd   : > { %1123 = vmatpush.msrb.mxu0 %v944_v38  ;;  %1143 = vmatpush.msrb.mxu1 %v1008_v39  ;;  %v1550_v31 = vld [vmem:[#allocation7 + $0x940] sm:$0xff] }
  0xce   : > { %1163 = vmatpush.msrb.mxu2 %v945_v40  ;;  %1183 = vmatpush.msrb.mxu3 %v1009_v41  ;;  %v1626_v32 = vld [vmem:[#allocation7 + $0xba0] sm:$0xff] }
  0xcf   : > { %1124 = vmatpush.msrb.mxu0 %v940_v42  ;;  %1144 = vmatpush.msrb.mxu1 %v1004_v43  ;;  %v1542_v33 = vld [vmem:[#allocation7 + $0x900] sm:$0xff] }
  0xd0   : > { %1164 = vmatpush.msrb.mxu2 %v941_v44  ;;  %1184 = vmatpush.msrb.mxu3 %v1005_v45  ;;  %v1618_v34 = vld [vmem:[#allocation7 + $0xb60] sm:$0xff] }
  0xd1   : > { %1125 = vmatpush.msrb.mxu0 %v936_v46  ;;  %1145 = vmatpush.msrb.mxu1 %v1000_v47  ;;  %v1538_v35 = vld [vmem:[#allocation7 + $0x8e0] sm:$0xff] }
  0xd2   : > { %1165 = vmatpush.msrb.mxu2 %v937_v48  ;;  %1185 = vmatpush.msrb.mxu3 %v1001_v49  ;;  %v1614_v36 = vld [vmem:[#allocation7 + $0xb40] sm:$0xff] }
  0xd3   : > { %1126 = vmatpush.msrb.mxu0 %v932_v50  ;;  %1146 = vmatpush.msrb.mxu1 %v996_v51  ;;  %v1534_v37 = vld [vmem:[#allocation7 + $0x8c0] sm:$0xff] }
  0xd4   : > { %1166 = vmatpush.msrb.mxu2 %v933_v52  ;;  %1186 = vmatpush.msrb.mxu3 %v997_v53  ;;  %v1610_v38 = vld [vmem:[#allocation7 + $0xb20] sm:$0xff] }
  0xd5   : > { %1127 = vmatpush.msrb.mxu0 %v928_v54  ;;  %1147 = vmatpush.msrb.mxu1 %v992_v55  ;;  %v1530_v39 = vld [vmem:[#allocation7 + $0x8a0] sm:$0xff] }
  0xd6   : > { %1167 = vmatpush.msrb.mxu2 %v929_v56  ;;  %1187 = vmatpush.msrb.mxu3 %v993_v57  ;;  %v1606_v40 = vld [vmem:[#allocation7 + $0xb00] sm:$0xff]  ;;  %v1571_v57 = vld [vmem:[#allocation7 + $0x9e8] sm:$0xff] }
  0xd7   : > { %1128 = vmatpush.msrb.mxu0 %v924_v58  ;;  %1148 = vmatpush.msrb.mxu1 %v988_v59  ;;  %v1526_v41 = vld [vmem:[#allocation7 + $0x880] sm:$0xff] }
  0xd8   : > { %1168 = vmatpush.msrb.mxu2 %v925_v60  ;;  %1188 = vmatpush.msrb.mxu3 %v989_v61  ;;  %v1602_v42 = vld [vmem:[#allocation7 + $0xae0] sm:$0xff]  ;;  %v1567_v60 = vld [vmem:[#allocation7 + $0x9c8] sm:$0xff] }
  0xd9   : > { %1129 = vmatpush.msrb.mxu0 %v920_v62  ;;  %1149 = vmatpush.msrb.mxu1 %v984_v63  ;;  %v1522_v43 = vld [vmem:[#allocation7 + $0x860] sm:$0xff]  ;;  %v1563_v62 = vld [vmem:[#allocation7 + $0x9a8] sm:$0xff] }
  0xda   : > { %1169 = vmatpush.msrb.mxu2 %v921_v0  ;;  %1189 = vmatpush.msrb.mxu3 %v985_v1  ;;  %v1598_v44 = vld [vmem:[#allocation7 + $0xac0] sm:$0xff]  ;;  %v1559_v0 = vld [vmem:[#allocation7 + $0x988] sm:$0xff] }
  0xdb   : > { %1130 = vmatpush.msrb.mxu0 %v916_v2  ;;  %1150 = vmatpush.msrb.mxu1 %v980_v3  ;;  %v1698_v45 = vld [vmem:[#allocation7 + $0xde0] sm:$0xff]  ;;  %v1635_v1 = vld [vmem:[#allocation7 + $0xbe8] sm:$0xff] }
  0xdc   : > { %1170 = vmatpush.msrb.mxu2 %v917_v4  ;;  %1190 = vmatpush.msrb.mxu3 %v981_v5  ;;  %v1694_v46 = vld [vmem:[#allocation7 + $0xdc0] sm:$0xff]  ;;  %v1555_v2 = vld [vmem:[#allocation7 + $0x968] sm:$0xff]  ;;  %v3532_v4 = vpop.f32.mrf.mxu0  ;;  %v3534_v5 = vpop.f32.mrf.mxu1 }
  0xdd   : > { %1131 = vmatpush.msrb.mxu0 %v912_v6  ;;  %1151 = vmatpush.msrb.mxu1 %v976_v7  ;;  %v1518_v47 = vld [vmem:[#allocation7 + $0x840] sm:$0xff]  ;;  %v1631_v3 = vld [vmem:[#allocation7 + $0xbc8] sm:$0xff] }
  0xde   : > { %1171 = vmatpush.msrb.mxu2 %v913_v8  ;;  %1191 = vmatpush.msrb.mxu3 %v977_v10  ;;  %v1594_v48 = vld [vmem:[#allocation7 + $0xaa0] sm:$0xff]  ;;  %v1551_v8 = vld [vmem:[#allocation7 + $0x948] sm:$0xff] }
  0xdf   : > { %1132 = vmatpush.msrb.mxu0 %v908_v9  ;;  %1152 = vmatpush.msrb.mxu1 %v972_v12  ;;  %v1690_v49 = vld [vmem:[#allocation7 + $0xda0] sm:$0xff]  ;;  %v3536_v10 = vpop.f32.mrf.mxu2  ;;  %v3538_v9 = vpop.f32.mrf.mxu3  ;;  %v1627_v12 = vld [vmem:[#allocation7 + $0xba8] sm:$0xff] }
  0xe0   : > { %1172 = vmatpush.msrb.mxu2 %v909_v13  ;;  %1192 = vmatpush.msrb.mxu3 %v973_v14  ;;  %v1514_v50 = vld [vmem:[#allocation7 + $0x820] sm:$0xff] }
  0xe1   : > { %1133 = vmatpush.msrb.mxu0 %v904_v16  ;;  %1153 = vmatpush.msrb.mxu1 %v968_v17  ;;  %v1590_v51 = vld [vmem:[#allocation7 + $0xa80] sm:$0xff] }
  0xe2   : > { %1173 = vmatpush.msrb.mxu2 %v905_v18  ;;  %1193 = vmatpush.msrb.mxu3 %v969_v19  ;;  %v1762_v52 = vld [vmem:[#allocation7 + $0xfe0] sm:$0xff]  ;;  %v1547_v18 = vld [vmem:[#allocation7 + $0x928] sm:$0xff] }
  0xe3   : > { %1134 = vmatpush.msrb.mxu0 %v900_v20  ;;  %1154 = vmatpush.msrb.mxu1 %v964_v21  ;;  %v1686_v53 = vld [vmem:[#allocation7 + $0xd80] sm:$0xff]  ;;  %v1623_v19 = vld [vmem:[#allocation7 + $0xb88] sm:$0xff] }
  0xe4   : > { %1174 = vmatpush.msrb.mxu2 %v901_v24  ;;  %1194 = vmatpush.msrb.mxu3 %v965_v25  ;;  %v1758_v54 = vld [vmem:[#allocation7 + $0xfc0] sm:$0xff]  ;;  %v1543_v24 = vld [vmem:[#allocation7 + $0x908] sm:$0xff] }
  0xe5   : > { %1135 = vmatmul.f32.vlgmr.msrb.gmra.mxu0 %v3519_v22  ;;  %1155 = vmatmul.f32.vlgmr.msrb.gmra.mxu1 %v3522_v23  ;;  %v1510_v55 = vld [vmem:[#allocation7 + $0x800] sm:$0xff]  ;;  %v1619_v25 = vld [vmem:[#allocation7 + $0xb68] sm:$0xff] }
  0xe6   : > { %1175 = vmatmul.f32.vlgmr.msrb.gmra.mxu2 %v3519_v22  ;;  %1195 = vmatmul.f32.vlgmr.msrb.gmra.mxu3 %v3522_v23  ;;  %v1546_v22 = vld [vmem:[#allocation7 + $0x920] sm:$0xff] }
  0xe7   : > { %1790 = vmatpush.msra.mxu0 %v1570_v11  ;;  %1810 = vmatpush.msra.mxu1 %v1634_v27  ;;  %v1622_v23 = vld [vmem:[#allocation7 + $0xb80] sm:$0xff]  ;;  %v1539_v27 = vld [vmem:[#allocation7 + $0x8e8] sm:$0xff] }
  0xe8   : > { %1830 = vmatpush.msra.mxu2 %v1698_v45  ;;  %v1586_v56 = vld [vmem:[#allocation7 + $0xa60] sm:$0xff]  ;;  %1850 = vmatpush.msra.mxu3 %v1762_v52  ;;  %v288_v45 = vlaneseq }
  0xe9   : > { %1791 = vmatpush.msra.mxu0 %v1566_v26  ;;  %1811 = vmatpush.msra.mxu1 %v1630_v29  ;;  %v1682_v58 = vld [vmem:[#allocation7 + $0xd60] sm:$0xff] }
  0xea   : > { %1831 = vmatpush.msra.mxu2 %v1694_v46  ;;  %v1582_v59 = vld [vmem:[#allocation7 + $0xa40] sm:$0xff]  ;;  %1851 = vmatpush.msra.mxu3 %v1758_v54  ;;  %v1599_v46 = vld [vmem:[#allocation7 + $0xac8] sm:$0xff]  ;;  %vm290_vm2 = vcmp.lt.s32.totalorder %v288_v45, 512 }
  0xeb   : > { %1792 = vmatpush.msra.mxu0 %v1562_v28  ;;  %1812 = vmatpush.msra.mxu1 %v1626_v32  ;;  %v1578_v61 = vld [vmem:[#allocation7 + $0xa20] sm:$0xff]  ;;  %v1615_v28 = vld [vmem:[#allocation7 + $0xb48] sm:$0xff] }
  0xec   : > { %1832 = vmatpush.msra.mxu2 %v1690_v49  ;;  %v1574_v63 = vld [vmem:[#allocation7 + $0xa00] sm:$0xff]  ;;  %v1519_v49 = vld [vmem:[#allocation7 + $0x848] sm:$0xff] }
  0xed   : > { %1793 = vmatpush.msra.mxu0 %v1558_v30  ;;  %1813 = vmatpush.msra.mxu1 %v1622_v23  ;;  %v1678_v6 = vld [vmem:[#allocation7 + $0xd40] sm:$0xff]  ;;  %v1591_v54 = vld [vmem:[#allocation7 + $0xa88] sm:$0xff] }
  0xee   : > { %1833 = vmatpush.msra.mxu2 %v1686_v53  ;;  %v1754_v7 = vld [vmem:[#allocation7 + $0xfa0] sm:$0xff]  ;;  %v1515_v53 = vld [vmem:[#allocation7 + $0x828] sm:$0xff] }
  0xef   : > { %1794 = vmatpush.msra.mxu0 %v1554_v15  ;;  %1814 = vmatpush.msra.mxu1 %v1618_v34  ;;  %v1674_v16 = vld [vmem:[#allocation7 + $0xd20] sm:$0xff]  ;;  %v1535_v15 = vld [vmem:[#allocation7 + $0x8c8] sm:$0xff] }
  0xf0   : > { %1834 = vmatpush.msra.mxu2 %v1682_v58  ;;  %1852 = vmatpush.msra.mxu3 %v1754_v7  ;;  %v1750_v17 = vld [vmem:[#allocation7 + $0xf80] sm:$0xff]  ;;  %v1531_v34 = vld [vmem:[#allocation7 + $0x8a8] sm:$0xff]  ;;  %v611_v7 = vadd.f32 %v3534_v5, %v3532_v4 }
  0xf1   : > { %1795 = vmatpush.msra.mxu0 %v1550_v31  ;;  %1815 = vmatpush.msra.mxu1 %v1614_v36  ;;  %v1670_v20 = vld [vmem:[#allocation7 + $0xd00] sm:$0xff]  ;;  %v1759_v4 = vld [vmem:[#allocation7 + $0xfc8] sm:$0xff] }
  0xf2   : > { %1835 = vmatpush.msra.mxu2 %v1678_v6  ;;  %v3540_v13 = vpop.f32.mrf.mxu0  ;;  %1853 = vmatpush.msra.mxu3 %v1750_v17  ;;  %v1746_v21 = vld [vmem:[#allocation7 + $0xf60] sm:$0xff]  ;;  %v1667_v45 = vld [vmem:[#allocation7 + $0xce8] sm:$0xff] }
  0xf3   : > { %1796 = vmatpush.msra.mxu0 %v1546_v22  ;;  %1816 = vmatpush.msra.mxu1 %v1610_v38  ;;  %v1666_v11 = vld [vmem:[#allocation7 + $0xce0] sm:$0xff]  ;;  %v1611_v22 = vld [vmem:[#allocation7 + $0xb28] sm:$0xff] }
  0xf4   : > { %1836 = vmatpush.msra.mxu2 %v1674_v16  ;;  %1854 = vmatpush.msra.mxu3 %v1746_v21  ;;  %v1742_v26 = vld [vmem:[#allocation7 + $0xf40] sm:$0xff]  ;;  %v1763_v21 = vld [vmem:[#allocation7 + $0xfe8] sm:$0xff] }
  0xf5   : > { %1797 = vmatpush.msra.mxu0 %v1542_v33  ;;  %1817 = vmatpush.msra.mxu1 %v1606_v40  ;;  %v3542_v14 = vpop.f32.mrf.mxu1  ;;  %v1662_v29 = vld [vmem:[#allocation7 + $0xcc0] sm:$0xff]  ;;  %v1527_v40 = vld [vmem:[#allocation7 + $0x888] sm:$0xff] }
  0xf6   : > { %1837 = vmatpush.msra.mxu2 %v1670_v20  ;;  %1855 = vmatpush.msra.mxu3 %v1742_v26  ;;  %v1738_v30 = vld [vmem:[#allocation7 + $0xf20] sm:$0xff]  ;;  %v1687_v20 = vld [vmem:[#allocation7 + $0xd88] sm:$0xff] }
  0xf7   : > { %1798 = vmatpush.msra.mxu0 %v1538_v35  ;;  %1818 = vmatpush.msra.mxu1 %v1602_v42  ;;  %v1658_v23 = vld [vmem:[#allocation7 + $0xca0] sm:$0xff]  ;;  %v1607_v35 = vld [vmem:[#allocation7 + $0xb08] sm:$0xff] }
  0xf8   : > { %1838 = vmatpush.msra.mxu2 %v1666_v11  ;;  %v3544_v31 = vpop.f32.mrf.mxu2  ;;  %1856 = vmatpush.msra.mxu3 %v1738_v30  ;;  %v1734_v33 = vld [vmem:[#allocation7 + $0xf00] sm:$0xff]  ;;  %v1683_v26 = vld [vmem:[#allocation7 + $0xd68] sm:$0xff]  ;;  %v651_v30 = vadd.f32 %v3538_v9, %v3536_v10 }
  0xf9   : > { %1799 = vmatpush.msra.mxu0 %v1534_v37  ;;  %1819 = vmatpush.msra.mxu1 %v1598_v44  ;;  %v1654_v38 = vld [vmem:[#allocation7 + $0xc80] sm:$0xff]  ;;  %v1523_v44 = vld [vmem:[#allocation7 + $0x868] sm:$0xff] }
  0xfa   : > { %1839 = vmatpush.msra.mxu2 %v1662_v29  ;;  %1857 = vmatpush.msra.mxu3 %v1734_v33  ;;  %v1650_v42 = vld [vmem:[#allocation7 + $0xc60] sm:$0xff] }
  0xfb   : > { %1800 = vmatpush.msra.mxu0 %v1530_v39  ;;  %1820 = vmatpush.msra.mxu1 %v1594_v48  ;;  %v3546_v32 = vpop.f32.mrf.mxu3  ;;  %v1730_v39 = vld [vmem:[#allocation7 + $0xee0] sm:$0xff] }
  0xfc   : > { %1840 = vmatpush.msra.mxu2 %v1658_v23  ;;  %v3548_v36 = vpop.f32.mrf.mxu0  ;;  %1858 = vmatpush.msra.mxu3 %v1730_v39  ;;  %v1722_v48 = vld [vmem:[#allocation7 + $0xea0] sm:$0xff]  ;;  %v1755_v23 = vld [vmem:[#allocation7 + $0xfa8] sm:$0xff] }
  0xfd   : > { %1801 = vmatpush.msra.mxu0 %v1526_v41  ;;  %1821 = vmatpush.msra.mxu1 %v1590_v51  ;;  %v1603_v41 = vld [vmem:[#allocation7 + $0xae8] sm:$0xff]  ;;  %v1642_v51 = vld [vmem:[#allocation7 + $0xc20] sm:$0xff]  ;;  %v751_v17 = vadd.f32 %v3548_v36, %v611_v7 }
  0xfe   : > { %1841 = vmatpush.msra.mxu2 %v1654_v38  ;;  %v1718_v52 = vld [vmem:[#allocation7 + $0xe80] sm:$0xff]  ;;  %v1751_v36 = vld [vmem:[#allocation7 + $0xf88] sm:$0xff] }
  0xff   : > { %1802 = vmatpush.msra.mxu0 %v1522_v43  ;;  %1822 = vmatpush.msra.mxu1 %v1586_v56  ;;  %v3550_v37 = vpop.f32.mrf.mxu1  ;;  %v1726_v43 = vld [vmem:[#allocation7 + $0xec0] sm:$0xff]  ;;  %v1719_v7 = vld [vmem:[#allocation7 + $0xe88] sm:$0xff] }
 0x100   : > { %1842 = vmatpush.msra.mxu2 %v1650_v42  ;;  %1859 = vmatpush.msra.mxu3 %v1726_v43  ;;  %v1638_v56 = vld [vmem:[#allocation7 + $0xc00] sm:$0xff] }
 0x101   : > { %1803 = vmatpush.msra.mxu0 %v1518_v47  ;;  %1823 = vmatpush.msra.mxu1 %v1582_v59  ;;  %v1646_v47 = vld [vmem:[#allocation7 + $0xc40] sm:$0xff] }
 0x102   : > { %1843 = vmatpush.msra.mxu2 %v1646_v47  ;;  %1860 = vmatpush.msra.mxu3 %v1722_v48  ;;  %v790_v58 = vpop.f32.mrf.mxu2  ;;  %v1706_v6 = vld [vmem:[#allocation7 + $0xe20] sm:$0xff]  ;;  %v1663_v48 = vld [vmem:[#allocation7 + $0xcc8] sm:$0xff] }
 0x103   : > { %1804 = vmatpush.msra.mxu0 %v1514_v50  ;;  %1824 = vmatpush.msra.mxu1 %v1578_v61  ;;  %v1595_v50 = vld [vmem:[#allocation7 + $0xaa8] sm:$0xff]  ;;  %v1702_v16 = vld [vmem:[#allocation7 + $0xe00] sm:$0xff]  ;;  %v791_v33 = vadd.f32 %v790_v58, %v651_v30 }
 0x104   : > { %1844 = vmatpush.msra.mxu2 %v1642_v51  ;;  %1861 = vmatpush.msra.mxu3 %v1718_v52  ;;  %v1587_v61 = vld [vmem:[#allocation7 + $0xa68] sm:$0xff] }
 0x105   : > { %1805 = vmatpush.msra.mxu0 %v1510_v55  ;;  %1825 = vmatpush.msra.mxu1 %v1574_v63  ;;  %v3380_v55 = vmov 0.0   ;;  %v3552_v59 = vpop.f32.mrf.mxu3  ;;  %v1659_v51 = vld [vmem:[#allocation7 + $0xca8] sm:$0xff] }
 0x106   : > { %292 = vst.msk [vmem:[#allocation2] ss:$8 sm:$0xf] %vm290_vm2, %v3380_v55  ;;  %1845 = vmatpush.msra.mxu2 %v1638_v56  ;;  %v811_v10 = vadd.f32 %v3552_v59, %v791_v33  ;;  %v1735_v52 = vld [vmem:[#allocation7 + $0xf08] sm:$0xff] }
 0x107   : > { %1870 = vmatpush.msrb.mxu0 %v1571_v57  ;;  %1890 = vmatpush.msrb.mxu1 %v1635_v1  ;;  %v1714_v57 = vld [vmem:[#allocation7 + $0xe60] sm:$0xff]  ;;  %295 = vst.msk [vmem:[#allocation2 + $0x21] ss:$8 sm:$0xf] %vm290_vm2, %v3380_v55  ;;  %v1731_v55 = vld [vmem:[#allocation7 + $0xee8] sm:$0xff] }
 0x108   : > { %v1710_v1 = vld [vmem:[#allocation7 + $0xe40] sm:$0xff]  ;;  %1862 = vmatpush.msra.mxu3 %v1714_v57  ;;  %v1651_v57 = vld [vmem:[#allocation7 + $0xc68] sm:$0xff] }
 0x109   : > { %1871 = vmatpush.msrb.mxu0 %v1567_v60  ;;  %1891 = vmatpush.msrb.mxu1 %v1631_v3  ;;  %v1511_v60 = vld [vmem:[#allocation7 + $0x808] sm:$0xff] }
 0x10a   : > { %v1695_v3 = vld [vmem:[#allocation7 + $0xdc8] sm:$0xff]  ;;  %1863 = vmatpush.msra.mxu3 %v1710_v1 }
 0x10b   : > { %1872 = vmatpush.msrb.mxu0 %v1563_v62  ;;  %1892 = vmatpush.msrb.mxu1 %v1627_v12  ;;  %v1691_v12 = vld [vmem:[#allocation7 + $0xda8] sm:$0xff] }
 0x10c   : > { %1864 = vmatpush.msra.mxu3 %v1706_v6  ;;  %v1727_v58 = vld [vmem:[#allocation7 + $0xec8] sm:$0xff] }
 0x10d   : > { %1873 = vmatpush.msrb.mxu0 %v1559_v0  ;;  %1893 = vmatpush.msrb.mxu1 %v1623_v19  ;;  %v1699_v0 = vld [vmem:[#allocation7 + $0xde8] sm:$0xff]  ;;  %v3561_v19 = vld [vmem:[#allocation5] sm:$0xf] }
 0x10e   : > { %1910 = vmatpush.msrb.mxu2 %v1699_v0  ;;  %1865 = vmatpush.msra.mxu3 %v1702_v16  ;;  %v1205_v29 = vperm.slane %v3561_v19, 0  ;;  %v1206_v42 = vperm.slane %v3561_v19, 1  ;;  %v1647_v0 = vld [vmem:[#allocation7 + $0xc48] sm:$0xff] }
 0x10f   : > { %1874 = vmatpush.msrb.mxu0 %v1555_v2  ;;  %1894 = vmatpush.msrb.mxu1 %v1619_v25  ;;  %v1583_v2 = vld [vmem:[#allocation7 + $0xa48] sm:$0xff] }
 0x110   : > { %1911 = vmatpush.msrb.mxu2 %v1695_v3  ;;  %1930 = vmatpush.msrb.mxu3 %v1763_v21  ;;  %v1723_v1 = vld [vmem:[#allocation7 + $0xea8] sm:$0xff] }
 0x111   : > { %1875 = vmatpush.msrb.mxu0 %v1551_v8  ;;  %1895 = vmatpush.msrb.mxu1 %v1615_v28  ;;  %v1579_v8 = vld [vmem:[#allocation7 + $0xa28] sm:$0xff] }
 0x112   : > { %1912 = vmatpush.msrb.mxu2 %v1691_v12  ;;  %1931 = vmatpush.msrb.mxu3 %v1759_v4  ;;  %v1643_v3 = vld [vmem:[#allocation7 + $0xc28] sm:$0xff] }
 0x113   : > { %1876 = vmatpush.msrb.mxu0 %v1547_v18  ;;  %1896 = vmatpush.msrb.mxu1 %v1611_v22  ;;  %v1575_v18 = vld [vmem:[#allocation7 + $0xa08] sm:$0xff] }
 0x114   : > { %1913 = vmatpush.msrb.mxu2 %v1687_v20  ;;  %v1679_v22 = vld [vmem:[#allocation7 + $0xd48] sm:$0xff]  ;;  %1932 = vmatpush.msrb.mxu3 %v1755_v23  ;;  %v1552_v23 = vld [vmem:[#allocation7 + $0x950] sm:$0xff] }
 0x115   : > { %1877 = vmatpush.msrb.mxu0 %v1543_v24  ;;  %1897 = vmatpush.msrb.mxu1 %v1607_v35  ;;  %v1675_v35 = vld [vmem:[#allocation7 + $0xd28] sm:$0xff] }
 0x116   : > { %1914 = vmatpush.msrb.mxu2 %v1683_v26  ;;  %1933 = vmatpush.msrb.mxu3 %v1751_v36  ;;  %v1639_v12 = vld [vmem:[#allocation7 + $0xc08] sm:$0xff]  ;;  %v1636_v26 = vld [vmem:[#allocation7 + $0xbf0] sm:$0xff] }
 0x117   : > { %1878 = vmatpush.msrb.mxu0 %v1539_v27  ;;  %1898 = vmatpush.msrb.mxu1 %v1603_v41  ;;  %v771_v27 = vadd.f32 %v3550_v37, %v751_v17  ;;  %v1747_v41 = vld [vmem:[#allocation7 + $0xf68] sm:$0xff]  ;;  %v1564_v17 = vld [vmem:[#allocation7 + $0x9b0] sm:$0xff] }
 0x118   : > { %1915 = vmatpush.msrb.mxu2 %v1679_v22  ;;  %1934 = vmatpush.msrb.mxu3 %v1747_v41  ;;  %v1715_v16 = vld [vmem:[#allocation7 + $0xe68] sm:$0xff]  ;;  %v1624_v36 = vld [vmem:[#allocation7 + $0xb90] sm:$0xff] }
 0x119   : > { %1879 = vmatpush.msrb.mxu0 %v1535_v15  ;;  %1899 = vmatpush.msrb.mxu1 %v1599_v46  ;;  %v1743_v46 = vld [vmem:[#allocation7 + $0xf48] sm:$0xff]  ;;  %v1620_v41 = vld [vmem:[#allocation7 + $0xb70] sm:$0xff] }
 0x11a   : > { %1916 = vmatpush.msrb.mxu2 %v1675_v35  ;;  %1935 = vmatpush.msrb.mxu3 %v1743_v46  ;;  %v1711_v4 = vld [vmem:[#allocation7 + $0xe48] sm:$0xff] }
 0x11b   : > { %1880 = vmatpush.msrb.mxu0 %v1531_v34  ;;  %1900 = vmatpush.msrb.mxu1 %v1595_v50  ;;  %v1707_v30 = vld [vmem:[#allocation7 + $0xe28] sm:$0xff] }
 0x11c   : > { %v1703_v33 = vld [vmem:[#allocation7 + $0xe08] sm:$0xff] }
 0x11d   : > { %1881 = vmatpush.msrb.mxu0 %v1527_v40  ;;  %1901 = vmatpush.msrb.mxu1 %v1591_v54  ;;  %v1671_v40 = vld [vmem:[#allocation7 + $0xd08] sm:$0xff] }
 0x11e   : > { %v3554_v62 = vpop.f32.mrf.mxu0  ;;  %1917 = vmatpush.msrb.mxu2 %v1671_v40  ;;  %v1655_v54 = vld [vmem:[#allocation7 + $0xc88] sm:$0xff]  ;;  %v731_v40 = vadd.f32 %v3546_v32, %v3544_v31  ;;  %v1532_v31 = vld [vmem:[#allocation7 + $0x8b0] sm:$0xff] }
 0x11f   : > { %1882 = vmatpush.msrb.mxu0 %v1523_v44  ;;  %1902 = vmatpush.msrb.mxu1 %v1587_v61 }
 0x120   : > { %1918 = vmatpush.msrb.mxu2 %v1667_v45  ;;  %v1612_v45 = vld [vmem:[#allocation7 + $0xb30] sm:$0xff] }
 0x121   : > { %1883 = vmatpush.msrb.mxu0 %v1519_v49  ;;  %v3556_v63 = vpop.f32.mrf.mxu1  ;;  %1903 = vmatpush.msrb.mxu1 %v1583_v2  ;;  %v1739_v49 = vld [vmem:[#allocation7 + $0xf28] sm:$0xff]  ;;  %v1572_v2 = vld [vmem:[#allocation7 + $0x9f0] sm:$0xff] }
 0x122   : > { %1919 = vmatpush.msrb.mxu2 %v1663_v48  ;;  %1936 = vmatpush.msrb.mxu3 %v1739_v49 }
 0x123   : > { %1884 = vmatpush.msrb.mxu0 %v1515_v53  ;;  %1904 = vmatpush.msrb.mxu1 %v1579_v8  ;;  %v1568_v8 = vld [vmem:[#allocation7 + $0x9d0] sm:$0xff] }
 0x124   : > { %v3563_v24 = vpop.f32.mrf.mxu2  ;;  %1920 = vmatpush.msrb.mxu2 %v1659_v51  ;;  %1937 = vmatpush.msrb.mxu3 %v1735_v52  ;;  %v1528_v52 = vld [vmem:[#allocation7 + $0x890] sm:$0xff] }
 0x125   : > { %1885 = vmatpush.msrb.mxu0 %v1511_v60  ;;  %1905 = vmatpush.msrb.mxu1 %v1575_v18 }
 0x126   : > { %1921 = vmatpush.msrb.mxu2 %v1655_v54  ;;  %1938 = vmatpush.msrb.mxu3 %v1731_v55  ;;  %v1604_v54 = vld [vmem:[#allocation7 + $0xaf0] sm:$0xff] }
 0x127   : > { %v3565_v25 = vpop.f32.mrf.mxu3  ;;  %v1524_v55 = vld [vmem:[#allocation7 + $0x870] sm:$0xff] }
 0x128   : > { %1922 = vmatpush.msrb.mxu2 %v1651_v57  ;;  %1939 = vmatpush.msrb.mxu3 %v1727_v58  ;;  %v1600_v57 = vld [vmem:[#allocation7 + $0xad0] sm:$0xff] }
 0x12a   : > { %1923 = vmatpush.msrb.mxu2 %v1647_v0  ;;  %1940 = vmatpush.msrb.mxu3 %v1723_v1  ;;  %v1512_v0 = vld [vmem:[#allocation7 + $0x810] sm:$0xff] }
 0x12b   : > { %v1588_v1 = vld [vmem:[#allocation7 + $0xa70] sm:$0xff] }
 0x12c   : > { %1924 = vmatpush.msrb.mxu2 %v1643_v3  ;;  %1941 = vmatpush.msrb.mxu3 %v1719_v7 }
 0x12e   : > { %1925 = vmatpush.msrb.mxu2 %v1639_v12  ;;  %1942 = vmatpush.msrb.mxu3 %v1715_v16  ;;  %v1584_v16 = vld [vmem:[#allocation7 + $0xa50] sm:$0xff] }
 0x130   : > { %1943 = vmatpush.msrb.mxu3 %v1711_v4  ;;  %v1696_v4 = vld [vmem:[#allocation7 + $0xdd0] sm:$0xff] }
 0x132   : > { %1944 = vmatpush.msrb.mxu3 %v1707_v30 }
 0x134   : > { %1945 = vmatpush.msrb.mxu3 %v1703_v33  ;;  %v1688_v33 = vld [vmem:[#allocation7 + $0xd90] sm:$0xff] }
 0x140   : > { %v1056_v5 = vpop.f32.mrf.mxu0  ;;  %v1076_v11 = vpop.f32.mrf.mxu1 }
 0x141   : > { %v1077_v28 = vadd.f32 %v1076_v11, %v1056_v5  ;;  %v1560_v11 = vld [vmem:[#allocation7 + $0x990] sm:$0xff] }
 0x143   : > { %v1199_v15 = vadd.f32 %v1077_v28, %v771_v27  ;;  %v691_v27 = vadd.f32 %v3542_v14, %v3540_v13  ;;  %v1548_v13 = vld [vmem:[#allocation7 + $0x930] sm:$0xff] }
 0x145   : > { %v1213_v34 = vadd.f32 %v1205_v29, %v1199_v15  ;;  %v1556_v29 = vld [vmem:[#allocation7 + $0x970] sm:$0xff]  ;;  %v831_v22 = vadd.f32 %v3554_v62, %v691_v27  ;;  %v1207_v62 = vperm.slane %v3561_v19, 2 }
 0x146   : > { %v1632_v15 = vld [vmem:[#allocation7 + $0xbd0] sm:$0xff] }
 0x147   : > { %v1217_v37 = vmax.f32 %v1213_v34, 0.0  ;;  %v1096_v38 = vpop.f32.mrf.mxu2  ;;  %v1116_v39 = vpop.f32.mrf.mxu3  ;;  %v1628_v34 = vld [vmem:[#allocation7 + $0xbb0] sm:$0xff] }
 0x148   : > { %v1117_v9 = vadd.f32 %v1116_v39, %v1096_v38  ;;  %v1544_v39 = vld [vmem:[#allocation7 + $0x910] sm:$0xff] }
 0x149   : > { %v1225_v43 = vrot.slane %v1217_v37, 7  ;;  %v851_v37 = vadd.f32 %v3556_v63, %v831_v22  ;;  %v1637_v22 = vld [vmem:[#allocation7 + $0xbf8] sm:$0xff] }
 0x14a   : > { %v1200_v44 = vadd.f32 %v1117_v9, %v811_v10  ;;  %v1540_v9 = vld [vmem:[#allocation7 + $0x8f0] sm:$0xff] }
 0x14b   : > { %1233 = vst [vmem:[#allocation2] sm:$0xfe] %v1225_v43 }
 0x14c   : > { %1237 = vst [vmem:[#allocation2 + $0x20] sm:$0x1] %v1225_v43  ;;  %v1214_v47 = vadd.f32 %v1206_v42, %v1200_v44  ;;  %v871_v42 = vadd.f32 %v3563_v24, %v731_v40  ;;  %v1616_v43 = vld [vmem:[#allocation7 + $0xb50] sm:$0xff]  ;;  %v1629_v40 = vld [vmem:[#allocation7 + $0xbb8] sm:$0xff] }
 0x14d   : > { %v1536_v44 = vld [vmem:[#allocation7 + $0x8d0] sm:$0xff] }
 0x14e   : > { %v1218_v50 = vmax.f32 %v1214_v47, 0.0  ;;  %v891_v32 = vadd.f32 %v3565_v25, %v871_v42  ;;  %v1608_v24 = vld [vmem:[#allocation7 + $0xb10] sm:$0xff]  ;;  %v1625_v42 = vld [vmem:[#allocation7 + $0xb98] sm:$0xff] }
 0x14f   : > { %v1520_v25 = vld [vmem:[#allocation7 + $0x850] sm:$0xff] }
 0x150   : > { %v1226_v53 = vrot.slane %v1218_v50, 7  ;;  %v1208_v50 = vperm.slane %v3561_v19, 3  ;;  %v1596_v19 = vld [vmem:[#allocation7 + $0xab0] sm:$0xff] }
 0x152   : > { %1234 = vst [vmem:[#allocation2 + $0x8] sm:$0xfe] %v1226_v53  ;;  %v1501_v56 = vld [vmem:[#allocation2] sm:$0xfe] }
 0x153   : > { %1238 = vst [vmem:[#allocation2 + $0x28] sm:$0x1] %v1226_v53  ;;  %v1505_v59 = vld [vmem:[#allocation2 + $0x20] sm:$0x1]  ;;  %v1774_v60 = vrot.slane %v1501_v56, 1 }
 0x154   : > { %v1775_v61 = vrot.slane %v1505_v59, 1  ;;  %v1516_v59 = vld [vmem:[#allocation7 + $0x830] sm:$0xff] }
 0x156   : > { %v3574_v6 = vsel %vm564_vm0, %v1774_v60, %v1775_v61  ;;  %v1592_v61 = vld [vmem:[#allocation7 + $0xa90] sm:$0xff] }
 0x157   : > { %1806 = vmatmul.f32.vlgmr.msra.gmra.mxu0 %v3574_v6 }
 0x158   : > { %1950 = vmatpush.msra.mxu0 %v1572_v2 }
 0x159   : > { %v1502_v18 = vld [vmem:[#allocation2 + $0x8] sm:$0xfe] }
 0x15a   : > { %1951 = vmatpush.msra.mxu0 %v1568_v8  ;;  %v1506_v20 = vld [vmem:[#allocation2 + $0x28] sm:$0x1]  ;;  %v1777_v21 = vrot.slane %v1502_v18, 1  ;;  %v1573_v8 = vld [vmem:[#allocation7 + $0x9f8] sm:$0xff] }
 0x15b   : > { %v1778_v5 = vrot.slane %v1506_v20, 1  ;;  %v1569_v18 = vld [vmem:[#allocation7 + $0x9d8] sm:$0xff] }
 0x15c   : > { %1952 = vmatpush.msra.mxu0 %v1564_v17  ;;  %v1700_v17 = vld [vmem:[#allocation7 + $0xdf0] sm:$0xff] }
 0x15d   : > { %v3580_v28 = vsel %vm564_vm0, %v1777_v21, %v1778_v5  ;;  %v1580_v21 = vld [vmem:[#allocation7 + $0xa30] sm:$0xff]  ;;  %v1565_v5 = vld [vmem:[#allocation7 + $0x9b8] sm:$0xff] }
 0x15e   : > { %1826 = vmatmul.f32.vlgmr.msra.gmra.mxu1 %v3580_v28  ;;  %1953 = vmatpush.msra.mxu0 %v1560_v11  ;;  %v1576_v11 = vld [vmem:[#allocation7 + $0xa10] sm:$0xff] }
 0x15f   : > { %1970 = vmatpush.msra.mxu1 %v1636_v26  ;;  %1886 = vmatmul.f32.vlgmr.msrb.gmra.mxu0 %v3574_v6  ;;  %v1692_v26 = vld [vmem:[#allocation7 + $0xdb0] sm:$0xff] }
 0x160   : > { %1954 = vmatpush.msra.mxu0 %v1556_v29 }
 0x161   : > { %1971 = vmatpush.msra.mxu1 %v1632_v15  ;;  %v1561_v15 = vld [vmem:[#allocation7 + $0x998] sm:$0xff] }
 0x162   : > { %v1136_v14 = vpop.f32.mrf.mxu0  ;;  %v1156_v35 = vpop.f32.mrf.mxu1  ;;  %1955 = vmatpush.msra.mxu0 %v1552_v23 }
 0x163   : > { %v1157_v38 = vadd.f32 %v1156_v35, %v1136_v14  ;;  %1972 = vmatpush.msra.mxu1 %v1628_v34  ;;  %v1764_v34 = vld [vmem:[#allocation7 + $0xff0] sm:$0xff]  ;;  %v1557_v35 = vld [vmem:[#allocation7 + $0x978] sm:$0xff] }
 0x164   : > { %1956 = vmatpush.msra.mxu0 %v1548_v13  ;;  %v1684_v14 = vld [vmem:[#allocation7 + $0xd70] sm:$0xff] }
 0x165   : > { %v1201_v10 = vadd.f32 %v1157_v38, %v851_v37  ;;  %1973 = vmatpush.msra.mxu1 %v1624_v36  ;;  %v1760_v36 = vld [vmem:[#allocation7 + $0xfd0] sm:$0xff]  ;;  %v1633_v37 = vld [vmem:[#allocation7 + $0xbd8] sm:$0xff] }
 0x166   : > { %1906 = vmatmul.f32.vlgmr.msrb.gmra.mxu1 %v3580_v28  ;;  %1957 = vmatpush.msra.mxu0 %v1544_v39  ;;  %v1680_v38 = vld [vmem:[#allocation7 + $0xd50] sm:$0xff] }
 0x167   : > { %v1215_v63 = vadd.f32 %v1207_v62, %v1201_v10  ;;  %1974 = vmatpush.msra.mxu1 %v1620_v41  ;;  %v1553_v62 = vld [vmem:[#allocation7 + $0x958] sm:$0xff]  ;;  %v1756_v39 = vld [vmem:[#allocation7 + $0xfb0] sm:$0xff] }
 0x168   : > { %1958 = vmatpush.msra.mxu0 %v1540_v9  ;;  %v1676_v41 = vld [vmem:[#allocation7 + $0xd30] sm:$0xff]  ;;  %v1549_v10 = vld [vmem:[#allocation7 + $0x938] sm:$0xff] }
 0x169   : > { %v1219_v46 = vmax.f32 %v1215_v63, 0.0  ;;  %v1176_v47 = vpop.f32.mrf.mxu2  ;;  %v1196_v48 = vpop.f32.mrf.mxu3  ;;  %1975 = vmatpush.msra.mxu1 %v1616_v43  ;;  %v1752_v9 = vld [vmem:[#allocation7 + $0xf90] sm:$0xff] }
 0x16a   : > { %v1197_v49 = vadd.f32 %v1196_v48, %v1176_v47  ;;  %1959 = vmatpush.msra.mxu0 %v1536_v44  ;;  %v1672_v43 = vld [vmem:[#allocation7 + $0xd10] sm:$0xff]  ;;  %v1545_v44 = vld [vmem:[#allocation7 + $0x918] sm:$0xff] }
 0x16b   : > { %v1227_v51 = vrot.slane %v1219_v46, 7  ;;  %1976 = vmatpush.msra.mxu1 %v1612_v45  ;;  %v1748_v63 = vld [vmem:[#allocation7 + $0xf70] sm:$0xff]  ;;  %v1621_v45 = vld [vmem:[#allocation7 + $0xb78] sm:$0xff] }
 0x16c   : > { %v1202_v53 = vadd.f32 %v1197_v49, %v891_v32  ;;  %1960 = vmatpush.msra.mxu0 %v1532_v31  ;;  %v1668_v46 = vld [vmem:[#allocation7 + $0xcf0] sm:$0xff]  ;;  %v1541_v48 = vld [vmem:[#allocation7 + $0x8f8] sm:$0xff] }
 0x16d   : > { %1235 = vst [vmem:[#allocation2 + $0x10] sm:$0xfe] %v1227_v51  ;;  %1977 = vmatpush.msra.mxu1 %v1608_v24  ;;  %v1744_v47 = vld [vmem:[#allocation7 + $0xf50] sm:$0xff]  ;;  %v1617_v31 = vld [vmem:[#allocation7 + $0xb58] sm:$0xff] }
 0x16e   : > { %1239 = vst [vmem:[#allocation2 + $0x30] sm:$0x1] %v1227_v51  ;;  %v1216_v56 = vadd.f32 %v1208_v50, %v1202_v53  ;;  %1961 = vmatpush.msra.mxu0 %v1528_v52  ;;  %v1664_v32 = vld [vmem:[#allocation7 + $0xcd0] sm:$0xff]  ;;  %v1537_v50 = vld [vmem:[#allocation7 + $0x8d8] sm:$0xff] }
 0x16f   : > { %1978 = vmatpush.msra.mxu1 %v1604_v54  ;;  %v1740_v49 = vld [vmem:[#allocation7 + $0xf30] sm:$0xff]  ;;  %v1613_v24 = vld [vmem:[#allocation7 + $0xb38] sm:$0xff] }
 0x170   : > { %v1220_v58 = vmax.f32 %v1216_v56, 0.0  ;;  %1962 = vmatpush.msra.mxu0 %v1524_v55  ;;  %v1660_v51 = vld [vmem:[#allocation7 + $0xcb0] sm:$0xff]  ;;  %v1533_v53 = vld [vmem:[#allocation7 + $0x8b8] sm:$0xff] }
 0x171   : > { %1979 = vmatpush.msra.mxu1 %v1600_v57  ;;  %v1736_v52 = vld [vmem:[#allocation7 + $0xf10] sm:$0xff]  ;;  %v1609_v54 = vld [vmem:[#allocation7 + $0xb18] sm:$0xff] }
 0x172   : > { %v1228_v60 = vrot.slane %v1220_v58, 7  ;;  %1963 = vmatpush.msra.mxu0 %v1520_v25  ;;  %v1656_v55 = vld [vmem:[#allocation7 + $0xc90] sm:$0xff]  ;;  %v1529_v57 = vld [vmem:[#allocation7 + $0x898] sm:$0xff] }
 0x173   : > { %1980 = vmatpush.msra.mxu1 %v1596_v19  ;;  %v1732_v56 = vld [vmem:[#allocation7 + $0xef0] sm:$0xff]  ;;  %v1605_v25 = vld [vmem:[#allocation7 + $0xaf8] sm:$0xff] }
 0x174   : > { %1236 = vst [vmem:[#allocation2 + $0x18] sm:$0xfe] %v1228_v60  ;;  %1964 = vmatpush.msra.mxu0 %v1516_v59  ;;  %v1503_v2 = vld [vmem:[#allocation2 + $0x10] sm:$0xfe]  ;;  %v1525_v59 = vld [vmem:[#allocation7 + $0x878] sm:$0xff] }
 0x175   : > { %1240 = vst [vmem:[#allocation2 + $0x38] sm:$0x1] %v1228_v60  ;;  %1981 = vmatpush.msra.mxu1 %v1592_v61  ;;  %v1507_v3 = vld [vmem:[#allocation2 + $0x30] sm:$0x1]  ;;  %v1780_v7 = vrot.slane %v1503_v2, 1  ;;  %v1652_v58 = vld [vmem:[#allocation7 + $0xc70] sm:$0xff] }
 0x176   : > { %1965 = vmatpush.msra.mxu0 %v1512_v0  ;;  %v1781_v12 = vrot.slane %v1507_v3, 1  ;;  %v1728_v19 = vld [vmem:[#allocation7 + $0xed0] sm:$0xff]  ;;  %v1601_v60 = vld [vmem:[#allocation7 + $0xad8] sm:$0xff] }
 0x177   : > { %1982 = vmatpush.msra.mxu1 %v1588_v1  ;;  %1966 = vmatmul.f32.vlgmr.msra.gmra.mxu0 %v3574_v6  ;;  %v1648_v61 = vld [vmem:[#allocation7 + $0xc50] sm:$0xff]  ;;  %v1521_v1 = vld [vmem:[#allocation7 + $0x858] sm:$0xff] }
 0x178   : > { %v3595_v20 = vsel %vm564_vm0, %v1780_v7, %v1781_v12  ;;  %2030 = vmatpush.msrb.mxu0 %v1573_v8  ;;  %v1724_v0 = vld [vmem:[#allocation7 + $0xeb0] sm:$0xff]  ;;  %v1597_v2 = vld [vmem:[#allocation7 + $0xab8] sm:$0xff] }
 0x179   : > { %1846 = vmatmul.f32.vlgmr.msra.gmra.mxu2 %v3595_v20  ;;  %1983 = vmatpush.msra.mxu1 %v1584_v16  ;;  %v1644_v3 = vld [vmem:[#allocation7 + $0xc30] sm:$0xff]  ;;  %v1517_v8 = vld [vmem:[#allocation7 + $0x838] sm:$0xff] }
 0x17a   : > { %1990 = vmatpush.msra.mxu2 %v1700_v17  ;;  %2031 = vmatpush.msrb.mxu0 %v1569_v18  ;;  %v1720_v7 = vld [vmem:[#allocation7 + $0xe90] sm:$0xff]  ;;  %v1593_v12 = vld [vmem:[#allocation7 + $0xa98] sm:$0xff] }
 0x17b   : > { %1984 = vmatpush.msra.mxu1 %v1580_v21  ;;  %v1504_v27 = vld [vmem:[#allocation2 + $0x18] sm:$0xfe] }
 0x17c   : > { %1991 = vmatpush.msra.mxu2 %v1696_v4  ;;  %2032 = vmatpush.msrb.mxu0 %v1565_v5  ;;  %v1508_v29 = vld [vmem:[#allocation2 + $0x38] sm:$0x1]  ;;  %v1783_v30 = vrot.slane %v1504_v27, 1  ;;  %v1513_v18 = vld [vmem:[#allocation7 + $0x818] sm:$0xff]  ;;  %v1305_v5 = vld [vmem:[#allocation7 + $0x1e0] sm:$0xff] }
 0x17d   : > { %1985 = vmatpush.msra.mxu1 %v1576_v11  ;;  %v1784_v23 = vrot.slane %v1508_v29, 1  ;;  %v1640_v16 = vld [vmem:[#allocation7 + $0xc10] sm:$0xff]  ;;  %v1589_v21 = vld [vmem:[#allocation7 + $0xa78] sm:$0xff]  ;;  %v1301_v29 = vld [vmem:[#allocation7 + $0x1c0] sm:$0xff] }
 0x17e   : > { %1992 = vmatpush.msra.mxu2 %v1692_v26  ;;  %1986 = vmatmul.f32.vlgmr.msra.gmra.mxu1 %v3580_v28  ;;  %v1716_v17 = vld [vmem:[#allocation7 + $0xe70] sm:$0xff]  ;;  %v1701_v4 = vld [vmem:[#allocation7 + $0xdf8] sm:$0xff] }
 0x17f   : > { %v3600_v13 = vsel %vm564_vm0, %v1783_v30, %v1784_v23  ;;  %2033 = vmatpush.msrb.mxu0 %v1561_v15  ;;  %2050 = vmatpush.msrb.mxu1 %v1637_v22  ;;  %v1712_v11 = vld [vmem:[#allocation7 + $0xe50] sm:$0xff]  ;;  %v1585_v26 = vld [vmem:[#allocation7 + $0xa58] sm:$0xff]  ;;  %v1297_v23 = vld [vmem:[#allocation7 + $0x1a0] sm:$0xff] }
 0x180   : > { %1866 = vmatmul.f32.vlgmr.msra.gmra.mxu3 %v3600_v13  ;;  %1993 = vmatpush.msra.mxu2 %v1688_v33  ;;  %v1697_v27 = vld [vmem:[#allocation7 + $0xdd8] sm:$0xff]  ;;  %v1708_v30 = vld [vmem:[#allocation7 + $0xe30] sm:$0xff] }
 0x181   : > { %2010 = vmatpush.msra.mxu3 %v1764_v34  ;;  %1926 = vmatmul.f32.vlgmr.msrb.gmra.mxu2 %v3595_v20  ;;  %v1581_v15 = vld [vmem:[#allocation7 + $0xa38] sm:$0xff]  ;;  %v1704_v33 = vld [vmem:[#allocation7 + $0xe10] sm:$0xff] }
 0x182   : > { %1994 = vmatpush.msra.mxu2 %v1684_v14  ;;  %2034 = vmatpush.msrb.mxu0 %v1557_v35  ;;  %v1693_v22 = vld [vmem:[#allocation7 + $0xdb8] sm:$0xff]  ;;  %v1293_v35 = vld [vmem:[#allocation7 + $0x180] sm:$0xff] }
 0x183   : > { %2011 = vmatpush.msra.mxu3 %v1760_v36  ;;  %2051 = vmatpush.msrb.mxu1 %v1633_v37  ;;  %v1577_v34 = vld [vmem:[#allocation7 + $0xa18] sm:$0xff]  ;;  %v1369_v36 = vld [vmem:[#allocation7 + $0x3e0] sm:$0xff] }
 0x184   : > { %1995 = vmatpush.msra.mxu2 %v1680_v38  ;;  %2035 = vmatpush.msrb.mxu0 %v1553_v62  ;;  %v1689_v14 = vld [vmem:[#allocation7 + $0xd98] sm:$0xff]  ;;  %v1289_v62 = vld [vmem:[#allocation7 + $0x160] sm:$0xff] }
 0x185   : > { %2012 = vmatpush.msra.mxu3 %v1756_v39  ;;  %2052 = vmatpush.msrb.mxu1 %v1629_v40  ;;  %v1685_v37 = vld [vmem:[#allocation7 + $0xd78] sm:$0xff]  ;;  %v1365_v39 = vld [vmem:[#allocation7 + $0x3c0] sm:$0xff] }
 0x186   : > { %1996 = vmatpush.msra.mxu2 %v1676_v41  ;;  %2036 = vmatpush.msrb.mxu0 %v1549_v10  ;;  %v1761_v38 = vld [vmem:[#allocation7 + $0xfd8] sm:$0xff]  ;;  %v1285_v10 = vld [vmem:[#allocation7 + $0x140] sm:$0xff] }
 0x187   : > { %2013 = vmatpush.msra.mxu3 %v1752_v9  ;;  %2053 = vmatpush.msrb.mxu1 %v1625_v42  ;;  %v1681_v40 = vld [vmem:[#allocation7 + $0xd58] sm:$0xff]  ;;  %v1361_v9 = vld [vmem:[#allocation7 + $0x3a0] sm:$0xff] }
 0x188   : > { %1946 = vmatmul.f32.vlgmr.msrb.gmra.mxu3 %v3600_v13  ;;  %1997 = vmatpush.msra.mxu2 %v1672_v43  ;;  %v1757_v41 = vld [vmem:[#allocation7 + $0xfb8] sm:$0xff] }
 0x189   : > { %2014 = vmatpush.msra.mxu3 %v1748_v63  ;;  %2037 = vmatpush.msrb.mxu0 %v1545_v44  ;;  %v1677_v42 = vld [vmem:[#allocation7 + $0xd38] sm:$0xff]  ;;  %v1281_v63 = vld [vmem:[#allocation7 + $0x120] sm:$0xff] }
 0x18a   : > { %2054 = vmatpush.msrb.mxu1 %v1621_v45  ;;  %1998 = vmatpush.msra.mxu2 %v1668_v46  ;;  %v1753_v43 = vld [vmem:[#allocation7 + $0xf98] sm:$0xff]  ;;  %v1277_v46 = vld [vmem:[#allocation7 + $0x100] sm:$0xff] }
 0x18b   : > { %2015 = vmatpush.msra.mxu3 %v1744_v47  ;;  %2038 = vmatpush.msrb.mxu0 %v1541_v48  ;;  %v1673_v44 = vld [vmem:[#allocation7 + $0xd18] sm:$0xff]  ;;  %v1353_v47 = vld [vmem:[#allocation7 + $0x360] sm:$0xff] }
 0x18c   : > { %2055 = vmatpush.msrb.mxu1 %v1617_v31  ;;  %1999 = vmatpush.msra.mxu2 %v1664_v32  ;;  %v1749_v45 = vld [vmem:[#allocation7 + $0xf78] sm:$0xff]  ;;  %v1273_v32 = vld [vmem:[#allocation7 + $0xe0] sm:$0xff] }
 0x18d   : > { %2016 = vmatpush.msra.mxu3 %v1740_v49  ;;  %2039 = vmatpush.msrb.mxu0 %v1537_v50  ;;  %v1669_v48 = vld [vmem:[#allocation7 + $0xcf8] sm:$0xff]  ;;  %v1349_v49 = vld [vmem:[#allocation7 + $0x340] sm:$0xff] }
 0x18e   : > { %2056 = vmatpush.msrb.mxu1 %v1613_v24  ;;  %2000 = vmatpush.msra.mxu2 %v1660_v51  ;;  %v1745_v31 = vld [vmem:[#allocation7 + $0xf58] sm:$0xff]  ;;  %v1269_v51 = vld [vmem:[#allocation7 + $0xc0] sm:$0xff] }
 0x18f   : > { %2017 = vmatpush.msra.mxu3 %v1736_v52  ;;  %2040 = vmatpush.msrb.mxu0 %v1533_v53  ;;  %v1665_v50 = vld [vmem:[#allocation7 + $0xcd8] sm:$0xff]  ;;  %v1345_v52 = vld [vmem:[#allocation7 + $0x320] sm:$0xff] }
 0x190   : > { %2057 = vmatpush.msrb.mxu1 %v1609_v54  ;;  %2001 = vmatpush.msra.mxu2 %v1656_v55  ;;  %v1741_v24 = vld [vmem:[#allocation7 + $0xf38] sm:$0xff]  ;;  %v1265_v55 = vld [vmem:[#allocation7 + $0xa0] sm:$0xff] }
 0x191   : > { %2018 = vmatpush.msra.mxu3 %v1732_v56  ;;  %2041 = vmatpush.msrb.mxu0 %v1529_v57  ;;  %v1661_v53 = vld [vmem:[#allocation7 + $0xcb8] sm:$0xff]  ;;  %v1341_v56 = vld [vmem:[#allocation7 + $0x300] sm:$0xff] }
 0x192   : > { %2058 = vmatpush.msrb.mxu1 %v1605_v25  ;;  %2002 = vmatpush.msra.mxu2 %v1652_v58  ;;  %v1737_v54 = vld [vmem:[#allocation7 + $0xf18] sm:$0xff]  ;;  %v1261_v58 = vld [vmem:[#allocation7 + $0x80] sm:$0xff] }
 0x193   : > { %2019 = vmatpush.msra.mxu3 %v1728_v19  ;;  %2042 = vmatpush.msrb.mxu0 %v1525_v59  ;;  %v1657_v57 = vld [vmem:[#allocation7 + $0xc98] sm:$0xff]  ;;  %v1337_v19 = vld [vmem:[#allocation7 + $0x2e0] sm:$0xff] }
 0x194   : > { %2059 = vmatpush.msrb.mxu1 %v1601_v60  ;;  %2003 = vmatpush.msra.mxu2 %v1648_v61  ;;  %v1733_v25 = vld [vmem:[#allocation7 + $0xef8] sm:$0xff]  ;;  %v1257_v61 = vld [vmem:[#allocation7 + $0x60] sm:$0xff] }
 0x195   : > { %2020 = vmatpush.msra.mxu3 %v1724_v0  ;;  %2043 = vmatpush.msrb.mxu0 %v1521_v1  ;;  %v1653_v59 = vld [vmem:[#allocation7 + $0xc78] sm:$0xff]  ;;  %v1333_v0 = vld [vmem:[#allocation7 + $0x2c0] sm:$0xff] }
 0x196   : > { %2060 = vmatpush.msrb.mxu1 %v1597_v2  ;;  %2004 = vmatpush.msra.mxu2 %v1644_v3  ;;  %v1729_v60 = vld [vmem:[#allocation7 + $0xed8] sm:$0xff]  ;;  %v1253_v3 = vld [vmem:[#allocation7 + $0x40] sm:$0xff] }
 0x197   : > { %2021 = vmatpush.msra.mxu3 %v1720_v7  ;;  %2044 = vmatpush.msrb.mxu0 %v1517_v8  ;;  %v1649_v1 = vld [vmem:[#allocation7 + $0xc58] sm:$0xff]  ;;  %v1329_v7 = vld [vmem:[#allocation7 + $0x2a0] sm:$0xff] }
 0x198   : > { %2061 = vmatpush.msrb.mxu1 %v1593_v12  ;;  %2005 = vmatpush.msra.mxu2 %v1640_v16  ;;  %v1725_v2 = vld [vmem:[#allocation7 + $0xeb8] sm:$0xff]  ;;  %v1249_v16 = vld [vmem:[#allocation7 + $0x20] sm:$0xff] }
 0x199   : > { %2022 = vmatpush.msra.mxu3 %v1716_v17  ;;  %2045 = vmatpush.msrb.mxu0 %v1513_v18  ;;  %v1645_v8 = vld [vmem:[#allocation7 + $0xc38] sm:$0xff]  ;;  %v1325_v17 = vld [vmem:[#allocation7 + $0x280] sm:$0xff] }
 0x19a   : > { %2062 = vmatpush.msrb.mxu1 %v1589_v21  ;;  %2006 = vmatmul.f32.vlgmr.msra.gmra.mxu2 %v3595_v20  ;;  %v1721_v12 = vld [vmem:[#allocation7 + $0xe98] sm:$0xff] }
 0x19b   : > { %2046 = vmatmul.f32.vlgmr.msrb.gmra.mxu0 %v3574_v6  ;;  %2070 = vmatpush.msrb.mxu2 %v1701_v4  ;;  %v1765_v6 = vld [vmem:[#allocation7 + $0xff8] sm:$0xff]  ;;  %v1245_v4 = vld [vmem:[#allocation7] sm:$0xff] }
 0x19c   : > { %2110 = vmatpush.msra.mxu0 %v1305_v5  ;;  %2023 = vmatpush.msra.mxu3 %v1712_v11  ;;  %v1641_v18 = vld [vmem:[#allocation7 + $0xc18] sm:$0xff]  ;;  %v1321_v5 = vld [vmem:[#allocation7 + $0x260] sm:$0xff] }
 0x19d   : > { %2063 = vmatpush.msrb.mxu1 %v1585_v26  ;;  %2071 = vmatpush.msrb.mxu2 %v1697_v27  ;;  %v1717_v21 = vld [vmem:[#allocation7 + $0xe78] sm:$0xff]  ;;  %v1433_v11 = vld [vmem:[#allocation7 + $0x5e0] sm:$0xff]  ;;  %v1306_v26 = vld [vmem:[#allocation7 + $0x1e8] sm:$0xff] }
 0x19e   : > { %2111 = vmatpush.msra.mxu0 %v1301_v29  ;;  %2024 = vmatpush.msra.mxu3 %v1708_v30  ;;  %v1713_v27 = vld [vmem:[#allocation7 + $0xe58] sm:$0xff]  ;;  %v1317_v30 = vld [vmem:[#allocation7 + $0x240] sm:$0xff] }
 0x19f   : > { %2064 = vmatpush.msrb.mxu1 %v1581_v15  ;;  %2072 = vmatpush.msrb.mxu2 %v1693_v22  ;;  %v3610_v29 = vld [vmem:[#allocation2] sm:$0xff]  ;;  %v1302_v22 = vld [vmem:[#allocation7 + $0x1c8] sm:$0xff] }
 0x1a0   : > { %2112 = vmatpush.msra.mxu0 %v1297_v23  ;;  %2025 = vmatpush.msra.mxu3 %v1704_v33  ;;  %v1429_v15 = vld [vmem:[#allocation7 + $0x5c0] sm:$0xff]  ;;  %v1709_v23 = vld [vmem:[#allocation7 + $0xe38] sm:$0xff] }
 0x1a1   : > { %2065 = vmatpush.msrb.mxu1 %v1577_v34  ;;  %2026 = vmatmul.f32.vlgmr.msra.gmra.mxu3 %v3600_v13  ;;  %v1313_v33 = vld [vmem:[#allocation7 + $0x220] sm:$0xff] }
 0x1a2   : > { %2066 = vmatmul.f32.vlgmr.msrb.gmra.mxu1 %v3580_v28  ;;  %2073 = vmatpush.msrb.mxu2 %v1689_v14  ;;  %v1357_v28 = vld [vmem:[#allocation7 + $0x380] sm:$0xff]  ;;  %v1298_v14 = vld [vmem:[#allocation7 + $0x1a8] sm:$0xff] }
 0x1a3   : > { %2090 = vmatpush.msrb.mxu3 %v1765_v6  ;;  %2113 = vmatpush.msra.mxu0 %v1293_v35  ;;  %v1425_v34 = vld [vmem:[#allocation7 + $0x5a0] sm:$0xff]  ;;  %v1705_v6 = vld [vmem:[#allocation7 + $0xe18] sm:$0xff] }
 0x1a4   : > { %2130 = vmatpush.msra.mxu1 %v1369_v36  ;;  %2074 = vmatpush.msrb.mxu2 %v1685_v37  ;;  %v1421_v35 = vld [vmem:[#allocation7 + $0x580] sm:$0xff]  ;;  %v1294_v37 = vld [vmem:[#allocation7 + $0x188] sm:$0xff] }
 0x1a5   : > { %2091 = vmatpush.msrb.mxu3 %v1761_v38  ;;  %2114 = vmatpush.msra.mxu0 %v1289_v62  ;;  %v1497_v36 = vld [vmem:[#allocation7 + $0x7e0] sm:$0xff]  ;;  %v1370_v62 = vld [vmem:[#allocation7 + $0x3e8] sm:$0xff] }
 0x1a6   : > { %2131 = vmatpush.msra.mxu1 %v1365_v39  ;;  %2075 = vmatpush.msrb.mxu2 %v1681_v40  ;;  %v3614_v38 = vld [vmem:[#allocation2 + $0x8] sm:$0xff] }
 0x1a7   : > { %2092 = vmatpush.msrb.mxu3 %v1757_v41  ;;  %2115 = vmatpush.msra.mxu0 %v1285_v10  ;;  %v1417_v39 = vld [vmem:[#allocation7 + $0x560] sm:$0xff]  ;;  %v1290_v41 = vld [vmem:[#allocation7 + $0x168] sm:$0xff] }
 0x1a8   : > { %2132 = vmatpush.msra.mxu1 %v1361_v9  ;;  %2076 = vmatpush.msrb.mxu2 %v1677_v42  ;;  %v1493_v40 = vld [vmem:[#allocation7 + $0x7c0] sm:$0xff]  ;;  %v1366_v10 = vld [vmem:[#allocation7 + $0x3c8] sm:$0xff] }
 0x1a9   : > { %2093 = vmatpush.msrb.mxu3 %v1753_v43  ;;  %2116 = vmatpush.msra.mxu0 %v1281_v63  ;;  %v1413_v9 = vld [vmem:[#allocation7 + $0x540] sm:$0xff]  ;;  %v1286_v43 = vld [vmem:[#allocation7 + $0x148] sm:$0xff] }
 0x1aa   : > { %2133 = vmatpush.msra.mxu1 %v1357_v28  ;;  %2077 = vmatpush.msrb.mxu2 %v1673_v44  ;;  %v1489_v42 = vld [vmem:[#allocation7 + $0x7a0] sm:$0xff]  ;;  %v1282_v44 = vld [vmem:[#allocation7 + $0x128] sm:$0xff] }
 0x1ab   : > { %2094 = vmatpush.msrb.mxu3 %v1749_v45  ;;  %2117 = vmatpush.msra.mxu0 %v1277_v46  ;;  %v1409_v63 = vld [vmem:[#allocation7 + $0x520] sm:$0xff]  ;;  %v1358_v45 = vld [vmem:[#allocation7 + $0x388] sm:$0xff] }
 0x1ac   : > { %2134 = vmatpush.msra.mxu1 %v1353_v47  ;;  %2078 = vmatpush.msrb.mxu2 %v1669_v48  ;;  %v1485_v28 = vld [vmem:[#allocation7 + $0x780] sm:$0xff]  ;;  %v1278_v48 = vld [vmem:[#allocation7 + $0x108] sm:$0xff] }
 0x1ad   : > { %2095 = vmatpush.msrb.mxu3 %v1745_v31  ;;  %2118 = vmatpush.msra.mxu0 %v1273_v32  ;;  %v1405_v46 = vld [vmem:[#allocation7 + $0x500] sm:$0xff]  ;;  %v1354_v31 = vld [vmem:[#allocation7 + $0x368] sm:$0xff] }
 0x1ae   : > { %2135 = vmatpush.msra.mxu1 %v1349_v49  ;;  %2079 = vmatpush.msrb.mxu2 %v1665_v50  ;;  %v1481_v47 = vld [vmem:[#allocation7 + $0x760] sm:$0xff]  ;;  %v1274_v50 = vld [vmem:[#allocation7 + $0xe8] sm:$0xff] }
 0x1af   : > { %2096 = vmatpush.msrb.mxu3 %v1741_v24  ;;  %2119 = vmatpush.msra.mxu0 %v1269_v51  ;;  %v1401_v32 = vld [vmem:[#allocation7 + $0x4e0] sm:$0xff]  ;;  %v1350_v24 = vld [vmem:[#allocation7 + $0x348] sm:$0xff] }
 0x1b0   : > { %2136 = vmatpush.msra.mxu1 %v1345_v52  ;;  %2080 = vmatpush.msrb.mxu2 %v1661_v53  ;;  %v1477_v49 = vld [vmem:[#allocation7 + $0x740] sm:$0xff]  ;;  %v1270_v53 = vld [vmem:[#allocation7 + $0xc8] sm:$0xff] }
 0x1b1   : > { %2097 = vmatpush.msrb.mxu3 %v1737_v54  ;;  %2120 = vmatpush.msra.mxu0 %v1265_v55  ;;  %v1397_v51 = vld [vmem:[#allocation7 + $0x4c0] sm:$0xff]  ;;  %v1346_v54 = vld [vmem:[#allocation7 + $0x328] sm:$0xff] }
 0x1b2   : > { %2137 = vmatpush.msra.mxu1 %v1341_v56  ;;  %2081 = vmatpush.msrb.mxu2 %v1657_v57  ;;  %v1473_v52 = vld [vmem:[#allocation7 + $0x720] sm:$0xff]  ;;  %v1266_v57 = vld [vmem:[#allocation7 + $0xa8] sm:$0xff] }
 0x1b3   : > { %2098 = vmatpush.msrb.mxu3 %v1733_v25  ;;  %2121 = vmatpush.msra.mxu0 %v1261_v58  ;;  %v1393_v55 = vld [vmem:[#allocation7 + $0x4a0] sm:$0xff]  ;;  %v1342_v25 = vld [vmem:[#allocation7 + $0x308] sm:$0xff] }
 0x1b4   : > { %2138 = vmatpush.msra.mxu1 %v1337_v19  ;;  %2082 = vmatpush.msrb.mxu2 %v1653_v59  ;;  %v1469_v56 = vld [vmem:[#allocation7 + $0x700] sm:$0xff]  ;;  %v1262_v59 = vld [vmem:[#allocation7 + $0x88] sm:$0xff] }
 0x1b5   : > { %2099 = vmatpush.msrb.mxu3 %v1729_v60  ;;  %2122 = vmatpush.msra.mxu0 %v1257_v61  ;;  %v1389_v58 = vld [vmem:[#allocation7 + $0x480] sm:$0xff]  ;;  %v1338_v60 = vld [vmem:[#allocation7 + $0x2e8] sm:$0xff] }
 0x1b6   : > { %2139 = vmatpush.msra.mxu1 %v1333_v0  ;;  %2083 = vmatpush.msrb.mxu2 %v1649_v1  ;;  %v1465_v19 = vld [vmem:[#allocation7 + $0x6e0] sm:$0xff]  ;;  %v1258_v1 = vld [vmem:[#allocation7 + $0x68] sm:$0xff] }
 0x1b7   : > { %2100 = vmatpush.msrb.mxu3 %v1725_v2  ;;  %2123 = vmatpush.msra.mxu0 %v1253_v3  ;;  %v1385_v61 = vld [vmem:[#allocation7 + $0x460] sm:$0xff]  ;;  %v1334_v2 = vld [vmem:[#allocation7 + $0x2c8] sm:$0xff] }
 0x1b8   : > { %2140 = vmatpush.msra.mxu1 %v1329_v7  ;;  %2084 = vmatpush.msrb.mxu2 %v1645_v8  ;;  %v1461_v0 = vld [vmem:[#allocation7 + $0x6c0] sm:$0xff]  ;;  %v1254_v8 = vld [vmem:[#allocation7 + $0x48] sm:$0xff] }
 0x1b9   : > { %2101 = vmatpush.msrb.mxu3 %v1721_v12  ;;  %2124 = vmatpush.msra.mxu0 %v1249_v16  ;;  %v1381_v3 = vld [vmem:[#allocation7 + $0x440] sm:$0xff]  ;;  %v1330_v12 = vld [vmem:[#allocation7 + $0x2a8] sm:$0xff] }
 0x1ba   : > { %2141 = vmatpush.msra.mxu1 %v1325_v17  ;;  %2085 = vmatpush.msrb.mxu2 %v1641_v18  ;;  %v1457_v7 = vld [vmem:[#allocation7 + $0x6a0] sm:$0xff]  ;;  %v1250_v18 = vld [vmem:[#allocation7 + $0x28] sm:$0xff] }
 0x1bb   : > { %2102 = vmatpush.msrb.mxu3 %v1717_v21  ;;  %2125 = vmatpush.msra.mxu0 %v1245_v4  ;;  %v1377_v16 = vld [vmem:[#allocation7 + $0x420] sm:$0xff]  ;;  %v1326_v21 = vld [vmem:[#allocation7 + $0x288] sm:$0xff] }
 0x1bc   : > { %2142 = vmatpush.msra.mxu1 %v1321_v5  ;;  %2086 = vmatmul.f32.vlgmr.msrb.gmra.mxu2 %v3595_v20  ;;  %v1309_v20 = vld [vmem:[#allocation7 + $0x200] sm:$0xff] }
 0x1bd   : > { %2126 = vmatmul.f32.vlgmr.msra.gmra.mxu0 %v3610_v29  ;;  %2150 = vmatpush.msra.mxu2 %v1433_v11  ;;  %v1453_v17 = vld [vmem:[#allocation7 + $0x680] sm:$0xff] }
 0x1be   : > { %2190 = vmatpush.msrb.mxu0 %v1306_v26  ;;  %2103 = vmatpush.msrb.mxu3 %v1713_v27  ;;  %v1373_v4 = vld [vmem:[#allocation7 + $0x400] sm:$0xff]  ;;  %v1246_v26 = vld [vmem:[#allocation7 + $0x8] sm:$0xff] }
 0x1bf   : > { %2143 = vmatpush.msra.mxu1 %v1317_v30  ;;  %2151 = vmatpush.msra.mxu2 %v1429_v15  ;;  %v1449_v11 = vld [vmem:[#allocation7 + $0x660] sm:$0xff]  ;;  %v1322_v27 = vld [vmem:[#allocation7 + $0x268] sm:$0xff] }
 0x1c0   : > { %2191 = vmatpush.msrb.mxu0 %v1302_v22  ;;  %2104 = vmatpush.msrb.mxu3 %v1709_v23  ;;  %v1434_v15 = vld [vmem:[#allocation7 + $0x5e8] sm:$0xff]  ;;  %v1307_v23 = vld [vmem:[#allocation7 + $0x1f0] sm:$0xff] }
 0x1c1   : > { %2144 = vmatpush.msra.mxu1 %v1313_v33  ;;  %2152 = vmatpush.msra.mxu2 %v1425_v34  ;;  %v3621_v22 = vld [vmem:[#allocation2 + $0x10] sm:$0xff]  ;;  %v1445_v33 = vld [vmem:[#allocation7 + $0x640] sm:$0xff] }
 0x1c2   : > { %2192 = vmatpush.msrb.mxu0 %v1298_v14  ;;  %2105 = vmatpush.msrb.mxu3 %v1705_v6  ;;  %v1318_v34 = vld [vmem:[#allocation7 + $0x248] sm:$0xff]  ;;  %v1303_v6 = vld [vmem:[#allocation7 + $0x1d0] sm:$0xff] }
 0x1c3   : > { %2145 = vmatpush.msra.mxu1 %v1309_v20  ;;  %2106 = vmatmul.f32.vlgmr.msrb.gmra.mxu3 %v3600_v13  ;;  %v1362_v13 = vld [vmem:[#allocation7 + $0x3a8] sm:$0xff]  ;;  %v1441_v20 = vld [vmem:[#allocation7 + $0x620] sm:$0xff] }
 0x1c4   : > { %2146 = vmatmul.f32.vlgmr.msra.gmra.mxu1 %v3614_v38  ;;  %2153 = vmatpush.msra.mxu2 %v1421_v35  ;;  %v1430_v14 = vld [vmem:[#allocation7 + $0x5c8] sm:$0xff] }
 0x1c5   : > { %2170 = vmatpush.msra.mxu3 %v1497_v36  ;;  %2193 = vmatpush.msrb.mxu0 %v1294_v37  ;;  %v1314_v35 = vld [vmem:[#allocation7 + $0x228] sm:$0xff]  ;;  %v1299_v37 = vld [vmem:[#allocation7 + $0x1b0] sm:$0xff] }
 0x1c6   : > { %2210 = vmatpush.msrb.mxu1 %v1370_v62  ;;  %2154 = vmatpush.msra.mxu2 %v1417_v39  ;;  %v1426_v36 = vld [vmem:[#allocation7 + $0x5a8] sm:$0xff]  ;;  %v1437_v62 = vld [vmem:[#allocation7 + $0x600] sm:$0xff] }
 0x1c7   : > { %2171 = vmatpush.msra.mxu3 %v1493_v40  ;;  %2194 = vmatpush.msrb.mxu0 %v1290_v41  ;;  %v1310_v39 = vld [vmem:[#allocation7 + $0x208] sm:$0xff] }
 0x1c8   : > { %2211 = vmatpush.msrb.mxu1 %v1366_v10  ;;  %2155 = vmatpush.msra.mxu2 %v1413_v9  ;;  %v1422_v40 = vld [vmem:[#allocation7 + $0x588] sm:$0xff]  ;;  %v3625_v9 = vld [vmem:[#allocation2 + $0x18] sm:$0xff] }
 0x1c9   : > { %2172 = vmatpush.msra.mxu3 %v1489_v42  ;;  %2195 = vmatpush.msrb.mxu0 %v1286_v43  ;;  %v1498_v42 = vld [vmem:[#allocation7 + $0x7e8] sm:$0xff]  ;;  %v1295_v43 = vld [vmem:[#allocation7 + $0x190] sm:$0xff] }
 0x1ca   : > { %2212 = vmatpush.msrb.mxu1 %v1362_v13  ;;  %2156 = vmatpush.msra.mxu2 %v1409_v63  ;;  %v1371_v63 = vld [vmem:[#allocation7 + $0x3f0] sm:$0xff] }
 0x1cb   : > { %2173 = vmatpush.msra.mxu3 %v1485_v28  ;;  %2196 = vmatpush.msrb.mxu0 %v1282_v44  ;;  %v1418_v28 = vld [vmem:[#allocation7 + $0x568] sm:$0xff] }
 0x1cc   : > { %2213 = vmatpush.msrb.mxu1 %v1358_v45  ;;  %2157 = vmatpush.msra.mxu2 %v1405_v46  ;;  %v1494_v44 = vld [vmem:[#allocation7 + $0x7c8] sm:$0xff]  ;;  %v1291_v45 = vld [vmem:[#allocation7 + $0x170] sm:$0xff] }
 0x1cd   : > { %2174 = vmatpush.msra.mxu3 %v1481_v47  ;;  %2197 = vmatpush.msrb.mxu0 %v1278_v48  ;;  %v1367_v46 = vld [vmem:[#allocation7 + $0x3d0] sm:$0xff]  ;;  %v1414_v47 = vld [vmem:[#allocation7 + $0x548] sm:$0xff] }
 0x1ce   : > { %2214 = vmatpush.msrb.mxu1 %v1354_v31  ;;  %2158 = vmatpush.msra.mxu2 %v1401_v32  ;;  %v1490_v48 = vld [vmem:[#allocation7 + $0x7a8] sm:$0xff]  ;;  %v1287_v31 = vld [vmem:[#allocation7 + $0x150] sm:$0xff] }
 0x1cf   : > { %2175 = vmatpush.msra.mxu3 %v1477_v49  ;;  %2198 = vmatpush.msrb.mxu0 %v1274_v50  ;;  %v1363_v32 = vld [vmem:[#allocation7 + $0x3b0] sm:$0xff]  ;;  %v1410_v49 = vld [vmem:[#allocation7 + $0x528] sm:$0xff] }
 0x1d0   : > { %2215 = vmatpush.msrb.mxu1 %v1350_v24  ;;  %2159 = vmatpush.msra.mxu2 %v1397_v51  ;;  %v1486_v50 = vld [vmem:[#allocation7 + $0x788] sm:$0xff]  ;;  %v1283_v24 = vld [vmem:[#allocation7 + $0x130] sm:$0xff] }
 0x1d1   : > { %2176 = vmatpush.msra.mxu3 %v1473_v52  ;;  %2199 = vmatpush.msrb.mxu0 %v1270_v53  ;;  %v1359_v51 = vld [vmem:[#allocation7 + $0x390] sm:$0xff]  ;;  %v1406_v52 = vld [vmem:[#allocation7 + $0x508] sm:$0xff] }
 0x1d2   : > { %2216 = vmatpush.msrb.mxu1 %v1346_v54  ;;  %2160 = vmatpush.msra.mxu2 %v1393_v55  ;;  %v1482_v53 = vld [vmem:[#allocation7 + $0x768] sm:$0xff]  ;;  %v1279_v54 = vld [vmem:[#allocation7 + $0x110] sm:$0xff] }
 0x1d3   : > { %2177 = vmatpush.msra.mxu3 %v1469_v56  ;;  %2200 = vmatpush.msrb.mxu0 %v1266_v57  ;;  %v1355_v55 = vld [vmem:[#allocation7 + $0x370] sm:$0xff]  ;;  %v1402_v56 = vld [vmem:[#allocation7 + $0x4e8] sm:$0xff] }
 0x1d4   : > { %2217 = vmatpush.msrb.mxu1 %v1342_v25  ;;  %2161 = vmatpush.msra.mxu2 %v1389_v58  ;;  %v3617_v5 = vpop.f32.mrf.mxu0  ;;  %v1478_v57 = vld [vmem:[#allocation7 + $0x748] sm:$0xff]  ;;  %v1275_v25 = vld [vmem:[#allocation7 + $0xf0] sm:$0xff] }
 0x1d5   : > { %2178 = vmatpush.msra.mxu3 %v1465_v19  ;;  %2201 = vmatpush.msrb.mxu0 %v1262_v59  ;;  %v1351_v58 = vld [vmem:[#allocation7 + $0x350] sm:$0xff]  ;;  %v1398_v19 = vld [vmem:[#allocation7 + $0x4c8] sm:$0xff] }
 0x1d6   : > { %2218 = vmatpush.msrb.mxu1 %v1338_v60  ;;  %2162 = vmatpush.msra.mxu2 %v1385_v61  ;;  %v1474_v59 = vld [vmem:[#allocation7 + $0x728] sm:$0xff]  ;;  %v1271_v60 = vld [vmem:[#allocation7 + $0xd0] sm:$0xff] }
 0x1d7   : > { %2179 = vmatpush.msra.mxu3 %v1461_v0  ;;  %2202 = vmatpush.msrb.mxu0 %v1258_v1  ;;  %v1347_v61 = vld [vmem:[#allocation7 + $0x330] sm:$0xff]  ;;  %v1394_v0 = vld [vmem:[#allocation7 + $0x4a8] sm:$0xff] }
 0x1d8   : > { %2219 = vmatpush.msrb.mxu1 %v1334_v2  ;;  %2163 = vmatpush.msra.mxu2 %v1381_v3  ;;  %v1470_v1 = vld [vmem:[#allocation7 + $0x708] sm:$0xff]  ;;  %v1267_v2 = vld [vmem:[#allocation7 + $0xb0] sm:$0xff] }
 0x1d9   : > { %2180 = vmatpush.msra.mxu3 %v1457_v7  ;;  %2203 = vmatpush.msrb.mxu0 %v1254_v8  ;;  %v1343_v3 = vld [vmem:[#allocation7 + $0x310] sm:$0xff]  ;;  %v1390_v7 = vld [vmem:[#allocation7 + $0x488] sm:$0xff] }
 0x1da   : > { %2220 = vmatpush.msrb.mxu1 %v1330_v12  ;;  %2164 = vmatpush.msra.mxu2 %v1377_v16  ;;  %v1466_v8 = vld [vmem:[#allocation7 + $0x6e8] sm:$0xff]  ;;  %v1263_v12 = vld [vmem:[#allocation7 + $0x90] sm:$0xff] }
 0x1db   : > { %2181 = vmatpush.msra.mxu3 %v1453_v17  ;;  %2204 = vmatpush.msrb.mxu0 %v1250_v18  ;;  %v3619_v30 = vpop.f32.mrf.mxu1  ;;  %v1339_v16 = vld [vmem:[#allocation7 + $0x2f0] sm:$0xff]  ;;  %v1386_v17 = vld [vmem:[#allocation7 + $0x468] sm:$0xff] }
 0x1dc   : > { %2221 = vmatpush.msrb.mxu1 %v1326_v21  ;;  %2165 = vmatpush.msra.mxu2 %v1373_v4  ;;  %v1887_v41 = vpop.f32.mrf.mxu0  ;;  %v1462_v18 = vld [vmem:[#allocation7 + $0x6c8] sm:$0xff]  ;;  %v1259_v21 = vld [vmem:[#allocation7 + $0x70] sm:$0xff] }
 0x1dd   : > { %2182 = vmatpush.msra.mxu3 %v1449_v11  ;;  %2205 = vmatpush.msrb.mxu0 %v1246_v26  ;;  %v1335_v4 = vld [vmem:[#allocation7 + $0x2d0] sm:$0xff]  ;;  %v1382_v11 = vld [vmem:[#allocation7 + $0x448] sm:$0xff] }
 0x1de   : > { %2222 = vmatpush.msrb.mxu1 %v1322_v27  ;;  %2166 = vmatmul.f32.vlgmr.msra.gmra.mxu2 %v3621_v22  ;;  %v1458_v26 = vld [vmem:[#allocation7 + $0x6a8] sm:$0xff]  ;;  %v1255_v27 = vld [vmem:[#allocation7 + $0x50] sm:$0xff] }
 0x1df   : > { %2206 = vmatmul.f32.vlgmr.msrb.gmra.mxu0 %v3610_v29  ;;  %2230 = vmatpush.msrb.mxu2 %v1434_v15  ;;  %v1331_v15 = vld [vmem:[#allocation7 + $0x2b0] sm:$0xff] }
 0x1e0   : > { %2270 = vmatpush.msra.mxu0 %v1307_v23  ;;  %2183 = vmatpush.msra.mxu3 %v1445_v33  ;;  %v1378_v23 = vld [vmem:[#allocation7 + $0x428] sm:$0xff] }
 0x1e1   : > { %2223 = vmatpush.msrb.mxu1 %v1318_v34  ;;  %2231 = vmatpush.msrb.mxu2 %v1430_v14  ;;  %v1454_v33 = vld [vmem:[#allocation7 + $0x688] sm:$0xff]  ;;  %v1251_v34 = vld [vmem:[#allocation7 + $0x30] sm:$0xff] }
 0x1e2   : > { %2271 = vmatpush.msra.mxu0 %v1303_v6  ;;  %2184 = vmatpush.msra.mxu3 %v1441_v20  ;;  %v1327_v14 = vld [vmem:[#allocation7 + $0x290] sm:$0xff]  ;;  %v1374_v6 = vld [vmem:[#allocation7 + $0x408] sm:$0xff] }
 0x1e3   : > { %2224 = vmatpush.msrb.mxu1 %v1314_v35  ;;  %2232 = vmatpush.msrb.mxu2 %v1426_v36  ;;  %v1907_v10 = vpop.f32.mrf.mxu1  ;;  %v1450_v36 = vld [vmem:[#allocation7 + $0x668] sm:$0xff] }
 0x1e4   : > { %2272 = vmatpush.msra.mxu0 %v1299_v37  ;;  %2185 = vmatpush.msra.mxu3 %v1437_v62  ;;  %v3627_v13 = vadd.f32 %v1907_v10, %v1887_v41  ;;  %v1247_v37 = vld [vmem:[#allocation7 + $0x10] sm:$0xff]  ;;  %v1308_v10 = vld [vmem:[#allocation7 + $0x1f8] sm:$0xff] }
 0x1e5   : > { %2225 = vmatpush.msrb.mxu1 %v1310_v39  ;;  %2186 = vmatmul.f32.vlgmr.msra.gmra.mxu3 %v3625_v9  ;;  %v1435_v41 = vld [vmem:[#allocation7 + $0x5f0] sm:$0xff] }
 0x1e6   : > { %2226 = vmatmul.f32.vlgmr.msrb.gmra.mxu1 %v3614_v38  ;;  %2233 = vmatpush.msrb.mxu2 %v1422_v40  ;;  %v1323_v40 = vld [vmem:[#allocation7 + $0x270] sm:$0xff] }
 0x1e7   : > { %2250 = vmatpush.msrb.mxu3 %v1498_v42  ;;  %2273 = vmatpush.msra.mxu0 %v1295_v43  ;;  %v1446_v42 = vld [vmem:[#allocation7 + $0x648] sm:$0xff]  ;;  %v1319_v43 = vld [vmem:[#allocation7 + $0x250] sm:$0xff] }
 0x1e8   : > { %2290 = vmatpush.msra.mxu1 %v1371_v63  ;;  %2234 = vmatpush.msrb.mxu2 %v1418_v28  ;;  %v1431_v63 = vld [vmem:[#allocation7 + $0x5d0] sm:$0xff]  ;;  %v1304_v28 = vld [vmem:[#allocation7 + $0x1d8] sm:$0xff] }
 0x1e9   : > { %2251 = vmatpush.msrb.mxu3 %v1494_v44  ;;  %2274 = vmatpush.msra.mxu0 %v1291_v45  ;;  %v1442_v44 = vld [vmem:[#allocation7 + $0x628] sm:$0xff]  ;;  %v1315_v45 = vld [vmem:[#allocation7 + $0x230] sm:$0xff] }
 0x1ea   : > { %2291 = vmatpush.msra.mxu1 %v1367_v46  ;;  %2235 = vmatpush.msrb.mxu2 %v1414_v47  ;;  %v1427_v46 = vld [vmem:[#allocation7 + $0x5b0] sm:$0xff]  ;;  %v1300_v47 = vld [vmem:[#allocation7 + $0x1b8] sm:$0xff] }
 0x1eb   : > { %2252 = vmatpush.msrb.mxu3 %v1490_v48  ;;  %2275 = vmatpush.msra.mxu0 %v1287_v31  ;;  %v1438_v48 = vld [vmem:[#allocation7 + $0x608] sm:$0xff] }
 0x1ec   : > { %2292 = vmatpush.msra.mxu1 %v1363_v32  ;;  %2236 = vmatpush.msrb.mxu2 %v1410_v49  ;;  %v1311_v32 = vld [vmem:[#allocation7 + $0x210] sm:$0xff] }
 0x1ed   : > { %2253 = vmatpush.msrb.mxu3 %v1486_v50  ;;  %2276 = vmatpush.msra.mxu0 %v1283_v24  ;;  %v1423_v50 = vld [vmem:[#allocation7 + $0x590] sm:$0xff] }
 0x1ee   : > { %2293 = vmatpush.msra.mxu1 %v1359_v51  ;;  %2237 = vmatpush.msrb.mxu2 %v1406_v52  ;;  %v1499_v51 = vld [vmem:[#allocation7 + $0x7f0] sm:$0xff]  ;;  %v1296_v52 = vld [vmem:[#allocation7 + $0x198] sm:$0xff] }
 0x1ef   : > { %2254 = vmatpush.msrb.mxu3 %v1482_v53  ;;  %2277 = vmatpush.msra.mxu0 %v1279_v54  ;;  %v1372_v53 = vld [vmem:[#allocation7 + $0x3f8] sm:$0xff]  ;;  %v1419_v54 = vld [vmem:[#allocation7 + $0x570] sm:$0xff] }
 0x1f0   : > { %2294 = vmatpush.msra.mxu1 %v1355_v55  ;;  %2238 = vmatpush.msrb.mxu2 %v1402_v56  ;;  %v1495_v55 = vld [vmem:[#allocation7 + $0x7d0] sm:$0xff]  ;;  %v1292_v56 = vld [vmem:[#allocation7 + $0x178] sm:$0xff] }
 0x1f1   : > { %2255 = vmatpush.msrb.mxu3 %v1478_v57  ;;  %2278 = vmatpush.msra.mxu0 %v1275_v25  ;;  %v1368_v57 = vld [vmem:[#allocation7 + $0x3d8] sm:$0xff]  ;;  %v1415_v25 = vld [vmem:[#allocation7 + $0x550] sm:$0xff] }
 0x1f2   : > { %2295 = vmatpush.msra.mxu1 %v1351_v58  ;;  %2239 = vmatpush.msrb.mxu2 %v1398_v19  ;;  %v1288_v58 = vld [vmem:[#allocation7 + $0x158] sm:$0xff] }
 0x1f3   : > { %2256 = vmatpush.msrb.mxu3 %v1474_v59  ;;  %2279 = vmatpush.msra.mxu0 %v1271_v60  ;;  %v1364_v19 = vld [vmem:[#allocation7 + $0x3b8] sm:$0xff]  ;;  %v1411_v59 = vld [vmem:[#allocation7 + $0x530] sm:$0xff] }
 0x1f4   : > { %2296 = vmatpush.msra.mxu1 %v1347_v61  ;;  %2240 = vmatpush.msrb.mxu2 %v1394_v0  ;;  %v1967_v20 = vpop.f32.mrf.mxu0  ;;  %v1487_v61 = vld [vmem:[#allocation7 + $0x790] sm:$0xff]  ;;  %v1284_v0 = vld [vmem:[#allocation7 + $0x138] sm:$0xff] }
 0x1f5   : > { %2257 = vmatpush.msrb.mxu3 %v1470_v1  ;;  %2280 = vmatpush.msra.mxu0 %v1267_v2  ;;  %v1360_v2 = vld [vmem:[#allocation7 + $0x398] sm:$0xff] }
 0x1f6   : > { %2297 = vmatpush.msra.mxu1 %v1343_v3  ;;  %2241 = vmatpush.msrb.mxu2 %v1390_v7  ;;  %v1407_v3 = vld [vmem:[#allocation7 + $0x510] sm:$0xff] }
 0x1f7   : > { %2258 = vmatpush.msrb.mxu3 %v1466_v8  ;;  %2281 = vmatpush.msra.mxu0 %v1263_v12  ;;  %v1483_v7 = vld [vmem:[#allocation7 + $0x770] sm:$0xff]  ;;  %v1280_v8 = vld [vmem:[#allocation7 + $0x118] sm:$0xff] }
 0x1f8   : > { %2298 = vmatpush.msra.mxu1 %v1339_v16  ;;  %2242 = vmatpush.msrb.mxu2 %v1386_v17  ;;  %v1356_v12 = vld [vmem:[#allocation7 + $0x378] sm:$0xff]  ;;  %v1403_v16 = vld [vmem:[#allocation7 + $0x4f0] sm:$0xff] }
 0x1f9   : > { %2259 = vmatpush.msrb.mxu3 %v1462_v18  ;;  %2282 = vmatpush.msra.mxu0 %v1259_v21  ;;  %v1479_v17 = vld [vmem:[#allocation7 + $0x750] sm:$0xff]  ;;  %v1276_v18 = vld [vmem:[#allocation7 + $0xf8] sm:$0xff] }
 0x1fa   : > { %2299 = vmatpush.msra.mxu1 %v1335_v4  ;;  %2243 = vmatpush.msrb.mxu2 %v1382_v11  ;;  %v1352_v21 = vld [vmem:[#allocation7 + $0x358] sm:$0xff]  ;;  %v1399_v4 = vld [vmem:[#allocation7 + $0x4d0] sm:$0xff] }
 0x1fb   : > { %2260 = vmatpush.msrb.mxu3 %v1458_v26  ;;  %2283 = vmatpush.msra.mxu0 %v1255_v27  ;;  %v1987_v35 = vpop.f32.mrf.mxu1  ;;  %v1475_v11 = vld [vmem:[#allocation7 + $0x730] sm:$0xff]  ;;  %v1272_v26 = vld [vmem:[#allocation7 + $0xd8] sm:$0xff] }
 0x1fc   : > { %2300 = vmatpush.msra.mxu1 %v1331_v15  ;;  %2244 = vmatpush.msrb.mxu2 %v1378_v23  ;;  %v3631_v62 = vpop.f32.mrf.mxu2  ;;  %v3633_v39 = vadd.f32 %v1987_v35, %v1967_v20  ;;  %v1348_v27 = vld [vmem:[#allocation7 + $0x338] sm:$0xff]  ;;  %v1395_v15 = vld [vmem:[#allocation7 + $0x4b0] sm:$0xff] }
 0x1fd   : > { %2261 = vmatpush.msrb.mxu3 %v1454_v33  ;;  %2284 = vmatpush.msra.mxu0 %v1251_v34  ;;  %v1471_v23 = vld [vmem:[#allocation7 + $0x710] sm:$0xff]  ;;  %v1268_v33 = vld [vmem:[#allocation7 + $0xb8] sm:$0xff] }
 0x1fe   : > { %2301 = vmatpush.msra.mxu1 %v1327_v14  ;;  %2245 = vmatpush.msrb.mxu2 %v1374_v6  ;;  %v1344_v34 = vld [vmem:[#allocation7 + $0x318] sm:$0xff]  ;;  %v1391_v14 = vld [vmem:[#allocation7 + $0x490] sm:$0xff] }
 0x1ff   : > { %2262 = vmatpush.msrb.mxu3 %v1450_v36  ;;  %2285 = vmatpush.msra.mxu0 %v1247_v37  ;;  %v1467_v6 = vld [vmem:[#allocation7 + $0x6f0] sm:$0xff]  ;;  %v1264_v20 = vld [vmem:[#allocation7 + $0x98] sm:$0xff] }
 0x200   : > { %2302 = vmatpush.msra.mxu1 %v1323_v40  ;;  %2246 = vmatmul.f32.vlgmr.msrb.gmra.mxu2 %v3621_v22  ;;  %v1340_v35 = vld [vmem:[#allocation7 + $0x2f8] sm:$0xff]  ;;  %v1387_v36 = vld [vmem:[#allocation7 + $0x470] sm:$0xff] }
 0x201   : > { %2286 = vmatmul.f32.vlgmr.msra.gmra.mxu0 %v3610_v29  ;;  %2310 = vmatpush.msra.mxu2 %v1435_v41  ;;  %v1463_v37 = vld [vmem:[#allocation7 + $0x6d0] sm:$0xff]  ;;  %v1260_v40 = vld [vmem:[#allocation7 + $0x78] sm:$0xff] }
 0x202   : > { %2350 = vmatpush.msrb.mxu0 %v1308_v10  ;;  %2263 = vmatpush.msrb.mxu3 %v1446_v42  ;;  %v1336_v41 = vld [vmem:[#allocation7 + $0x2d8] sm:$0xff]  ;;  %v1383_v10 = vld [vmem:[#allocation7 + $0x450] sm:$0xff] }
 0x203   : > { %2303 = vmatpush.msra.mxu1 %v1319_v43  ;;  %2311 = vmatpush.msra.mxu2 %v1431_v63  ;;  %v3637_v31 = vpop.f32.mrf.mxu3  ;;  %v1459_v42 = vld [vmem:[#allocation7 + $0x6b0] sm:$0xff]  ;;  %v1256_v43 = vld [vmem:[#allocation7 + $0x58] sm:$0xff] }
 0x204   : > { %2351 = vmatpush.msrb.mxu0 %v1304_v28  ;;  %2264 = vmatpush.msrb.mxu3 %v1442_v44  ;;  %v1927_v49 = vpop.f32.mrf.mxu2  ;;  %v1332_v63 = vld [vmem:[#allocation7 + $0x2b8] sm:$0xff]  ;;  %v1379_v28 = vld [vmem:[#allocation7 + $0x430] sm:$0xff] }
 0x205   : > { %2304 = vmatpush.msra.mxu1 %v1315_v45  ;;  %2312 = vmatpush.msra.mxu2 %v1427_v46  ;;  %v1928_v24 = vadd.f32 %v1927_v49, %v3627_v13  ;;  %v1491_v13 = vld [vmem:[#allocation7 + $0x7b0] sm:$0xff]  ;;  %v1252_v45 = vld [vmem:[#allocation7 + $0x38] sm:$0xff] }
 0x206   : > { %2352 = vmatpush.msrb.mxu0 %v1300_v47  ;;  %2265 = vmatpush.msrb.mxu3 %v1438_v48  ;;  %v1455_v44 = vld [vmem:[#allocation7 + $0x690] sm:$0xff]  ;;  %v1328_v46 = vld [vmem:[#allocation7 + $0x298] sm:$0xff] }
 0x207   : > { %2305 = vmatpush.msra.mxu1 %v1311_v32  ;;  %2266 = vmatmul.f32.vlgmr.msrb.gmra.mxu3 %v3625_v9  ;;  %v1375_v47 = vld [vmem:[#allocation7 + $0x410] sm:$0xff]  ;;  %v1248_v49 = vld [vmem:[#allocation7 + $0x18] sm:$0xff] }
 0x208   : > { %2306 = vmatmul.f32.vlgmr.msra.gmra.mxu1 %v3614_v38  ;;  %2313 = vmatpush.msra.mxu2 %v1423_v50  ;;  %v1451_v32 = vld [vmem:[#allocation7 + $0x670] sm:$0xff] }
 0x209   : > { %2330 = vmatpush.msra.mxu3 %v1499_v51  ;;  %2353 = vmatpush.msrb.mxu0 %v1296_v52 }
 0x20a   : > { %2370 = vmatpush.msrb.mxu1 %v1372_v53  ;;  %2314 = vmatpush.msra.mxu2 %v1419_v54  ;;  %v1436_v53 = vld [vmem:[#allocation7 + $0x5f8] sm:$0xff] }
 0x20b   : > { %2331 = vmatpush.msra.mxu3 %v1495_v55  ;;  %2354 = vmatpush.msrb.mxu0 %v1292_v56  ;;  %v1947_v60 = vpop.f32.mrf.mxu3  ;;  %v2499_v55 = vld [vmem:[#allocation7 + $0x11e0] sm:$0xff]  ;;  %v1447_v56 = vld [vmem:[#allocation7 + $0x650] sm:$0xff] }
 0x20c   : > { %2371 = vmatpush.msrb.mxu1 %v1368_v57  ;;  %2315 = vmatpush.msra.mxu2 %v1415_v25  ;;  %v3642_v1 = vadd.f32 %v1947_v60, %v1928_v24  ;;  %v1324_v24 = vld [vmem:[#allocation7 + $0x278] sm:$0xff]  ;;  %v2491_v60 = vld [vmem:[#allocation7 + $0x11a0] sm:$0xff] }
 0x20d   : > { %2332 = vmatpush.msra.mxu3 %v1491_v13  ;;  %2355 = vmatpush.msrb.mxu0 %v1288_v58  ;;  %v1320_v57 = vld [vmem:[#allocation7 + $0x258] sm:$0xff]  ;;  %v1443_v13 = vld [vmem:[#allocation7 + $0x630] sm:$0xff] }
 0x20e   : > { %2372 = vmatpush.msrb.mxu1 %v1364_v19  ;;  %2316 = vmatpush.msra.mxu2 %v1411_v59  ;;  %v1432_v25 = vld [vmem:[#allocation7 + $0x5d8] sm:$0xff] }
 0x20f   : > { %2333 = vmatpush.msra.mxu3 %v1487_v61  ;;  %2356 = vmatpush.msrb.mxu0 %v1284_v0  ;;  %v1316_v58 = vld [vmem:[#allocation7 + $0x238] sm:$0xff]  ;;  %v1439_v61 = vld [vmem:[#allocation7 + $0x610] sm:$0xff] }
 0x210   : > { %2373 = vmatpush.msrb.mxu1 %v1360_v2  ;;  %2317 = vmatpush.msra.mxu2 %v1407_v3  ;;  %v1428_v19 = vld [vmem:[#allocation7 + $0x5b8] sm:$0xff] }
 0x211   : > { %2334 = vmatpush.msra.mxu3 %v1483_v7  ;;  %2357 = vmatpush.msrb.mxu0 %v1280_v8  ;;  %v1312_v2 = vld [vmem:[#allocation7 + $0x218] sm:$0xff]  ;;  %v2487_v7 = vld [vmem:[#allocation7 + $0x1180] sm:$0xff] }
 0x212   : > { %2374 = vmatpush.msrb.mxu1 %v1356_v12  ;;  %2318 = vmatpush.msra.mxu2 %v1403_v16  ;;  %v1500_v3 = vld [vmem:[#allocation7 + $0x7f8] sm:$0xff]  ;;  %v2563_v8 = vld [vmem:[#allocation7 + $0x13e0] sm:$0xff] }
 0x213   : > { %2335 = vmatpush.msra.mxu3 %v1479_v17  ;;  %2358 = vmatpush.msrb.mxu0 %v1276_v18  ;;  %v1420_v12 = vld [vmem:[#allocation7 + $0x578] sm:$0xff]  ;;  %v2483_v17 = vld [vmem:[#allocation7 + $0x1160] sm:$0xff] }
 0x214   : > { %2375 = vmatpush.msrb.mxu1 %v1352_v21  ;;  %2319 = vmatpush.msra.mxu2 %v1399_v4  ;;  %v1496_v16 = vld [vmem:[#allocation7 + $0x7d8] sm:$0xff]  ;;  %v2559_v18 = vld [vmem:[#allocation7 + $0x13c0] sm:$0xff] }
 0x215   : > { %2336 = vmatpush.msra.mxu3 %v1475_v11  ;;  %2359 = vmatpush.msrb.mxu0 %v1272_v26  ;;  %v1416_v21 = vld [vmem:[#allocation7 + $0x558] sm:$0xff]  ;;  %v2479_v11 = vld [vmem:[#allocation7 + $0x1140] sm:$0xff] }
 0x216   : > { %2376 = vmatpush.msrb.mxu1 %v1348_v27  ;;  %2320 = vmatpush.msra.mxu2 %v1395_v15  ;;  %v1492_v4 = vld [vmem:[#allocation7 + $0x7b8] sm:$0xff]  ;;  %v2555_v26 = vld [vmem:[#allocation7 + $0x13a0] sm:$0xff] }
 0x217   : > { %2337 = vmatpush.msra.mxu3 %v1471_v23  ;;  %2360 = vmatpush.msrb.mxu0 %v1268_v33  ;;  %v1412_v27 = vld [vmem:[#allocation7 + $0x538] sm:$0xff]  ;;  %v2475_v23 = vld [vmem:[#allocation7 + $0x1120] sm:$0xff] }
 0x218   : > { %2377 = vmatpush.msrb.mxu1 %v1344_v34  ;;  %2321 = vmatpush.msra.mxu2 %v1391_v14  ;;  %v2047_v51 = vpop.f32.mrf.mxu0  ;;  %v1488_v15 = vld [vmem:[#allocation7 + $0x798] sm:$0xff]  ;;  %v2471_v14 = vld [vmem:[#allocation7 + $0x1100] sm:$0xff] }
 0x219   : > { %2338 = vmatpush.msra.mxu3 %v1467_v6  ;;  %2361 = vmatpush.msrb.mxu0 %v1264_v20  ;;  %v1408_v33 = vld [vmem:[#allocation7 + $0x518] sm:$0xff]  ;;  %v2547_v6 = vld [vmem:[#allocation7 + $0x1360] sm:$0xff] }
 0x21a   : > { %2378 = vmatpush.msrb.mxu1 %v1340_v35  ;;  %2322 = vmatpush.msra.mxu2 %v1387_v36  ;;  %v1484_v34 = vld [vmem:[#allocation7 + $0x778] sm:$0xff]  ;;  %v2467_v36 = vld [vmem:[#allocation7 + $0x10e0] sm:$0xff] }
 0x21b   : > { %2339 = vmatpush.msra.mxu3 %v1463_v37  ;;  %2362 = vmatpush.msrb.mxu0 %v1260_v40  ;;  %v1404_v20 = vld [vmem:[#allocation7 + $0x4f8] sm:$0xff]  ;;  %v2543_v37 = vld [vmem:[#allocation7 + $0x1340] sm:$0xff] }
 0x21c   : > { %2379 = vmatpush.msrb.mxu1 %v1336_v41  ;;  %2323 = vmatpush.msra.mxu2 %v1383_v10  ;;  %v1480_v35 = vld [vmem:[#allocation7 + $0x758] sm:$0xff]  ;;  %v2463_v10 = vld [vmem:[#allocation7 + $0x10c0] sm:$0xff] }
 0x21d   : > { %2340 = vmatpush.msra.mxu3 %v1459_v42  ;;  %2363 = vmatpush.msrb.mxu0 %v1256_v43  ;;  %v2007_v48 = vpop.f32.mrf.mxu2  ;;  %v1400_v40 = vld [vmem:[#allocation7 + $0x4d8] sm:$0xff]  ;;  %v2539_v42 = vld [vmem:[#allocation7 + $0x1320] sm:$0xff] }
 0x21e   : > { %2380 = vmatpush.msrb.mxu1 %v1332_v63  ;;  %2324 = vmatpush.msra.mxu2 %v1379_v28  ;;  %v2008_v50 = vadd.f32 %v2007_v48, %v3633_v39  ;;  %v2495_v39 = vld [vmem:[#allocation7 + $0x11c0] sm:$0xff]  ;;  %v1476_v41 = vld [vmem:[#allocation7 + $0x738] sm:$0xff] }
 0x21f   : > { %2341 = vmatpush.msra.mxu3 %v1455_v44  ;;  %2364 = vmatpush.msrb.mxu0 %v1252_v45  ;;  %v2067_v52 = vpop.f32.mrf.mxu1  ;;  %v1396_v43 = vld [vmem:[#allocation7 + $0x4b8] sm:$0xff]  ;;  %v2459_v28 = vld [vmem:[#allocation7 + $0x10a0] sm:$0xff] }
 0x220   : > { %2381 = vmatpush.msrb.mxu1 %v1328_v46  ;;  %2325 = vmatpush.msra.mxu2 %v1375_v47  ;;  %v3645_v54 = vadd.f32 %v2067_v52, %v2047_v51  ;;  %v1472_v63 = vld [vmem:[#allocation7 + $0x718] sm:$0xff]  ;;  %v2535_v44 = vld [vmem:[#allocation7 + $0x1300] sm:$0xff] }
 0x221   : > { %2342 = vmatpush.msra.mxu3 %v1451_v32  ;;  %2365 = vmatpush.msrb.mxu0 %v1248_v49  ;;  %v1392_v45 = vld [vmem:[#allocation7 + $0x498] sm:$0xff]  ;;  %v2455_v47 = vld [vmem:[#allocation7 + $0x1080] sm:$0xff] }
 0x222   : > { %2382 = vmatpush.msrb.mxu1 %v1324_v24  ;;  %2326 = vmatmul.f32.vlgmr.msra.gmra.mxu2 %v3621_v22  ;;  %v1468_v46 = vld [vmem:[#allocation7 + $0x6f8] sm:$0xff]  ;;  %v2531_v48 = vld [vmem:[#allocation7 + $0x12e0] sm:$0xff] }
 0x223   : > { %2366 = vmatmul.f32.vlgmr.msrb.gmra.mxu0 %v3610_v29  ;;  %2390 = vmatpush.msrb.mxu2 %v1436_v53  ;;  %v1424_v29 = vld [vmem:[#allocation7 + $0x598] sm:$0xff]  ;;  %v2527_v24 = vld [vmem:[#allocation7 + $0x12c0] sm:$0xff] }
 0x224   : > { %2719 = vmatpush.msra.mxu0 %v2499_v55  ;;  %2343 = vmatpush.msra.mxu3 %v1447_v56  ;;  %v2027_v59 = vpop.f32.mrf.mxu3  ;;  %v1388_v32 = vld [vmem:[#allocation7 + $0x478] sm:$0xff]  ;;  %v2447_v53 = vld [vmem:[#allocation7 + $0x1040] sm:$0xff] }
 0x225   : > { %2383 = vmatpush.msrb.mxu1 %v1320_v57  ;;  %2391 = vmatpush.msrb.mxu2 %v1432_v25  ;;  %v3649_v0 = vadd.f32 %v2027_v59, %v2008_v50  ;;  %v1464_v49 = vld [vmem:[#allocation7 + $0x6d8] sm:$0xff]  ;;  %v2451_v50 = vld [vmem:[#allocation7 + $0x1060] sm:$0xff] }
 0x226   : > { %2720 = vmatpush.msra.mxu0 %v2495_v39  ;;  %2344 = vmatpush.msra.mxu3 %v1443_v13  ;;  %v1384_v51 = vld [vmem:[#allocation7 + $0x458] sm:$0xff]  ;;  %v2523_v56 = vld [vmem:[#allocation7 + $0x12a0] sm:$0xff] }
 0x227   : > { %2384 = vmatpush.msrb.mxu1 %v1316_v58  ;;  %2392 = vmatpush.msrb.mxu2 %v1428_v19  ;;  %v1460_v52 = vld [vmem:[#allocation7 + $0x6b8] sm:$0xff]  ;;  %v2443_v13 = vld [vmem:[#allocation7 + $0x1020] sm:$0xff] }
 0x228   : > { %2721 = vmatpush.msra.mxu0 %v2491_v60  ;;  %2345 = vmatpush.msra.mxu3 %v1439_v61  ;;  %v2430_v55 = vld [vmem:[#allocation2] sm:$0xfc]  ;;  %v2434_v25 = vld [vmem:[#allocation2 + $0x20] sm:$0x3] }
 0x229   : > { %2385 = vmatpush.msrb.mxu1 %v1312_v2  ;;  %2346 = vmatmul.f32.vlgmr.msra.gmra.mxu3 %v3625_v9  ;;  %v1380_v57 = vld [vmem:[#allocation7 + $0x438] sm:$0xff]  ;;  %v2519_v58 = vld [vmem:[#allocation7 + $0x1280] sm:$0xff]  ;;  %v2703_v2 = vrot.slane %v2430_v55, 2  ;;  %v2544_v55 = vld [vmem:[#allocation7 + $0x1348] sm:$0xff] }
 0x22a   : > { %2386 = vmatmul.f32.vlgmr.msrb.gmra.mxu1 %v3614_v38  ;;  %2393 = vmatpush.msrb.mxu2 %v1424_v29  ;;  %v2551_v38 = vld [vmem:[#allocation7 + $0x1380] sm:$0xff]  ;;  %v1456_v39 = vld [vmem:[#allocation7 + $0x698] sm:$0xff]  ;;  %v2704_v29 = vrot.slane %v2434_v25, 2  ;;  %v2464_v25 = vld [vmem:[#allocation7 + $0x10c8] sm:$0xff] }
 0x22b   : > { %2410 = vmatpush.msrb.mxu3 %v1500_v3  ;;  %2722 = vmatpush.msra.mxu0 %v2487_v7  ;;  %v1376_v19 = vld [vmem:[#allocation7 + $0x418] sm:$0xff]  ;;  %v2439_v61 = vld [vmem:[#allocation7 + $0x1000] sm:$0xff] }
 0x22c   : > { %2739 = vmatpush.msra.mxu1 %v2563_v8  ;;  %2394 = vmatpush.msrb.mxu2 %v1420_v12  ;;  %v1452_v60 = vld [vmem:[#allocation7 + $0x678] sm:$0xff]  ;;  %v2515_v7 = vld [vmem:[#allocation7 + $0x1260] sm:$0xff]  ;;  %v2500_v12 = vld [vmem:[#allocation7 + $0x11e8] sm:$0xff] }
 0x22d   : > { %2411 = vmatpush.msrb.mxu3 %v1496_v16  ;;  %2723 = vmatpush.msra.mxu0 %v2483_v17  ;;  %v2627_v8 = vld [vmem:[#allocation7 + $0x15e0] sm:$0xff]  ;;  %v1448_v16 = vld [vmem:[#allocation7 + $0x658] sm:$0xff] }
 0x22e   : > { %2740 = vmatpush.msra.mxu1 %v2559_v18  ;;  %2395 = vmatpush.msrb.mxu2 %v1416_v21  ;;  %v2431_v17 = vld [vmem:[#allocation2 + $0x8] sm:$0xfc]  ;;  %v3656_v18 = vsel %vm1030_vm1, %v2703_v2, %v2704_v29 }
 0x22f   : > { %2412 = vmatpush.msrb.mxu3 %v1492_v4  ;;  %2724 = vmatpush.msra.mxu0 %v2479_v11  ;;  %v2511_v21 = vld [vmem:[#allocation7 + $0x1240] sm:$0xff]  ;;  %v2496_v11 = vld [vmem:[#allocation7 + $0x11c8] sm:$0xff] }
 0x230   : > { %2741 = vmatpush.msra.mxu1 %v2555_v26  ;;  %2396 = vmatpush.msrb.mxu2 %v1412_v27  ;;  %v2623_v4 = vld [vmem:[#allocation7 + $0x15c0] sm:$0xff]  ;;  %v1444_v26 = vld [vmem:[#allocation7 + $0x638] sm:$0xff]  ;;  %v2456_v2 = vld [vmem:[#allocation7 + $0x1088] sm:$0xff] }
 0x231   : > { %2413 = vmatpush.msrb.mxu3 %v1488_v15  ;;  %2725 = vmatpush.msra.mxu0 %v2475_v23  ;;  %v2507_v27 = vld [vmem:[#allocation7 + $0x1220] sm:$0xff]  ;;  %v2532_v29 = vld [vmem:[#allocation7 + $0x12e8] sm:$0xff] }
 0x232   : > { %2742 = vmatpush.msra.mxu1 %v2551_v38  ;;  %2397 = vmatpush.msrb.mxu2 %v1408_v33  ;;  %v2619_v15 = vld [vmem:[#allocation7 + $0x15a0] sm:$0xff]  ;;  %v2492_v38 = vld [vmem:[#allocation7 + $0x11a8] sm:$0xff]  ;;  %v2706_v33 = vrot.slane %v2431_v17, 2 }
 0x233   : > { %2414 = vmatpush.msrb.mxu3 %v1484_v34  ;;  %2726 = vmatpush.msra.mxu0 %v2471_v14  ;;  %v2432_v17 = vld [vmem:[#allocation2 + $0x10] sm:$0xfc] }
 0x234   : > { %2743 = vmatpush.msra.mxu1 %v2547_v6  ;;  %2398 = vmatpush.msrb.mxu2 %v1404_v20  ;;  %v2503_v6 = vld [vmem:[#allocation7 + $0x1200] sm:$0xff] }
 0x235   : > { %2415 = vmatpush.msrb.mxu3 %v1480_v35  ;;  %2727 = vmatpush.msra.mxu0 %v2467_v36  ;;  %v2615_v20 = vld [vmem:[#allocation7 + $0x1580] sm:$0xff]  ;;  %v2488_v36 = vld [vmem:[#allocation7 + $0x1188] sm:$0xff] }
 0x236   : > { %2744 = vmatpush.msra.mxu1 %v2543_v37  ;;  %2399 = vmatpush.msrb.mxu2 %v1400_v40  ;;  %v2691_v35 = vld [vmem:[#allocation7 + $0x17e0] sm:$0xff]  ;;  %v2564_v40 = vld [vmem:[#allocation7 + $0x13e8] sm:$0xff] }
 0x237   : > { %2416 = vmatpush.msrb.mxu3 %v1476_v41  ;;  %2728 = vmatpush.msra.mxu0 %v2463_v10  ;;  %v2611_v41 = vld [vmem:[#allocation7 + $0x1560] sm:$0xff] }
 0x238   : > { %2745 = vmatpush.msra.mxu1 %v2539_v42  ;;  %2400 = vmatpush.msrb.mxu2 %v1396_v43  ;;  %v2687_v10 = vld [vmem:[#allocation7 + $0x17c0] sm:$0xff]  ;;  %v2484_v42 = vld [vmem:[#allocation7 + $0x1168] sm:$0xff] }
 0x239   : > { %2417 = vmatpush.msrb.mxu3 %v1472_v63  ;;  %2729 = vmatpush.msra.mxu0 %v2459_v28  ;;  %v2560_v43 = vld [vmem:[#allocation7 + $0x13c8] sm:$0xff]  ;;  %v2607_v63 = vld [vmem:[#allocation7 + $0x1540] sm:$0xff] }
 0x23a   : > { %2746 = vmatpush.msra.mxu1 %v2535_v44  ;;  %2401 = vmatpush.msrb.mxu2 %v1392_v45  ;;  %v2683_v28 = vld [vmem:[#allocation7 + $0x17a0] sm:$0xff]  ;;  %v2480_v44 = vld [vmem:[#allocation7 + $0x1148] sm:$0xff] }
 0x23b   : > { %2418 = vmatpush.msrb.mxu3 %v1468_v46  ;;  %2730 = vmatpush.msra.mxu0 %v2455_v47  ;;  %v2603_v45 = vld [vmem:[#allocation7 + $0x1520] sm:$0xff]  ;;  %v2476_v47 = vld [vmem:[#allocation7 + $0x1128] sm:$0xff] }
 0x23c   : > { %2747 = vmatpush.msra.mxu1 %v2531_v48  ;;  %2402 = vmatpush.msrb.mxu2 %v1388_v32  ;;  %v2679_v46 = vld [vmem:[#allocation7 + $0x1780] sm:$0xff]  ;;  %v2552_v48 = vld [vmem:[#allocation7 + $0x1388] sm:$0xff] }
 0x23d   : > { %2419 = vmatpush.msrb.mxu3 %v1464_v49  ;;  %2731 = vmatpush.msra.mxu0 %v2451_v50  ;;  %v2599_v32 = vld [vmem:[#allocation7 + $0x1500] sm:$0xff]  ;;  %v2472_v50 = vld [vmem:[#allocation7 + $0x1108] sm:$0xff] }
 0x23e   : > { %2748 = vmatpush.msra.mxu1 %v2527_v24  ;;  %2403 = vmatpush.msrb.mxu2 %v1384_v51  ;;  %v2675_v49 = vld [vmem:[#allocation7 + $0x1760] sm:$0xff]  ;;  %v2548_v24 = vld [vmem:[#allocation7 + $0x1368] sm:$0xff] }
 0x23f   : > { %2420 = vmatpush.msrb.mxu3 %v1460_v52  ;;  %2732 = vmatpush.msra.mxu0 %v2447_v53  ;;  %v2087_v59 = vpop.f32.mrf.mxu2  ;;  %v2595_v51 = vld [vmem:[#allocation7 + $0x14e0] sm:$0xff]  ;;  %v2468_v53 = vld [vmem:[#allocation7 + $0x10e8] sm:$0xff] }
 0x240   : > { %2749 = vmatpush.msra.mxu1 %v2523_v56  ;;  %2404 = vmatpush.msrb.mxu2 %v1380_v57  ;;  %v2088_v3 = vadd.f32 %v2087_v59, %v3645_v54  ;;  %v2435_v54 = vld [vmem:[#allocation2 + $0x28] sm:$0x3]  ;;  %v2536_v59 = vld [vmem:[#allocation7 + $0x1308] sm:$0xff] }
 0x241   : > { %2421 = vmatpush.msrb.mxu3 %v1456_v39  ;;  %2733 = vmatpush.msra.mxu0 %v2443_v13  ;;  %v2707_v34 = vrot.slane %v2435_v54, 2  ;;  %v2671_v52 = vld [vmem:[#allocation7 + $0x1740] sm:$0xff]  ;;  %v2540_v39 = vld [vmem:[#allocation7 + $0x1328] sm:$0xff] }
 0x242   : > { %2750 = vmatpush.msra.mxu1 %v2519_v58  ;;  %2405 = vmatpush.msrb.mxu2 %v1376_v19  ;;  %v2591_v56 = vld [vmem:[#allocation7 + $0x14c0] sm:$0xff]  ;;  %v2460_v19 = vld [vmem:[#allocation7 + $0x10a8] sm:$0xff] }
 0x243   : > { %2422 = vmatpush.msrb.mxu3 %v1452_v60  ;;  %2734 = vmatpush.msra.mxu0 %v2439_v61  ;;  %v3663_v37 = vsel %vm1030_vm1, %v2706_v33, %v2707_v34  ;;  %v2667_v57 = vld [vmem:[#allocation7 + $0x1720] sm:$0xff]  ;;  %v2436_v54 = vld [vmem:[#allocation2 + $0x30] sm:$0x3] }
 0x244   : > { %2751 = vmatpush.msra.mxu1 %v2515_v7  ;;  %2406 = vmatmul.f32.vlgmr.msrb.gmra.mxu2 %v3621_v22  ;;  %v1440_v22 = vld [vmem:[#allocation7 + $0x618] sm:$0xff]  ;;  %v2587_v13 = vld [vmem:[#allocation7 + $0x14a0] sm:$0xff]  ;;  %v2710_v33 = vrot.slane %v2436_v54, 2  ;;  %v2469_v54 = vld [vmem:[#allocation7 + $0x10f0] sm:$0xff] }
 0x245   : > { %2735 = vmatmul.f32.vlgmr.msra.gmra.mxu0 %v3656_v18  ;;  %2759 = vmatpush.msra.mxu2 %v2627_v8  ;;  %v2663_v58 = vld [vmem:[#allocation7 + $0x1700] sm:$0xff]  ;;  %v2452_v8 = vld [vmem:[#allocation7 + $0x1068] sm:$0xff] }
 0x246   : > { %2799 = vmatpush.msrb.mxu0 %v2500_v12  ;;  %2423 = vmatpush.msrb.mxu3 %v1448_v16  ;;  %v2107_v23 = vpop.f32.mrf.mxu3  ;;  %v2583_v60 = vld [vmem:[#allocation7 + $0x1480] sm:$0xff]  ;;  %v2528_v12 = vld [vmem:[#allocation7 + $0x12c8] sm:$0xff] }
 0x247   : > { %2752 = vmatpush.msra.mxu1 %v2511_v21  ;;  %2760 = vmatpush.msra.mxu2 %v2623_v4  ;;  %v3659_v14 = vadd.f32 %v2107_v23, %v2088_v3  ;;  %v2659_v61 = vld [vmem:[#allocation7 + $0x16e0] sm:$0xff]  ;;  %v2448_v4 = vld [vmem:[#allocation7 + $0x1048] sm:$0xff] }
 0x248   : > { %2800 = vmatpush.msrb.mxu0 %v2496_v11  ;;  %2424 = vmatpush.msrb.mxu3 %v1444_v26  ;;  %v2579_v3 = vld [vmem:[#allocation7 + $0x1460] sm:$0xff]  ;;  %v2524_v11 = vld [vmem:[#allocation7 + $0x12a8] sm:$0xff] }
 0x249   : > { %2753 = vmatpush.msra.mxu1 %v2507_v27  ;;  %2761 = vmatpush.msra.mxu2 %v2619_v15  ;;  %v2655_v7 = vld [vmem:[#allocation7 + $0x16c0] sm:$0xff]  ;;  %v2444_v15 = vld [vmem:[#allocation7 + $0x1028] sm:$0xff] }
 0x24a   : > { %2801 = vmatpush.msrb.mxu0 %v2492_v38  ;;  %2425 = vmatpush.msrb.mxu3 %v1440_v22  ;;  %v2575_v16 = vld [vmem:[#allocation7 + $0x1440] sm:$0xff]  ;;  %v2520_v23 = vld [vmem:[#allocation7 + $0x1288] sm:$0xff]  ;;  %v2709_v22 = vrot.slane %v2432_v17, 2 }
 0x24b   : > { %2754 = vmatpush.msra.mxu1 %v2503_v6  ;;  %2426 = vmatmul.f32.vlgmr.msrb.gmra.mxu3 %v3625_v9  ;;  %v2556_v9 = vld [vmem:[#allocation7 + $0x13a8] sm:$0xff]  ;;  %v2651_v21 = vld [vmem:[#allocation7 + $0x16a0] sm:$0xff] }
 0x24c   : > { %2755 = vmatmul.f32.vlgmr.msra.gmra.mxu1 %v3663_v37  ;;  %2762 = vmatpush.msra.mxu2 %v2615_v20  ;;  %v2571_v26 = vld [vmem:[#allocation7 + $0x1420] sm:$0xff]  ;;  %v2440_v6 = vld [vmem:[#allocation7 + $0x1008] sm:$0xff] }
 0x24d   : > { %2779 = vmatpush.msra.mxu3 %v2691_v35  ;;  %2802 = vmatpush.msrb.mxu0 %v2488_v36  ;;  %v2647_v27 = vld [vmem:[#allocation7 + $0x1680] sm:$0xff]  ;;  %v2516_v20 = vld [vmem:[#allocation7 + $0x1268] sm:$0xff]  ;;  %v2433_v36 = vld [vmem:[#allocation2 + $0x18] sm:$0xfc] }
 0x24e   : > { %2819 = vmatpush.msrb.mxu1 %v2564_v40  ;;  %2763 = vmatpush.msra.mxu2 %v2611_v41  ;;  %v2567_v38 = vld [vmem:[#allocation7 + $0x1400] sm:$0xff]  ;;  %v2628_v35 = vld [vmem:[#allocation7 + $0x15e8] sm:$0xff]  ;;  %v3667_v40 = vsel %vm1030_vm1, %v2709_v22, %v2710_v33  ;;  %v2501_v41 = vld [vmem:[#allocation7 + $0x11f0] sm:$0xff] }
 0x24f   : > { %2780 = vmatpush.msra.mxu3 %v2687_v10  ;;  %2803 = vmatpush.msrb.mxu0 %v2484_v42  ;;  %v2643_v34 = vld [vmem:[#allocation7 + $0x1660] sm:$0xff]  ;;  %v2437_v42 = vld [vmem:[#allocation2 + $0x38] sm:$0x3]  ;;  %v2596_v17 = vld [vmem:[#allocation7 + $0x14e8] sm:$0xff] }
 0x250   : > { %2820 = vmatpush.msrb.mxu1 %v2560_v43  ;;  %2764 = vmatpush.msra.mxu2 %v2607_v63  ;;  %v2639_v10 = vld [vmem:[#allocation7 + $0x1640] sm:$0xff]  ;;  %v2512_v43 = vld [vmem:[#allocation7 + $0x1248] sm:$0xff]  ;;  %v2461_v33 = vld [vmem:[#allocation7 + $0x10b0] sm:$0xff] }
 0x251   : > { %2781 = vmatpush.msra.mxu3 %v2683_v28  ;;  %2804 = vmatpush.msrb.mxu0 %v2480_v44  ;;  %v2624_v63 = vld [vmem:[#allocation7 + $0x15c8] sm:$0xff]  ;;  %v2497_v28 = vld [vmem:[#allocation7 + $0x11d0] sm:$0xff]  ;;  %v2635_v44 = vld [vmem:[#allocation7 + $0x1620] sm:$0xff] }
 0x252   : > { %2821 = vmatpush.msrb.mxu1 %v2556_v9  ;;  %2765 = vmatpush.msra.mxu2 %v2603_v45  ;;  %v2508_v9 = vld [vmem:[#allocation7 + $0x1228] sm:$0xff] }
 0x253   : > { %2782 = vmatpush.msra.mxu3 %v2679_v46  ;;  %2805 = vmatpush.msrb.mxu0 %v2476_v47  ;;  %v2620_v45 = vld [vmem:[#allocation7 + $0x15a8] sm:$0xff]  ;;  %v2712_v46 = vrot.slane %v2433_v36, 2  ;;  %v2713_v47 = vrot.slane %v2437_v42, 2 }
 0x254   : > { %2822 = vmatpush.msrb.mxu1 %v2552_v48  ;;  %2766 = vmatpush.msra.mxu2 %v2599_v32  ;;  %v2493_v48 = vld [vmem:[#allocation7 + $0x11b0] sm:$0xff]  ;;  %v2631_v32 = vld [vmem:[#allocation7 + $0x1600] sm:$0xff]  ;;  %v2664_v22 = vld [vmem:[#allocation7 + $0x1708] sm:$0xff] }
 0x255   : > { %2783 = vmatpush.msra.mxu3 %v2675_v49  ;;  %2806 = vmatpush.msrb.mxu0 %v2472_v50  ;;  %v2504_v49 = vld [vmem:[#allocation7 + $0x1208] sm:$0xff] }
 0x256   : > { %2823 = vmatpush.msrb.mxu1 %v2548_v24  ;;  %2767 = vmatpush.msra.mxu2 %v2595_v51  ;;  %v2616_v50 = vld [vmem:[#allocation7 + $0x1588] sm:$0xff]  ;;  %v3672_v24 = vsel %vm1030_vm1, %v2712_v46, %v2713_v47  ;;  %v2449_v46 = vld [vmem:[#allocation7 + $0x1050] sm:$0xff] }
 0x257   : > { %2784 = vmatpush.msra.mxu3 %v2671_v52  ;;  %2807 = vmatpush.msrb.mxu0 %v2468_v53  ;;  %v2692_v51 = vld [vmem:[#allocation7 + $0x17e8] sm:$0xff]  ;;  %v2489_v52 = vld [vmem:[#allocation7 + $0x1190] sm:$0xff] }
 0x258   : > { %2824 = vmatpush.msrb.mxu1 %v2544_v55  ;;  %2768 = vmatpush.msra.mxu2 %v2591_v56  ;;  %v2565_v53 = vld [vmem:[#allocation7 + $0x13f0] sm:$0xff]  ;;  %v2612_v55 = vld [vmem:[#allocation7 + $0x1568] sm:$0xff]  ;;  %v3675_v56 = vpop.f32.mrf.mxu0 }
 0x259   : > { %2785 = vmatpush.msra.mxu3 %v2667_v57  ;;  %2808 = vmatpush.msrb.mxu0 %v2464_v25  ;;  %v2688_v57 = vld [vmem:[#allocation7 + $0x17c8] sm:$0xff]  ;;  %v2485_v25 = vld [vmem:[#allocation7 + $0x1170] sm:$0xff] }
 0x25a   : > { %2825 = vmatpush.msrb.mxu1 %v2540_v39  ;;  %2769 = vmatpush.msra.mxu2 %v2587_v13  ;;  %v2561_v39 = vld [vmem:[#allocation7 + $0x13d0] sm:$0xff]  ;;  %v2608_v13 = vld [vmem:[#allocation7 + $0x1548] sm:$0xff] }
 0x25b   : > { %2786 = vmatpush.msra.mxu3 %v2663_v58  ;;  %2809 = vmatpush.msrb.mxu0 %v2460_v19  ;;  %v2684_v58 = vld [vmem:[#allocation7 + $0x17a8] sm:$0xff]  ;;  %v2481_v19 = vld [vmem:[#allocation7 + $0x1150] sm:$0xff] }
 0x25c   : > { %2826 = vmatpush.msrb.mxu1 %v2536_v59  ;;  %2770 = vmatpush.msra.mxu2 %v2583_v60  ;;  %v2557_v59 = vld [vmem:[#allocation7 + $0x13b0] sm:$0xff]  ;;  %v2604_v60 = vld [vmem:[#allocation7 + $0x1528] sm:$0xff] }
 0x25d   : > { %2787 = vmatpush.msra.mxu3 %v2659_v61  ;;  %2810 = vmatpush.msrb.mxu0 %v2456_v2  ;;  %v2680_v61 = vld [vmem:[#allocation7 + $0x1788] sm:$0xff]  ;;  %v2477_v2 = vld [vmem:[#allocation7 + $0x1130] sm:$0xff] }
 0x25e   : > { %2827 = vmatpush.msrb.mxu1 %v2532_v29  ;;  %2771 = vmatpush.msra.mxu2 %v2579_v3  ;;  %v2553_v29 = vld [vmem:[#allocation7 + $0x1390] sm:$0xff]  ;;  %v2600_v3 = vld [vmem:[#allocation7 + $0x1508] sm:$0xff] }
 0x25f   : > { %2788 = vmatpush.msra.mxu3 %v2655_v7  ;;  %2811 = vmatpush.msrb.mxu0 %v2452_v8  ;;  %v2676_v7 = vld [vmem:[#allocation7 + $0x1768] sm:$0xff]  ;;  %v2473_v8 = vld [vmem:[#allocation7 + $0x1110] sm:$0xff] }
 0x260   : > { %2828 = vmatpush.msrb.mxu1 %v2528_v12  ;;  %2772 = vmatpush.msra.mxu2 %v2575_v16  ;;  %v3678_v12 = vpop.f32.mrf.mxu1  ;;  %v2549_v16 = vld [vmem:[#allocation7 + $0x1370] sm:$0xff]  ;;  %v2656_v42 = vld [vmem:[#allocation7 + $0x16c8] sm:$0xff] }
 0x261   : > { %2789 = vmatpush.msra.mxu3 %v2651_v21  ;;  %2812 = vmatpush.msrb.mxu0 %v2448_v4  ;;  %v3680_v21 = vpop.f32.mrf.mxu0  ;;  %v2672_v4 = vld [vmem:[#allocation7 + $0x1748] sm:$0xff]  ;;  %v2525_v47 = vld [vmem:[#allocation7 + $0x12b0] sm:$0xff] }
 0x262   : > { %2829 = vmatpush.msrb.mxu1 %v2524_v11  ;;  %2773 = vmatpush.msra.mxu2 %v2571_v26  ;;  %v2545_v11 = vld [vmem:[#allocation7 + $0x1350] sm:$0xff]  ;;  %v2592_v26 = vld [vmem:[#allocation7 + $0x14c8] sm:$0xff] }
 0x263   : > { %2790 = vmatpush.msra.mxu3 %v2647_v27  ;;  %2813 = vmatpush.msrb.mxu0 %v2444_v15  ;;  %v2668_v27 = vld [vmem:[#allocation7 + $0x1728] sm:$0xff]  ;;  %v2465_v15 = vld [vmem:[#allocation7 + $0x10d0] sm:$0xff] }
 0x264   : > { %2830 = vmatpush.msrb.mxu1 %v2520_v23  ;;  %2774 = vmatpush.msra.mxu2 %v2567_v38  ;;  %v2541_v23 = vld [vmem:[#allocation7 + $0x1330] sm:$0xff]  ;;  %v2588_v38 = vld [vmem:[#allocation7 + $0x14a8] sm:$0xff] }
 0x265   : > { %2791 = vmatpush.msra.mxu3 %v2643_v34  ;;  %2814 = vmatpush.msrb.mxu0 %v2440_v6  ;;  %v2537_v34 = vld [vmem:[#allocation7 + $0x1310] sm:$0xff]  ;;  %v2584_v6 = vld [vmem:[#allocation7 + $0x1488] sm:$0xff] }
 0x266   : > { %2831 = vmatpush.msrb.mxu1 %v2516_v20  ;;  %2775 = vmatmul.f32.vlgmr.msra.gmra.mxu2 %v3667_v40  ;;  %v2660_v20 = vld [vmem:[#allocation7 + $0x16e8] sm:$0xff] }
 0x267   : > { %2815 = vmatmul.f32.vlgmr.msrb.gmra.mxu0 %v3656_v18  ;;  %2839 = vmatpush.msrb.mxu2 %v2628_v35  ;;  %v2457_v35 = vld [vmem:[#allocation7 + $0x1090] sm:$0xff] }
 0x268   : > { %2879 = vmatpush.msra.mxu0 %v2501_v41  ;;  %2792 = vmatpush.msra.mxu3 %v2639_v10  ;;  %v3682_v36 = vpop.f32.mrf.mxu1  ;;  %v2533_v41 = vld [vmem:[#allocation7 + $0x12f0] sm:$0xff]  ;;  %v2580_v10 = vld [vmem:[#allocation7 + $0x1468] sm:$0xff] }
 0x269   : > { %2832 = vmatpush.msrb.mxu1 %v2512_v43  ;;  %2840 = vmatpush.msrb.mxu2 %v2624_v63  ;;  %v2453_v43 = vld [vmem:[#allocation7 + $0x1070] sm:$0xff] }
 0x26a   : > { %2880 = vmatpush.msra.mxu0 %v2497_v28  ;;  %2793 = vmatpush.msra.mxu3 %v2635_v44  ;;  %v2529_v28 = vld [vmem:[#allocation7 + $0x12d0] sm:$0xff]  ;;  %v2576_v44 = vld [vmem:[#allocation7 + $0x1448] sm:$0xff] }
 0x26b   : > { %2833 = vmatpush.msrb.mxu1 %v2508_v9  ;;  %2841 = vmatpush.msrb.mxu2 %v2620_v45  ;;  %v2652_v45 = vld [vmem:[#allocation7 + $0x16a8] sm:$0xff] }
 0x26c   : > { %2881 = vmatpush.msra.mxu0 %v2493_v48  ;;  %2794 = vmatpush.msra.mxu3 %v2631_v32  ;;  %v2572_v48 = vld [vmem:[#allocation7 + $0x1428] sm:$0xff] }
 0x26d   : > { %2834 = vmatpush.msrb.mxu1 %v2504_v49  ;;  %2795 = vmatmul.f32.vlgmr.msra.gmra.mxu3 %v3672_v24  ;;  %v2648_v32 = vld [vmem:[#allocation7 + $0x1688] sm:$0xff]  ;;  %v2445_v49 = vld [vmem:[#allocation7 + $0x1030] sm:$0xff] }
 0x26e   : > { %2835 = vmatmul.f32.vlgmr.msrb.gmra.mxu1 %v3663_v37  ;;  %2842 = vmatpush.msrb.mxu2 %v2616_v50  ;;  %v2521_v50 = vld [vmem:[#allocation7 + $0x1290] sm:$0xff] }
 0x26f   : > { %2859 = vmatpush.msrb.mxu3 %v2692_v51  ;;  %2882 = vmatpush.msra.mxu0 %v2489_v52  ;;  %v2568_v51 = vld [vmem:[#allocation7 + $0x1408] sm:$0xff] }
 0x270   : > { %2899 = vmatpush.msra.mxu1 %v2565_v53  ;;  %2843 = vmatpush.msrb.mxu2 %v2612_v55  ;;  %v2644_v52 = vld [vmem:[#allocation7 + $0x1668] sm:$0xff]  ;;  %v2517_v53 = vld [vmem:[#allocation7 + $0x1270] sm:$0xff] }
 0x271   : > { %2860 = vmatpush.msrb.mxu3 %v2688_v57  ;;  %2883 = vmatpush.msra.mxu0 %v2485_v25  ;;  %v2629_v57 = vld [vmem:[#allocation7 + $0x15f0] sm:$0xff] }
 0x272   : > { %2900 = vmatpush.msra.mxu1 %v2561_v39  ;;  %2844 = vmatpush.msrb.mxu2 %v2608_v13  ;;  %v2502_v39 = vld [vmem:[#allocation7 + $0x11f8] sm:$0xff]  ;;  %v2640_v13 = vld [vmem:[#allocation7 + $0x1648] sm:$0xff] }
 0x273   : > { %2861 = vmatpush.msrb.mxu3 %v2684_v58  ;;  %2884 = vmatpush.msra.mxu0 %v2481_v19  ;;  %v2513_v58 = vld [vmem:[#allocation7 + $0x1250] sm:$0xff] }
 0x274   : > { %2901 = vmatpush.msra.mxu1 %v2557_v59  ;;  %2845 = vmatpush.msrb.mxu2 %v2604_v60  ;;  %v2625_v19 = vld [vmem:[#allocation7 + $0x15d0] sm:$0xff]  ;;  %v2498_v59 = vld [vmem:[#allocation7 + $0x11d8] sm:$0xff]  ;;  %v2636_v60 = vld [vmem:[#allocation7 + $0x1628] sm:$0xff] }
 0x275   : > { %2862 = vmatpush.msrb.mxu3 %v2680_v61  ;;  %2885 = vmatpush.msra.mxu0 %v2477_v2  ;;  %v2509_v61 = vld [vmem:[#allocation7 + $0x1230] sm:$0xff] }
 0x276   : > { %2902 = vmatpush.msra.mxu1 %v2553_v29  ;;  %2846 = vmatpush.msrb.mxu2 %v2600_v3  ;;  %v2621_v2 = vld [vmem:[#allocation7 + $0x15b0] sm:$0xff]  ;;  %v2494_v29 = vld [vmem:[#allocation7 + $0x11b8] sm:$0xff]  ;;  %v2632_v3 = vld [vmem:[#allocation7 + $0x1608] sm:$0xff] }
 0x277   : > { %2863 = vmatpush.msrb.mxu3 %v2676_v7  ;;  %2886 = vmatpush.msra.mxu0 %v2473_v8  ;;  %v2505_v7 = vld [vmem:[#allocation7 + $0x1210] sm:$0xff] }
 0x278   : > { %2903 = vmatpush.msra.mxu1 %v2549_v16  ;;  %2847 = vmatpush.msrb.mxu2 %v2596_v17  ;;  %v2617_v8 = vld [vmem:[#allocation7 + $0x1590] sm:$0xff]  ;;  %v2490_v17 = vld [vmem:[#allocation7 + $0x1198] sm:$0xff] }
 0x279   : > { %2864 = vmatpush.msrb.mxu3 %v2672_v4  ;;  %2887 = vmatpush.msra.mxu0 %v2469_v54  ;;  %v2693_v16 = vld [vmem:[#allocation7 + $0x17f0] sm:$0xff]  ;;  %v2566_v4 = vld [vmem:[#allocation7 + $0x13f8] sm:$0xff] }
 0x27a   : > { %2904 = vmatpush.msra.mxu1 %v2545_v11  ;;  %2848 = vmatpush.msrb.mxu2 %v2592_v26  ;;  %v2613_v54 = vld [vmem:[#allocation7 + $0x1570] sm:$0xff]  ;;  %v2486_v26 = vld [vmem:[#allocation7 + $0x1178] sm:$0xff] }
 0x27b   : > { %2865 = vmatpush.msrb.mxu3 %v2668_v27  ;;  %2888 = vmatpush.msra.mxu0 %v2465_v15  ;;  %v2689_v11 = vld [vmem:[#allocation7 + $0x17d0] sm:$0xff]  ;;  %v2562_v27 = vld [vmem:[#allocation7 + $0x13d8] sm:$0xff] }
 0x27c   : > { %2905 = vmatpush.msra.mxu1 %v2541_v23  ;;  %2849 = vmatpush.msrb.mxu2 %v2588_v38  ;;  %v2609_v15 = vld [vmem:[#allocation7 + $0x1550] sm:$0xff]  ;;  %v2482_v38 = vld [vmem:[#allocation7 + $0x1158] sm:$0xff] }
 0x27d   : > { %2866 = vmatpush.msrb.mxu3 %v2664_v22  ;;  %2889 = vmatpush.msra.mxu0 %v2461_v33  ;;  %v2685_v23 = vld [vmem:[#allocation7 + $0x17b0] sm:$0xff]  ;;  %v2558_v22 = vld [vmem:[#allocation7 + $0x13b8] sm:$0xff] }
 0x27e   : > { %2906 = vmatpush.msra.mxu1 %v2537_v34  ;;  %2850 = vmatpush.msrb.mxu2 %v2584_v6  ;;  %v2287_v63 = vpop.f32.mrf.mxu0  ;;  %v2605_v33 = vld [vmem:[#allocation7 + $0x1530] sm:$0xff]  ;;  %v2478_v6 = vld [vmem:[#allocation7 + $0x1138] sm:$0xff] }
 0x27f   : > { %2867 = vmatpush.msrb.mxu3 %v2660_v20  ;;  %2890 = vmatpush.msra.mxu0 %v2457_v35  ;;  %v2288_v9 = vadd.f32 %v2287_v63, %v3649_v0  ;;  %v2441_v0 = vld [vmem:[#allocation7 + $0x1010] sm:$0xff]  ;;  %v3691_v20 = vpop.f32.mrf.mxu2  ;;  %v2554_v35 = vld [vmem:[#allocation7 + $0x1398] sm:$0xff] }
 0x280   : > { %2907 = vmatpush.msra.mxu1 %v2533_v41  ;;  %2851 = vmatpush.msrb.mxu2 %v2580_v10  ;;  %v2681_v34 = vld [vmem:[#allocation7 + $0x1790] sm:$0xff] }
 0x281   : > { %2868 = vmatpush.msrb.mxu3 %v2656_v42  ;;  %2891 = vmatpush.msra.mxu0 %v2453_v43  ;;  %v2601_v41 = vld [vmem:[#allocation7 + $0x1510] sm:$0xff]  ;;  %v2474_v42 = vld [vmem:[#allocation7 + $0x1118] sm:$0xff] }
 0x282   : > { %2908 = vmatpush.msra.mxu1 %v2529_v28  ;;  %2852 = vmatpush.msrb.mxu2 %v2576_v44  ;;  %v2677_v10 = vld [vmem:[#allocation7 + $0x1770] sm:$0xff]  ;;  %v2550_v43 = vld [vmem:[#allocation7 + $0x1378] sm:$0xff] }
 0x283   : > { %2869 = vmatpush.msrb.mxu3 %v2652_v45  ;;  %2892 = vmatpush.msra.mxu0 %v2449_v46  ;;  %v2597_v63 = vld [vmem:[#allocation7 + $0x14f0] sm:$0xff]  ;;  %v2470_v44 = vld [vmem:[#allocation7 + $0x10f8] sm:$0xff] }
 0x284   : > { %2909 = vmatpush.msra.mxu1 %v2525_v47  ;;  %2853 = vmatpush.msrb.mxu2 %v2572_v48  ;;  %v2673_v28 = vld [vmem:[#allocation7 + $0x1750] sm:$0xff]  ;;  %v2466_v47 = vld [vmem:[#allocation7 + $0x10d8] sm:$0xff] }
 0x285   : > { %2870 = vmatpush.msrb.mxu3 %v2648_v32  ;;  %2893 = vmatpush.msra.mxu0 %v2445_v49  ;;  %v2307_v55 = vpop.f32.mrf.mxu1  ;;  %v2593_v45 = vld [vmem:[#allocation7 + $0x14d0] sm:$0xff]  ;;  %v2542_v48 = vld [vmem:[#allocation7 + $0x1338] sm:$0xff]  ;;  %v3693_v49 = vpop.f32.mrf.mxu3 }
 0x286   : > { %2910 = vmatpush.msra.mxu1 %v2521_v50  ;;  %2854 = vmatpush.msrb.mxu2 %v2568_v51  ;;  %v3685_v25 = vadd.f32 %v2307_v55, %v2288_v9  ;;  %v2546_v9 = vld [vmem:[#allocation7 + $0x1358] sm:$0xff]  ;;  %v2669_v46 = vld [vmem:[#allocation7 + $0x1730] sm:$0xff] }
 0x287   : > { %2871 = vmatpush.msrb.mxu3 %v2644_v52  ;;  %2894 = vmatpush.msra.mxu0 %v2441_v0  ;;  %v2589_v32 = vld [vmem:[#allocation7 + $0x14b0] sm:$0xff]  ;;  %v2462_v51 = vld [vmem:[#allocation7 + $0x10b8] sm:$0xff]  ;;  %v3695_v52 = vpop.f32.mrf.mxu2 }
 0x288   : > { %2911 = vmatpush.msra.mxu1 %v2517_v53  ;;  %2855 = vmatmul.f32.vlgmr.msrb.gmra.mxu2 %v3667_v40  ;;  %v2665_v50 = vld [vmem:[#allocation7 + $0x1710] sm:$0xff]  ;;  %v2538_v0 = vld [vmem:[#allocation7 + $0x1318] sm:$0xff] }
 0x289   : > { %2895 = vmatmul.f32.vlgmr.msra.gmra.mxu0 %v3656_v18  ;;  %2919 = vmatpush.msra.mxu2 %v2629_v57  ;;  %v2585_v53 = vld [vmem:[#allocation7 + $0x1490] sm:$0xff]  ;;  %v2458_v57 = vld [vmem:[#allocation7 + $0x1098] sm:$0xff] }
 0x28a   : > { %2959 = vmatpush.msrb.mxu0 %v2502_v39  ;;  %2872 = vmatpush.msrb.mxu3 %v2640_v13  ;;  %v2661_v55 = vld [vmem:[#allocation7 + $0x16f0] sm:$0xff]  ;;  %v2534_v39 = vld [vmem:[#allocation7 + $0x12f8] sm:$0xff] }
 0x28b   : > { %2912 = vmatpush.msra.mxu1 %v2513_v58  ;;  %2920 = vmatpush.msra.mxu2 %v2625_v19  ;;  %v2581_v13 = vld [vmem:[#allocation7 + $0x1470] sm:$0xff]  ;;  %v2454_v19 = vld [vmem:[#allocation7 + $0x1078] sm:$0xff] }
 0x28c   : > { %2960 = vmatpush.msrb.mxu0 %v2498_v59  ;;  %2873 = vmatpush.msrb.mxu3 %v2636_v60  ;;  %v2657_v58 = vld [vmem:[#allocation7 + $0x16d0] sm:$0xff]  ;;  %v2530_v60 = vld [vmem:[#allocation7 + $0x12d8] sm:$0xff] }
 0x28d   : > { %2913 = vmatpush.msra.mxu1 %v2509_v61  ;;  %2921 = vmatpush.msra.mxu2 %v2621_v2  ;;  %v2577_v61 = vld [vmem:[#allocation7 + $0x1450] sm:$0xff] }
 0x28e   : > { %2961 = vmatpush.msrb.mxu0 %v2494_v29  ;;  %2874 = vmatpush.msrb.mxu3 %v2632_v3  ;;  %v2653_v29 = vld [vmem:[#allocation7 + $0x16b0] sm:$0xff]  ;;  %v2450_v3 = vld [vmem:[#allocation7 + $0x1058] sm:$0xff] }
 0x28f   : > { %2914 = vmatpush.msra.mxu1 %v2505_v7  ;;  %2875 = vmatmul.f32.vlgmr.msrb.gmra.mxu3 %v3672_v24  ;;  %v2526_v7 = vld [vmem:[#allocation7 + $0x12b8] sm:$0xff] }
 0x290   : > { %2915 = vmatmul.f32.vlgmr.msra.gmra.mxu1 %v3663_v37  ;;  %2922 = vmatpush.msra.mxu2 %v2617_v8  ;;  %v2573_v8 = vld [vmem:[#allocation7 + $0x1430] sm:$0xff] }
 0x291   : > { %2939 = vmatpush.msra.mxu3 %v2693_v16  ;;  %2962 = vmatpush.msrb.mxu0 %v2490_v17  ;;  %v3698_v16 = vpop.f32.mrf.mxu3  ;;  %v2649_v17 = vld [vmem:[#allocation7 + $0x1690] sm:$0xff] }
 0x292   : > { %2979 = vmatpush.msrb.mxu1 %v2566_v4  ;;  %2923 = vmatpush.msra.mxu2 %v2613_v54  ;;  %v2446_v4 = vld [vmem:[#allocation7 + $0x1038] sm:$0xff] }
 0x293   : > { %2940 = vmatpush.msra.mxu3 %v2689_v11  ;;  %2963 = vmatpush.msrb.mxu0 %v2486_v26  ;;  %v2522_v54 = vld [vmem:[#allocation7 + $0x1298] sm:$0xff]  ;;  %v2569_v11 = vld [vmem:[#allocation7 + $0x1410] sm:$0xff] }
 0x294   : > { %2980 = vmatpush.msrb.mxu1 %v2562_v27  ;;  %2924 = vmatpush.msra.mxu2 %v2609_v15  ;;  %v2442_v27 = vld [vmem:[#allocation7 + $0x1018] sm:$0xff] }
 0x295   : > { %2941 = vmatpush.msra.mxu3 %v2685_v23  ;;  %2964 = vmatpush.msrb.mxu0 %v2482_v38  ;;  %v2518_v23 = vld [vmem:[#allocation7 + $0x1278] sm:$0xff] }
 0x296   : > { %2981 = vmatpush.msrb.mxu1 %v2558_v22  ;;  %2925 = vmatpush.msra.mxu2 %v2605_v33  ;;  %v2630_v22 = vld [vmem:[#allocation7 + $0x15f8] sm:$0xff] }
 0x297   : > { %2942 = vmatpush.msra.mxu3 %v2681_v34  ;;  %2965 = vmatpush.msrb.mxu0 %v2478_v6  ;;  %v2641_v34 = vld [vmem:[#allocation7 + $0x1650] sm:$0xff]  ;;  %v2514_v6 = vld [vmem:[#allocation7 + $0x1258] sm:$0xff] }
 0x298   : > { %2982 = vmatpush.msrb.mxu1 %v2554_v35  ;;  %2926 = vmatpush.msra.mxu2 %v2601_v41  ;;  %v2626_v35 = vld [vmem:[#allocation7 + $0x15d8] sm:$0xff] }
 0x299   : > { %2943 = vmatpush.msra.mxu3 %v2677_v10  ;;  %2966 = vmatpush.msrb.mxu0 %v2474_v42  ;;  %v2510_v41 = vld [vmem:[#allocation7 + $0x1238] sm:$0xff] }
 0x29a   : > { %2983 = vmatpush.msrb.mxu1 %v2550_v43  ;;  %2927 = vmatpush.msra.mxu2 %v2597_v63  ;;  %v2622_v10 = vld [vmem:[#allocation7 + $0x15b8] sm:$0xff]  ;;  %v2633_v43 = vld [vmem:[#allocation7 + $0x1610] sm:$0xff] }
 0x29b   : > { %2944 = vmatpush.msra.mxu3 %v2673_v28  ;;  %2967 = vmatpush.msrb.mxu0 %v2470_v44  ;;  %v2506_v63 = vld [vmem:[#allocation7 + $0x1218] sm:$0xff] }
 0x29c   : > { %2984 = vmatpush.msrb.mxu1 %v2546_v9  ;;  %2928 = vmatpush.msra.mxu2 %v2593_v45  ;;  %v2618_v44 = vld [vmem:[#allocation7 + $0x1598] sm:$0xff] }
 0x29d   : > { %2945 = vmatpush.msra.mxu3 %v2669_v46  ;;  %2968 = vmatpush.msrb.mxu0 %v2466_v47  ;;  %v2694_v9 = vld [vmem:[#allocation7 + $0x17f8] sm:$0xff] }
 0x29e   : > { %2985 = vmatpush.msrb.mxu1 %v2542_v48  ;;  %2929 = vmatpush.msra.mxu2 %v2589_v32  ;;  %v2690_v45 = vld [vmem:[#allocation7 + $0x17d8] sm:$0xff] }
 0x29f   : > { %2946 = vmatpush.msra.mxu3 %v2665_v50  ;;  %2969 = vmatpush.msrb.mxu0 %v2462_v51  ;;  %v2610_v46 = vld [vmem:[#allocation7 + $0x1558] sm:$0xff] }
 0x2a0   : > { %2986 = vmatpush.msrb.mxu1 %v2538_v0  ;;  %2930 = vmatpush.msra.mxu2 %v2585_v53  ;;  %v2367_v59 = vpop.f32.mrf.mxu0  ;;  %v2686_v47 = vld [vmem:[#allocation7 + $0x17b8] sm:$0xff] }
 0x2a1   : > { %2947 = vmatpush.msra.mxu3 %v2661_v55  ;;  %2970 = vmatpush.msrb.mxu0 %v2458_v57  ;;  %v2368_v2 = vadd.f32 %v2367_v59, %v3659_v14  ;;  %v2645_v14 = vld [vmem:[#allocation7 + $0x1670] sm:$0xff]  ;;  %v2606_v48 = vld [vmem:[#allocation7 + $0x1538] sm:$0xff] }
 0x2a2   : > { %2987 = vmatpush.msrb.mxu1 %v2534_v39  ;;  %2931 = vmatpush.msra.mxu2 %v2581_v13  ;;  %v2682_v32 = vld [vmem:[#allocation7 + $0x1798] sm:$0xff] }
 0x2a3   : > { %2948 = vmatpush.msra.mxu3 %v2657_v58  ;;  %2971 = vmatpush.msrb.mxu0 %v2454_v19  ;;  %v2602_v50 = vld [vmem:[#allocation7 + $0x1518] sm:$0xff] }
 0x2a4   : > { %2988 = vmatpush.msrb.mxu1 %v2530_v60  ;;  %2932 = vmatpush.msra.mxu2 %v2577_v61  ;;  %v2678_v51 = vld [vmem:[#allocation7 + $0x1778] sm:$0xff] }
 0x2a5   : > { %2949 = vmatpush.msra.mxu3 %v2653_v29  ;;  %2972 = vmatpush.msrb.mxu0 %v2450_v3  ;;  %v2327_v26 = vpop.f32.mrf.mxu2  ;;  %v2598_v0 = vld [vmem:[#allocation7 + $0x14f8] sm:$0xff] }
 0x2a6   : > { %2989 = vmatpush.msrb.mxu1 %v2526_v7  ;;  %2933 = vmatpush.msra.mxu2 %v2573_v8  ;;  %v2328_v15 = vadd.f32 %v2327_v26, %v3685_v25  ;;  %v2637_v25 = vld [vmem:[#allocation7 + $0x1630] sm:$0xff]  ;;  %v2674_v53 = vld [vmem:[#allocation7 + $0x1758] sm:$0xff] }
 0x2a7   : > { %2950 = vmatpush.msra.mxu3 %v2649_v17  ;;  %2973 = vmatpush.msrb.mxu0 %v2446_v4  ;;  %v2387_v38 = vpop.f32.mrf.mxu1  ;;  %v2670_v55 = vld [vmem:[#allocation7 + $0x1738] sm:$0xff] }
 0x2a8   : > { %2990 = vmatpush.msrb.mxu1 %v2522_v54  ;;  %2934 = vmatpush.msra.mxu2 %v2569_v11  ;;  %v3701_v33 = vadd.f32 %v2387_v38, %v2368_v2  ;;  %v2590_v57 = vld [vmem:[#allocation7 + $0x14b8] sm:$0xff] }
 0x2a9   : > { %2951 = vmatpush.msra.mxu3 %v2645_v14  ;;  %2974 = vmatpush.msrb.mxu0 %v2442_v27  ;;  %v2666_v39 = vld [vmem:[#allocation7 + $0x1718] sm:$0xff]  ;;  %v1828_v27 = vadd.f32 %v3619_v30, %v3617_v5 }
 0x2aa   : > { %2991 = vmatpush.msrb.mxu1 %v2518_v23  ;;  %2935 = vmatmul.f32.vlgmr.msra.gmra.mxu2 %v3667_v40  ;;  %v2586_v13 = vld [vmem:[#allocation7 + $0x1498] sm:$0xff] }
 0x2ab   : > { %2975 = vmatmul.f32.vlgmr.msrb.gmra.mxu0 %v3656_v18  ;;  %2999 = vmatpush.msrb.mxu2 %v2630_v22  ;;  %v2614_v18 = vld [vmem:[#allocation7 + $0x1578] sm:$0xff] }
 0x2ac   : > { %2952 = vmatpush.msra.mxu3 %v2641_v34  ;;  %2992 = vmatpush.msrb.mxu1 %v2514_v6  ;;  %v2347_v42 = vpop.f32.mrf.mxu3  ;;  %v2662_v58 = vld [vmem:[#allocation7 + $0x16f8] sm:$0xff] }
 0x2ad   : > { %3000 = vmatpush.msrb.mxu2 %v2626_v35  ;;  %v3705_v28 = vadd.f32 %v2347_v42, %v2328_v15  ;;  %v2582_v19 = vld [vmem:[#allocation7 + $0x1478] sm:$0xff]  ;;  %v1848_v15 = vadd.f32 %v3631_v62, %v1828_v27  ;;  %v3043_v35 = vld [vmem:[#allocation8] sm:$0xf] }
 0x2ae   : > { %2953 = vmatpush.msra.mxu3 %v2637_v25  ;;  %2993 = vmatpush.msrb.mxu1 %v2510_v41  ;;  %v2658_v59 = vld [vmem:[#allocation7 + $0x16d8] sm:$0xff]  ;;  %v3045_v62 = vperm.slane %v3043_v35, 0 }
 0x2af   : > { %3001 = vmatpush.msrb.mxu2 %v2622_v10  ;;  %v2578_v60 = vld [vmem:[#allocation7 + $0x1458] sm:$0xff]  ;;  %v1868_v23 = vadd.f32 %v3637_v31, %v1848_v15 }
 0x2b0   : > { %2954 = vmatpush.msra.mxu3 %v2633_v43  ;;  %2994 = vmatpush.msrb.mxu1 %v2506_v63  ;;  %v2654_v61 = vld [vmem:[#allocation7 + $0x16b8] sm:$0xff] }
 0x2b1   : > { %2955 = vmatmul.f32.vlgmr.msra.gmra.mxu3 %v3672_v24  ;;  %2995 = vmatmul.f32.vlgmr.msrb.gmra.mxu1 %v3663_v37  ;;  %v2594_v37 = vld [vmem:[#allocation7 + $0x14d8] sm:$0xff] }
 0x2b2   : > { %3002 = vmatpush.msrb.mxu2 %v2618_v44  ;;  %3019 = vmatpush.msrb.mxu3 %v2694_v9  ;;  %v2574_v2 = vld [vmem:[#allocation7 + $0x1438] sm:$0xff] }
 0x2b3   : > { %v2650_v29 = vld [vmem:[#allocation7 + $0x1698] sm:$0xff] }
 0x2b4   : > { %3003 = vmatpush.msrb.mxu2 %v2614_v18  ;;  %3020 = vmatpush.msrb.mxu3 %v2690_v45  ;;  %v2570_v3 = vld [vmem:[#allocation7 + $0x1418] sm:$0xff] }
 0x2b5   : > { %v2646_v7 = vld [vmem:[#allocation7 + $0x1678] sm:$0xff] }
 0x2b6   : > { %3004 = vmatpush.msrb.mxu2 %v2610_v46  ;;  %3021 = vmatpush.msrb.mxu3 %v2686_v47  ;;  %v2642_v4 = vld [vmem:[#allocation7 + $0x1658] sm:$0xff]  ;;  %v3046_v47 = vperm.slane %v3043_v35, 1 }
 0x2b7   : > { %v2638_v54 = vld [vmem:[#allocation7 + $0x1638] sm:$0xff] }
 0x2b8   : > { %3005 = vmatpush.msrb.mxu2 %v2606_v48  ;;  %3022 = vmatpush.msrb.mxu3 %v2682_v32  ;;  %v2634_v11 = vld [vmem:[#allocation7 + $0x1618] sm:$0xff] }
 0x2ba   : > { %3006 = vmatpush.msrb.mxu2 %v2602_v50  ;;  %3023 = vmatpush.msrb.mxu3 %v2678_v51 }
 0x2bc   : > { %3007 = vmatpush.msrb.mxu2 %v2598_v0  ;;  %3024 = vmatpush.msrb.mxu3 %v2674_v53 }
 0x2be   : > { %3008 = vmatpush.msrb.mxu2 %v2594_v37  ;;  %3025 = vmatpush.msrb.mxu3 %v2670_v55  ;;  %v3047_v55 = vperm.slane %v3043_v35, 2 }
 0x2c0   : > { %3009 = vmatpush.msrb.mxu2 %v2590_v57  ;;  %3026 = vmatpush.msrb.mxu3 %v2666_v39 }
 0x2c2   : > { %3010 = vmatpush.msrb.mxu2 %v2586_v13  ;;  %3027 = vmatpush.msrb.mxu3 %v2662_v58  ;;  %v2736_v22 = vpop.f32.mrf.mxu0 }
 0x2c4   : > { %3011 = vmatpush.msrb.mxu2 %v2582_v19  ;;  %3028 = vmatpush.msrb.mxu3 %v2658_v59 }
 0x2c6   : > { %3012 = vmatpush.msrb.mxu2 %v2578_v60  ;;  %3029 = vmatpush.msrb.mxu3 %v2654_v61 }
 0x2c7   : > { %v2407_v8 = vpop.f32.mrf.mxu2 }
 0x2c8   : > { %3013 = vmatpush.msrb.mxu2 %v2574_v2  ;;  %3030 = vmatpush.msrb.mxu3 %v2650_v29  ;;  %v2408_v17 = vadd.f32 %v2407_v8, %v3701_v33  ;;  %v3048_v2 = vperm.slane %v3043_v35, 3 }
 0x2c9   : > { %v2756_v38 = vpop.f32.mrf.mxu1 }
 0x2ca   : > { %3014 = vmatpush.msrb.mxu2 %v2570_v3  ;;  %3031 = vmatpush.msrb.mxu3 %v2646_v7  ;;  %v2757_v6 = vadd.f32 %v2756_v38, %v2736_v22 }
 0x2cb   : > { %3015 = vmatmul.f32.vlgmr.msrb.gmra.mxu2 %v3667_v40  ;;  %v2128_v40 = vadd.f32 %v3675_v56, %v1868_v23 }
 0x2cc   : > { %3032 = vmatpush.msrb.mxu3 %v2642_v4 }
 0x2cd   : > { %v2148_v34 = vadd.f32 %v3678_v12, %v2128_v40 }
 0x2ce   : > { %3033 = vmatpush.msrb.mxu3 %v2638_v54  ;;  %v2427_v26 = vpop.f32.mrf.mxu3 }
 0x2cf   : > { %v2428_v14 = vadd.f32 %v2427_v26, %v2408_v17  ;;  %v2168_v25 = vadd.f32 %v3691_v20, %v2148_v34  ;;  %v2208_v20 = vadd.f32 %v3680_v21, %v3642_v1 }
 0x2d0   : > { %3034 = vmatpush.msrb.mxu3 %v2634_v11 }
 0x2d1   : > { %3035 = vmatmul.f32.vlgmr.msrb.gmra.mxu3 %v3672_v24  ;;  %v2188_v5 = vadd.f32 %v3693_v49, %v2168_v25  ;;  %v2228_v43 = vadd.f32 %v3682_v36, %v2208_v20 }
 0x2d3   : > { %v2248_v44 = vadd.f32 %v3695_v52, %v2228_v43 }
 0x2d5   : > { %v2268_v45 = vadd.f32 %v3698_v16, %v2248_v44 }
 0x2e4   : > { %v2816_v42 = vpop.f32.mrf.mxu0 }
 0x2e9   : > { %v2776_v33 = vpop.f32.mrf.mxu2 }
 0x2ea   : > { %v2777_v24 = vadd.f32 %v2776_v33, %v2757_v6 }
 0x2eb   : > { %v2836_v12 = vpop.f32.mrf.mxu1 }
 0x2ec   : > { %v2837_v63 = vadd.f32 %v2836_v12, %v2816_v42 }
 0x2f0   : > { %v2796_v41 = vpop.f32.mrf.mxu3 }
 0x2f1   : > { %v2797_v30 = vadd.f32 %v2796_v41, %v2777_v24 }
 0x2f3   : > { %v3039_v10 = vadd.f32 %v2797_v30, %v2188_v5 }
 0x2f5   : > { %v3053_v31 = vadd.f32 %v3045_v62, %v3039_v10 }
 0x2f7   : > { %v3057_v56 = vmax.f32 %v3053_v31, 0.0 }
 0x2f9   : > { %3061 = vst [vmem:[%s3725_s27] sm:$0xff] %v3057_v56 }
 0x306   : > { %v2896_v1 = vpop.f32.mrf.mxu0 }
 0x30b   : > { %v2856_v49 = vpop.f32.mrf.mxu2 }
 0x30c   : > { %v2857_v9 = vadd.f32 %v2856_v49, %v2837_v63 }
 0x30d   : > { %v2916_v51 = vpop.f32.mrf.mxu1 }
 0x30e   : > { %v2917_v0 = vadd.f32 %v2916_v51, %v2896_v1 }
 0x312   : > { %v2876_v18 = vpop.f32.mrf.mxu3 }
 0x313   : > { %v2877_v46 = vadd.f32 %v2876_v18, %v2857_v9 }
 0x315   : > { %v3040_v48 = vadd.f32 %v2877_v46, %v2268_v45 }
 0x317   : > { %v3054_v32 = vadd.f32 %v3046_v47, %v3040_v48 }
 0x319   : > { %v3058_v50 = vmax.f32 %v3054_v32, 0.0 }
 0x31b   : > { %3062 = vst [vmem:[%s3725_s27 + $0x8] sm:$0xff] %v3058_v50 }
 0x328   : > { %v2976_v13 = vpop.f32.mrf.mxu0 }
 0x32d   : > { %v2936_v21 = vpop.f32.mrf.mxu2 }
 0x32e   : > { %v2937_v53 = vadd.f32 %v2936_v21, %v2917_v0  ;;  %v2996_v39 = vpop.f32.mrf.mxu1 }
 0x32f   : > { %v2997_v19 = vadd.f32 %v2996_v39, %v2976_v13 }
 0x334   : > { %v2956_v36 = vpop.f32.mrf.mxu3 }
 0x335   : > { %v2957_v37 = vadd.f32 %v2956_v36, %v2937_v53 }
 0x337   : > { %v3041_v52 = vadd.f32 %v2957_v37, %v3705_v28 }
 0x339   : > { %v3055_v57 = vadd.f32 %v3047_v55, %v3041_v52 }
 0x33b   : > { %v3059_v16 = vmax.f32 %v3055_v57, 0.0 }
 0x33d   : > { %3063 = vst [vmem:[%s3725_s27 + $0x10] sm:$0xff] %v3059_v16 }
 0x34e   : > { %v3016_v58 = vpop.f32.mrf.mxu2 }
 0x34f   : > { %v3017_v59 = vadd.f32 %v3016_v58, %v2997_v19 }
 0x354   : > { %v3036_v60 = vpop.f32.mrf.mxu3 }
 0x355   : > { %v3037_v61 = vadd.f32 %v3036_v60, %v3017_v59 }
 0x357   : > { %v3042_v29 = vadd.f32 %v3037_v61, %v2428_v14 }
 0x359   : > { %v3056_v3 = vadd.f32 %v3048_v2, %v3042_v29 }
 0x35b   : > { %v3060_v7 = vmax.f32 %v3056_v3, 0.0 }
 0x35d   : > { %3064 = vst [vmem:[%s3725_s27 + $0x18] sm:$0xff] %v3060_v7 }
 0x35e PF: > { %s18_s18 = sadd.s32 1, %s3372_s18  }
 0x35f   : > { %p15_p7 = scmp.ge.s32.totalorder %s18_s18, 4  }
 0x361   :  { %17 = sbr.rel (!%p15_p7) target bundleno = 3 (0x3), region = 92 }
 0x366   :  { %3086 = vsyncpa [#allocation4], 1 }
 0x367   :  { %3088 = vsyncpa [#allocation4 + $0x1], 1 }
 0x368   :  { %3089 = vsyncpa [#allocation6], 1 }
 0x369   :  { %3090 = vsyncpa [#allocation9], 1 }

</bundles_post_ra>
